<compile_context>
chip_gen: v7x
topology: tpu7x:2x2x1
jax: 0.10.0
libtpu: 0.0.40
codegen_flags: <defaults>
</compile_context>

<pallas_src>
import functools

import jax
import jax.numpy as jnp
from jax.experimental import pallas as pl
from jax.experimental.pallas import tpu as pltpu


def _softplus(x):
    # matches torch.nn.functional.softplus (beta=1, threshold=20)
    return jnp.where(x > 20.0, x, jnp.log1p(jnp.exp(jnp.minimum(x, 20.0))))


def cc_attention_kernel(x_ref, wf_ref, bf_ref, gamma_ref, o_ref, *, H, W, Cq):
    C = x_ref.shape[1]
    HW = H * W
    bf16 = jnp.bfloat16
    f32 = jnp.float32

    x_cf = x_ref[0]                        # (C, H*W) f32 — NCHW block, channel-first
    x_t = x_cf.T                           # (H*W, C) — single in-VMEM relayout

    # Fused V|Q|K projection: one MXU push, bf16 inputs, f32 accumulation, f32 bias add.
    qkv = jnp.dot(x_t.astype(bf16), wf_ref[...].astype(bf16),
                  preferred_element_type=f32) + bf_ref[...]         # (H*W, C + 2*Cq) f32

    v = qkv[:, :C]                         # V columns first: wide slice starts at lane 0
    qk = _softplus(qkv[:, C:])             # softplus only on the Q|K columns (2*Cq wide)

    v_hw = v.reshape(H, W, C)              # free sublane-major split
    qk_hw = qk.reshape(H, W, 2 * Cq)
    v_wh = jnp.transpose(v_hw, (1, 0, 2))  # (W, H, C)  — feeds the "height" branch
    qk_wh = jnp.transpose(qk_hw, (1, 0, 2))

    spq_hw, spk_hw = qk_hw[..., :Cq], qk_hw[..., Cq:]   # (H, W, Cq) each
    spq_wh, spk_wh = qk_wh[..., :Cq], qk_wh[..., Cq:]   # (W, H, Cq) each

    # No softmax between the two bmms in the reference, so the contraction is
    # associative: out = spQ @ (spK^T @ V).  This avoids the (H,W,W)/(W,H,H) energy
    # tensors entirely and keeps every dot batch-leading for the MXU.

    # ---- width branch: attention along W within each row h (batch dim h leading) ----
    kv_w = jnp.einsum('hkq,hkc->hqc', spk_hw.astype(bf16), v_hw.astype(bf16),
                      preferred_element_type=f32)                    # (H, Cq, C)
    out_w = jnp.einsum('hwq,hqc->hwc', spq_hw.astype(bf16), kv_w.astype(bf16),
                       preferred_element_type=f32)                   # (H, W, C)

    # ---- height branch: identical contraction on the (W, H, .) views ----
    kv_h = jnp.einsum('wkq,wkc->wqc', spk_wh.astype(bf16), v_wh.astype(bf16),
                      preferred_element_type=f32)                    # (W, Cq, C)
    out_h = jnp.einsum('whq,wqc->whc', spq_wh.astype(bf16), kv_h.astype(bf16),
                       preferred_element_type=f32)                   # (W, H, C)

    # INF(): -inf on the i == i' diagonal of energy_H; with no softmax it contributes
    # (-inf) * V at the same spatial position — added elementwise in f32 (IEEE-equivalent
    # to carrying the -inf through the bmm).
    out_h = jnp.transpose(out_h, (1, 0, 2)) + f32(-jnp.inf) * v_hw   # (H, W, C)

    gamma = gamma_ref[0]                                             # scalar from SMEM
    res = (gamma * (out_h + out_w)).reshape(HW, C) + x_t             # f32 residual add
    o_ref[0] = res.T.astype(o_ref.dtype)                             # back to (C, H*W) == NCHW


@jax.jit
def cc_attention(x_nchw, params):
    """Criss-cross attention forward.  x_nchw: (B, C, H, W) float32 -> (B, C, H, W)."""
    B, C, H, W = x_nchw.shape
    Cq = params["wq"].shape[1]
    Ctot = C + 2 * Cq
    HW = H * W

    # Fuse the three 1x1 projections into one (C, C + 2*Cq) weight / (1, C + 2*Cq) bias,
    # V first so its columns start at lane 0 inside the kernel.
    # (In a real model these would be pre-fused once, outside the hot path.)
    wf = jnp.concatenate([params["wv"], params["wq"], params["wk"]], axis=1)
    bf = jnp.concatenate([params["bv"], params["bq"], params["bk"]], axis=1)
    gamma = params["gamma"].reshape((1,)).astype(jnp.float32)

    x2 = x_nchw.reshape(B, C, HW)          # free reshape; last dim H*W is lane-dense

    kernel = functools.partial(cc_attention_kernel, H=H, W=W, Cq=Cq)
    out = pl.pallas_call(
        kernel,
        out_shape=jax.ShapeDtypeStruct((B, C, HW), x_nchw.dtype),
        grid=(B,),
        in_specs=[
            pl.BlockSpec((1, C, HW), lambda b: (b, 0, 0)),          # x: one image / step
            pl.BlockSpec((C, Ctot), lambda b: (0, 0)),              # fused Wv|Wq|Wk
            pl.BlockSpec((1, Ctot), lambda b: (0, 0)),              # fused bv|bq|bk
            pl.BlockSpec(memory_space=pltpu.MemorySpace.SMEM),      # gamma (scalar)
        ],
        out_specs=pl.BlockSpec((1, C, HW), lambda b: (b, 0, 0)),
        compiler_params=pltpu.CompilerParams(
            dimension_semantics=("parallel",)),    # v7x: one image per TensorCore
    )(x2, wf, bf, gamma)

    return out.reshape(B, C, H, W)


if __name__ == "__main__":
    key = jax.random.PRNGKey(0)
    B, C, H, W = 2, 64, 16, 16        # in_dim=64 -> query/key channels = in_dim // 8 = 8
    Cq = C // 8

    ks = jax.random.split(key, 7)
    x = jax.random.normal(ks[0], (B, C, H, W), jnp.float32)

    # Deterministic synthetic parameters (shapes match the module's __init__).
    # Conv weights stored pre-transposed as (C_in, C_out) for y = x @ W + b.
    params = dict(
        wq=0.1 * jax.random.normal(ks[1], (C, Cq), jnp.float32),
        bq=0.1 * jax.random.normal(ks[2], (1, Cq), jnp.float32),
        wk=0.1 * jax.random.normal(ks[3], (C, Cq), jnp.float32),
        bk=0.1 * jax.random.normal(ks[4], (1, Cq), jnp.float32),
        wv=0.1 * jax.random.normal(ks[5], (C, C), jnp.float32),
        bv=0.1 * jax.random.normal(ks[6], (1, C), jnp.float32),
        gamma=jnp.zeros((1,), jnp.float32),    # matches nn.Parameter(torch.zeros(1))
    )

    out = cc_attention(x, params)
    jax.block_until_ready(out)
    assert out.shape == (B, C, H, W) and out.dtype == jnp.float32
    # NOTE: the reference adds -inf via INF() but never applies softmax, so with
    # gamma == 0 the output is NaN everywhere — faithfully reproduced here.
    print("KERNEL_OK")
</pallas_src>

<mosaic_0001>
module attributes {stable_mosaic.version = 11 : i64} {
  func.func @cc_attention_kernel(%arg0: i32, %arg1: memref<1x64x256xf32, #tpu.memory_space<vmem>>, %arg2: memref<64x80xf32, #tpu.memory_space<vmem>>, %arg3: memref<1x80xf32, #tpu.memory_space<vmem>>, %arg4: memref<1xf32, #tpu.memory_space<smem>>, %arg5: memref<1x64x256xf32, #tpu.memory_space<vmem>>) attributes {dimension_semantics = [#tpu.dimension_semantics<parallel>], iteration_bounds = array<i64: 2>, scalar_prefetch = 0 : i64, scratch_operands = 0 : i64, tpu.core_type = #tpu.core_type<tc>, window_params = [{transform_indices = @transform_0, window_bounds = array<i64: 1, 64, 256>}, {pipeline_mode = #tpu.pipeline_mode<synchronous>, transform_indices = @transform_1, window_bounds = array<i64: 64, 80>}, {pipeline_mode = #tpu.pipeline_mode<synchronous>, transform_indices = @transform_2, window_bounds = array<i64: 1, 80>}, {transform_indices = @transform_3, window_bounds = array<i64: 1>}, {transform_indices = @transform_4, window_bounds = array<i64: 1, 64, 256>}]} {
    %c0 = arith.constant 0 : index
    %c0_0 = arith.constant 0 : index
    %c0_1 = arith.constant 0 : index
    %0 = vector.load %arg1[%c0, %c0_0, %c0_1] : memref<1x64x256xf32, #tpu.memory_space<vmem>>, vector<1x64x256xf32>
    %1 = vector.shape_cast %0 : vector<1x64x256xf32> to vector<64x256xf32>
    %2 = tpu.transpose %1, [1, 0] : vector<64x256xf32> -> vector<256x64xf32>
    %3 = arith.truncf %2 : vector<256x64xf32> to vector<256x64xbf16>
    %c0_2 = arith.constant 0 : index
    %c0_3 = arith.constant 0 : index
    %4 = vector.load %arg2[%c0_2, %c0_3] : memref<64x80xf32, #tpu.memory_space<vmem>>, vector<64x80xf32>
    %5 = arith.truncf %4 : vector<64x80xf32> to vector<64x80xbf16>
    %cst = arith.constant dense<0.000000e+00> : vector<256x80xf32>
    %6 = tpu.matmul %3, %5, %cst {dimension_numbers = #tpu.dot_dimension_numbers<[1], [0], [0], [1], [0, 0, 1, 1], [], []>} : vector<256x64xbf16>, vector<64x80xbf16>, vector<256x80xf32> -> vector<256x80xf32>
    %c0_4 = arith.constant 0 : index
    %c0_5 = arith.constant 0 : index
    %7 = vector.load %arg3[%c0_4, %c0_5] : memref<1x80xf32, #tpu.memory_space<vmem>>, vector<1x80xf32>
    %8 = vector.broadcast %7 : vector<1x80xf32> to vector<256x80xf32>
    %9 = arith.addf %6, %8 : vector<256x80xf32>
    %10 = vector.extract_strided_slice %9 {offsets = [0, 0], sizes = [256, 64], strides = [1, 1]} : vector<256x80xf32> to vector<256x64xf32>
    %11 = vector.extract_strided_slice %9 {offsets = [0, 64], sizes = [256, 16], strides = [1, 1]} : vector<256x80xf32> to vector<256x16xf32>
    %cst_6 = arith.constant 2.000000e+01 : f32
    %12 = vector.broadcast %cst_6 : f32 to vector<256x16xf32>
    %13 = arith.cmpf ogt, %11, %12 : vector<256x16xf32>
    %cst_7 = arith.constant 2.000000e+01 : f32
    %14 = vector.broadcast %cst_7 : f32 to vector<256x16xf32>
    %15 = arith.minimumf %11, %14 : vector<256x16xf32>
    %16 = math.exp %15 : vector<256x16xf32>
    %17 = math.log1p %16 : vector<256x16xf32>
    %18 = arith.select %13, %11, %17 : vector<256x16xi1>, vector<256x16xf32>
    %19 = vector.shape_cast %10 : vector<256x64xf32> to vector<16x16x64xf32>
    %20 = vector.shape_cast %18 : vector<256x16xf32> to vector<16x16x16xf32>
    %21 = tpu.transpose %19, [1, 0, 2] : vector<16x16x64xf32> -> vector<16x16x64xf32>
    %22 = tpu.transpose %20, [1, 0, 2] : vector<16x16x16xf32> -> vector<16x16x16xf32>
    %23 = vector.extract_strided_slice %20 {offsets = [0, 0, 0], sizes = [16, 16, 8], strides = [1, 1, 1]} : vector<16x16x16xf32> to vector<16x16x8xf32>
    %24 = vector.extract_strided_slice %20 {offsets = [0, 0, 8], sizes = [16, 16, 8], strides = [1, 1, 1]} : vector<16x16x16xf32> to vector<16x16x8xf32>
    %25 = vector.extract_strided_slice %22 {offsets = [0, 0, 0], sizes = [16, 16, 8], strides = [1, 1, 1]} : vector<16x16x16xf32> to vector<16x16x8xf32>
    %26 = vector.extract_strided_slice %22 {offsets = [0, 0, 8], sizes = [16, 16, 8], strides = [1, 1, 1]} : vector<16x16x16xf32> to vector<16x16x8xf32>
    %27 = arith.truncf %24 : vector<16x16x8xf32> to vector<16x16x8xbf16>
    %28 = arith.truncf %19 : vector<16x16x64xf32> to vector<16x16x64xbf16>
    "tpu.trace_start"() <{level = 10 : i32, message = "hkq,hkc->hqc"}> : () -> ()
    %cst_8 = arith.constant dense<0.000000e+00> : vector<16x8x64xf32>
    %29 = tpu.matmul %27, %28, %cst_8 {dimension_numbers = #tpu.dot_dimension_numbers<[1], [1], [2], [2], [0, 0, 0, 2, 1, 2], [0], [0]>} : vector<16x16x8xbf16>, vector<16x16x64xbf16>, vector<16x8x64xf32> -> vector<16x8x64xf32>
    "tpu.trace_stop"() : () -> ()
    %30 = arith.truncf %23 : vector<16x16x8xf32> to vector<16x16x8xbf16>
    %31 = arith.truncf %29 : vector<16x8x64xf32> to vector<16x8x64xbf16>
    "tpu.trace_start"() <{level = 10 : i32, message = "hwq,hqc->hwc"}> : () -> ()
    %cst_9 = arith.constant dense<0.000000e+00> : vector<16x16x64xf32>
    %32 = tpu.matmul %30, %31, %cst_9 {dimension_numbers = #tpu.dot_dimension_numbers<[2], [1], [1], [2], [0, 0, 0, 1, 1, 2], [0], [0]>} : vector<16x16x8xbf16>, vector<16x8x64xbf16>, vector<16x16x64xf32> -> vector<16x16x64xf32>
    "tpu.trace_stop"() : () -> ()
    %33 = arith.truncf %26 : vector<16x16x8xf32> to vector<16x16x8xbf16>
    %34 = arith.truncf %21 : vector<16x16x64xf32> to vector<16x16x64xbf16>
    "tpu.trace_start"() <{level = 10 : i32, message = "wkq,wkc->wqc"}> : () -> ()
    %cst_10 = arith.constant dense<0.000000e+00> : vector<16x8x64xf32>
    %35 = tpu.matmul %33, %34, %cst_10 {dimension_numbers = #tpu.dot_dimension_numbers<[1], [1], [2], [2], [0, 0, 0, 2, 1, 2], [0], [0]>} : vector<16x16x8xbf16>, vector<16x16x64xbf16>, vector<16x8x64xf32> -> vector<16x8x64xf32>
    "tpu.trace_stop"() : () -> ()
    %36 = arith.truncf %25 : vector<16x16x8xf32> to vector<16x16x8xbf16>
    %37 = arith.truncf %35 : vector<16x8x64xf32> to vector<16x8x64xbf16>
    "tpu.trace_start"() <{level = 10 : i32, message = "whq,wqc->whc"}> : () -> ()
    %cst_11 = arith.constant dense<0.000000e+00> : vector<16x16x64xf32>
    %38 = tpu.matmul %36, %37, %cst_11 {dimension_numbers = #tpu.dot_dimension_numbers<[2], [1], [1], [2], [0, 0, 0, 1, 1, 2], [0], [0]>} : vector<16x16x8xbf16>, vector<16x8x64xbf16>, vector<16x16x64xf32> -> vector<16x16x64xf32>
    "tpu.trace_stop"() : () -> ()
    %39 = tpu.transpose %38, [1, 0, 2] : vector<16x16x64xf32> -> vector<16x16x64xf32>
    %cst_12 = arith.constant 0xFF800000 : f32
    %40 = vector.broadcast %cst_12 : f32 to vector<16x16x64xf32>
    %41 = arith.mulf %40, %19 : vector<16x16x64xf32>
    %42 = arith.addf %39, %41 : vector<16x16x64xf32>
    %c0_13 = arith.constant 0 : index
    %43 = memref.load %arg4[%c0_13] : memref<1xf32, #tpu.memory_space<smem>>
    %44 = arith.addf %42, %32 : vector<16x16x64xf32>
    %45 = vector.broadcast %43 : f32 to vector<16x16x64xf32>
    %46 = arith.mulf %45, %44 : vector<16x16x64xf32>
    %47 = vector.shape_cast %46 : vector<16x16x64xf32> to vector<256x64xf32>
    %48 = arith.addf %47, %2 : vector<256x64xf32>
    %49 = tpu.transpose %48, [1, 0] : vector<256x64xf32> -> vector<64x256xf32>
    %c0_14 = arith.constant 0 : index
    %c0_15 = arith.constant 0 : index
    %c0_16 = arith.constant 0 : index
    %50 = vector.load %arg5[%c0_14, %c0_15, %c0_16] : memref<1x64x256xf32, #tpu.memory_space<vmem>>, vector<1x64x256xf32>
    %51 = vector.shape_cast %50 : vector<1x64x256xf32> to vector<64x256xf32>
    %52 = vector.shape_cast %49 : vector<64x256xf32> to vector<1x64x256xf32>
    tpu.vector_store %arg5[%c0_14, %c0_15, %c0_16], %52 {strides = array<i32>} : memref<1x64x256xf32, #tpu.memory_space<vmem>>, vector<1x64x256xf32>,
    return
  }
  func.func @transform_0(%arg0: i32) -> (i32, i32, i32) {
    %c0_i32 = arith.constant 0 : i32
    %c0_i32_0 = arith.constant 0 : i32
    %c0_i32_1 = arith.constant 0 : i32
    return %arg0, %c0_i32, %c0_i32_0 : i32, i32, i32
  }
  func.func @transform_1(%arg0: i32) -> (i32, i32) {
    %c0_i32 = arith.constant 0 : i32
    %c0_i32_0 = arith.constant 0 : i32
    %c0_i32_1 = arith.constant 0 : i32
    return %c0_i32, %c0_i32_0 : i32, i32
  }
  func.func @transform_2(%arg0: i32) -> (i32, i32) {
    %c0_i32 = arith.constant 0 : i32
    %c0_i32_0 = arith.constant 0 : i32
    %c0_i32_1 = arith.constant 0 : i32
    return %c0_i32, %c0_i32_0 : i32, i32
  }
  func.func @transform_3(%arg0: i32) -> i32 {
    %c0_i32 = arith.constant 0 : i32
    %c0_i32_0 = arith.constant 0 : i32
    return %c0_i32 : i32
  }
  func.func @transform_4(%arg0: i32) -> (i32, i32, i32) {
    %c0_i32 = arith.constant 0 : i32
    %c0_i32_0 = arith.constant 0 : i32
    %c0_i32_1 = arith.constant 0 : i32
    return %arg0, %c0_i32, %c0_i32_0 : i32, i32, i32
  }
}

</mosaic_0001>

<bundles_post_ra>
// kernel: cc_attention.1
= control target key start
LH: loop header
LB: loop body
LE: loop exit
PB: predicated region body
PF: predicated region fallthrough
CT: control target
= control target key end

     0   :  { %s7535_s17 = smov 0   ;;  %s9798_s0 = inlined_call_operand.vmem [shape: f32[2,64,256], index: 0, kind: input, shape index: {}]   ;;  %s9799_s1 = inlined_call_operand.vmem [shape: f32[64,80], index: 1, kind: input, shape index: {}]   ;;  %s9800_s2 = inlined_call_operand.vmem [shape: f32[1,80], index: 2, kind: input, shape index: {}]   ;;  %s9801_s3 = inlined_call_operand.<no memory space> [shape: f32[1], index: 3, kind: input, shape index: {}]   ;;  %s9802_s4 = inlined_call_operand.vmem [shape: f32[2,64,256], index: 4, kind: output, shape index: {}]  }
   0x1   :  { %9 = sst [smem:[#allocation2]] %s9801_s3 }
   0x2 LB: > { %s6681_s18 = sadd.s32 4294967295, %s7498_s17   ;;  %p6685_p0 = scmp.ge.s32.totalorder %s7498_s17, 1  ;;  %s7498_s17 = sphi %s7535_s17, %s15_s17  }
   0x3   : > { %p163_p1 = scmp.lt.s32.totalorder %s7498_s17, 3 }
   0x5   : > { %p164_p2 = pnand %p6685_p0, %p163_p1 }
   0x7   : > { %167 = sbr.rel (%p164_p2) target bundleno = 1725 (0x6bd), region = 36 }
   0xe   : > { %p189_p3 = scmp.lt.s32.totalorder %s6681_s18, 1  ;;  %v296_v0 = vld [vmem:[%s9799_s1] sm:$0xff]  ;;  %v297_v1 = vld [vmem:[%s9799_s1 + $0x8] sm:$0xff]  ;;  %v298_v7 = vld [vmem:[%s9799_s1 + $0x10] sm:$0xff]  ;;  %vm315_vm0 = vcmask 523264   ;;  %s7501_s14 = smov 56  }
   0xf   : > { %v304_v2 = vpack.c.bf16 %v297_v1, %v296_v0  ;;  %v299_v8 = vld [vmem:[%s9799_s1 + $0x18] sm:$0xff]  ;;  %v300_v11 = vld [vmem:[%s9799_s1 + $0x20] sm:$0xff]  ;;  %v301_v12 = vld [vmem:[%s9799_s1 + $0x28] sm:$0xff]  ;;  %s7503_s19 = smov 64   ;;  %s7506_s20 = smov 120  }
  0x10   : > { %s10191_s18 = smov (!%p189_p3, %s6681_s18), 1  ;;  %v305_v10 = vpack.c.bf16 %v299_v8, %v298_v7  ;;  %v306_v13 = vpack.c.bf16 %v301_v12, %v300_v11  ;;  %v302_v15 = vld [vmem:[%s9799_s1 + $0x30] sm:$0xff]  ;;  %v303_v16 = vld [vmem:[%s9799_s1 + $0x38] sm:$0xff]  ;;  %v9803_v12 = vmov 0.0   ;;  %s6448_s3 = sld [smem:[#allocation2]] }
  0x11   : > { %6923 = vmatprep.subr.bf16.mxu0 %v304_v2  ;;  %s6773_s22 = sshll.u32 %s10191_s18, 7  ;;  %v307_v18 = vpack.c.bf16 %v303_v16, %v302_v15  ;;  %6963 = vmatprep.subr.bf16.mxu1 %v9803_v12 }
  0x12   : > { %6924 = vmatpush3.bf16.msra.mxu0 %v304_v2  ;;  %s7557_s25 = scalar_lea.vmem %s9798_s0, %s6773_s22  ;;  %s9777_s24 = scalar_lea.vmem %s9802_s4, %s6773_s22 }
  0x13   : > { %v200_v3 = vld [vmem:[%s7557_s25] sm:$0xff]  ;;  %v202_v4 = vld [vmem:[%s7557_s25 + $0x10] sm:$0xff]  ;;  %v201_v5 = vld [vmem:[%s7557_s25 + $0x8] sm:$0xff]  ;;  %6925 = vmatprep.subr.bf16.mxu0 %v305_v10 }
  0x14   : > { %216 = vxpose.xlu0.b32.start [1/8] (short) %v200_v3, 128  ;;  %248 = vxpose.xlu1.b32.start [1/8] (short) %v201_v5, 128  ;;  %v203_v6 = vld [vmem:[%s7557_s25 + $0x18] sm:$0xff]  ;;  %v204_v9 = vld [vmem:[%s7557_s25 + $0x20] sm:$0xff]  ;;  %v205_v14 = vld [vmem:[%s7557_s25 + $0x28] sm:$0xff] }
  0x15   : > { %v206_v17 = vld [vmem:[%s7557_s25 + $0x30] sm:$0xff]  ;;  %v207_v19 = vld [vmem:[%s7557_s25 + $0x38] sm:$0xff]  ;;  %v208_v20 = vld [vmem:[%s7557_s25 + $0x40] sm:$0xff] }
  0x16   : > { %6926 = vmatpush3.bf16.msra.mxu0 %v305_v10  ;;  %v209_v21 = vld [vmem:[%s7557_s25 + $0x48] sm:$0xff]  ;;  %v210_v22 = vld [vmem:[%s7557_s25 + $0x50] sm:$0xff]  ;;  %v211_v23 = vld [vmem:[%s7557_s25 + $0x58] sm:$0xff] }
  0x17   : > { %6927 = vmatprep.subr.bf16.mxu0 %v306_v13  ;;  %v212_v24 = vld [vmem:[%s7557_s25 + $0x60] sm:$0xff]  ;;  %v213_v25 = vld [vmem:[%s7557_s25 + $0x68] sm:$0xff]  ;;  %v214_v26 = vld [vmem:[%s7557_s25 + $0x70] sm:$0xff] }
  0x18   : > { %217 = vxpose.xlu0.b32.cont [2/8] (short) %v202_v4, 128  ;;  %249 = vxpose.xlu1.b32.cont [2/8] (short) %v203_v6, 128  ;;  %v215_v27 = vld [vmem:[%s7557_s25 + $0x78] sm:$0xff] }
  0x1a   : > { %6928 = vmatpush3.bf16.msra.mxu0 %v306_v13  ;;  %v7710_v13 = vld [vmem:[%s9800_s2] ss:$0 sm:$0xff] }
  0x1b   : > { %6929 = vmatprep.subr.bf16.mxu0 %v307_v18 }
  0x1c   : > { %218 = vxpose.xlu0.b32.cont [3/8] (short) %v204_v9, 128  ;;  %250 = vxpose.xlu1.b32.cont [3/8] (short) %v205_v14, 128 }
  0x1e   : > { %6930 = vmatpush3.bf16.msra.mxu0 %v307_v18 }
  0x1f   : > { %7023 = vmatprep.subr.bf16.mxu0 %v9803_v12 }
  0x20   : > { %219 = vxpose.xlu0.b32.cont [4/8] (short) %v206_v17, 128  ;;  %251 = vxpose.xlu1.b32.cont [4/8] (short) %v207_v19, 128 }
  0x24   : > { %220 = vxpose.xlu0.b32.cont [5/8] (short) %v208_v20, 128  ;;  %252 = vxpose.xlu1.b32.cont [5/8] (short) %v209_v21, 128 }
  0x28   : > { %221 = vxpose.xlu0.b32.cont [6/8] (short) %v210_v22, 128  ;;  %253 = vxpose.xlu1.b32.cont [6/8] (short) %v211_v23, 128 }
  0x2c   : > { %222 = vxpose.xlu0.b32.cont [7/8] (short) %v212_v24, 128  ;;  %254 = vxpose.xlu1.b32.cont [7/8] (short) %v213_v25, 128 }
  0x30   : > { %223 = vxpose.xlu0.b32.end [8/8] (short) %v214_v26, 128  ;;  %255 = vxpose.xlu1.b32.end [8/8] (short) %v215_v27, 128 }
  0x94   : > { %v7593_v28 = vpop.trf.xlu0  ;;  %v7595_v29 = vpop.trf.xlu1 }
  0x95   : > { %9914 = vst [vmem:[#allocation3_spill] sm:$0xff] %v7593_v28  ;;  %9915 = vst [vmem:[#allocation4_spill] sm:$0xff] %v7595_v29 }
  0x98   : > { %v7597_v30 = vpop.trf.xlu0  ;;  %v7601_v32 = vpop.trf.xlu1 }
  0x99   : > { %9916 = vst [vmem:[#allocation5_spill] sm:$0xff] %v7597_v30  ;;  %v280_v31 = vpack.c.bf16 %v7597_v30, %v7593_v28  ;;  %9917 = vst [vmem:[#allocation6_spill] sm:$0xff] %v7601_v32  ;;  %v288_v61 = vpack.c.bf16 %v7601_v32, %v7595_v29 }
  0x9b   : > { %6931 = vmatprep.mubr.msk.bf16.mxu0 %vm315_vm0, %v280_v31 }
  0x9c   : > { %v7604_v33 = vpop.trf.xlu0  ;;  %v7606_v34 = vpop.trf.xlu1 }
  0x9d   : > { %9918 = vst [vmem:[#allocation7_spill] sm:$0xff] %v7604_v33  ;;  %9919 = vst [vmem:[#allocation8_spill] sm:$0xff] %v7606_v34 }
  0xa0   : > { %v7608_v35 = vpop.trf.xlu0  ;;  %v7615_v38 = vpop.trf.xlu1 }
  0xa1   : > { %9920 = vst [vmem:[#allocation9_spill] sm:$0xff] %v7608_v35  ;;  %v281_v36 = vpack.c.bf16 %v7608_v35, %v7604_v33  ;;  %9922 = vst [vmem:[#allocation11_spill] sm:$0xff] %v7615_v38  ;;  %v289_v1 = vpack.c.bf16 %v7615_v38, %v7606_v34 }
  0xa3   : > { %6932 = vmatmul.mubr.msk.bf16.vlgmr.msra.gmra.mrb[0].mxu0 %vm315_vm0, %v281_v36 }
  0xa4   : > { %v7613_v37 = vpop.trf.xlu0  ;;  %v7621_v41 = vpop.trf.xlu1 }
  0xa5   : > { %9921 = vst [vmem:[#allocation10_spill] sm:$0xff] %v7613_v37  ;;  %9924 = vst [vmem:[#allocation13_spill] sm:$0xff] %v7621_v41 }
  0xa8   : > { %v7617_v39 = vpop.trf.xlu0  ;;  %v7628_v44 = vpop.trf.xlu1 }
  0xa9   : > { %9923 = vst [vmem:[#allocation12_spill] sm:$0xff] %v7617_v39  ;;  %v282_v40 = vpack.c.bf16 %v7617_v39, %v7613_v37  ;;  %9927 = vst [vmem:[#allocation16_spill] sm:$0xff] %v7628_v44  ;;  %v290_v2 = vpack.c.bf16 %v7628_v44, %v7621_v41 }
  0xab   : > { %6935 = vmatprep.mubr.msk.bf16.mxu0 %vm315_vm0, %v282_v40 }
  0xac   : > { %v7624_v42 = vpop.trf.xlu0  ;;  %v7635_v47 = vpop.trf.xlu1 }
  0xad   : > { %9925 = vst [vmem:[#allocation14_spill] sm:$0xff] %v7624_v42  ;;  %9929 = vst [vmem:[#allocation18_spill] sm:$0xff] %v7635_v47 }
  0xb0   : > { %v7626_v43 = vpop.trf.xlu0  ;;  %v7644_v51 = vpop.trf.xlu1 }
  0xb1   : > { %9926 = vst [vmem:[#allocation15_spill] sm:$0xff] %v7626_v43  ;;  %v283_v45 = vpack.c.bf16 %v7626_v43, %v7624_v42  ;;  %9932 = vst [vmem:[#allocation21_spill] sm:$0xff] %v7644_v51  ;;  %v291_v4 = vpack.c.bf16 %v7644_v51, %v7635_v47 }
  0xb3   : > { %6936 = vmatmul.mubr.msk.bf16.gmra.mrb[4].mxu0 %vm315_vm0, %v283_v45 }
  0xb4   : > { %v7633_v46 = vpop.trf.xlu0  ;;  %v7650_v54 = vpop.trf.xlu1 }
  0xb5   : > { %9928 = vst [vmem:[#allocation17_spill] sm:$0xff] %v7633_v46  ;;  %9934 = vst [vmem:[#allocation23_spill] sm:$0xff] %v7650_v54 }
  0xb8   : > { %v7637_v48 = vpop.trf.xlu0  ;;  %v7657_v57 = vpop.trf.xlu1 }
  0xb9   : > { %9930 = vst [vmem:[#allocation19_spill] sm:$0xff] %v7637_v48  ;;  %v284_v49 = vpack.c.bf16 %v7637_v48, %v7633_v46  ;;  %9937 = vst [vmem:[#allocation26_spill] sm:$0xff] %v7657_v57  ;;  %v292_v5 = vpack.c.bf16 %v7657_v57, %v7650_v54 }
  0xbb   : > { %6939 = vmatprep.mubr.msk.bf16.mxu0 %vm315_vm0, %v284_v49 }
  0xbc   : > { %v7642_v50 = vpop.trf.xlu0  ;;  %v7664_v60 = vpop.trf.xlu1 }
  0xbd   : > { %9931 = vst [vmem:[#allocation20_spill] sm:$0xff] %v7642_v50  ;;  %9939 = vst [vmem:[#allocation28_spill] sm:$0xff] %v7664_v60 }
  0xc0   : > { %v7646_v52 = vpop.trf.xlu0  ;;  %v7674_v0 = vpop.trf.xlu1 }
  0xc1   : > { %9933 = vst [vmem:[#allocation22_spill] sm:$0xff] %v7646_v52  ;;  %v285_v53 = vpack.c.bf16 %v7646_v52, %v7642_v50  ;;  %9941 = vst [vmem:[#allocation30_spill] sm:$0xff] %v7674_v0  ;;  %v293_v8 = vpack.c.bf16 %v7674_v0, %v7664_v60 }
  0xc3   : > { %6940 = vmatmul.mubr.msk.bf16.gmra.mrb[8].mxu0 %vm315_vm0, %v285_v53 }
  0xc4   : > { %v7653_v55 = vpop.trf.xlu0  ;;  %v7680_v3 = vpop.trf.xlu1 }
  0xc5   : > { %9935 = vst [vmem:[#allocation24_spill] sm:$0xff] %v7653_v55  ;;  %9942 = vst [vmem:[#allocation31_spill] sm:$0xff] %v7680_v3 }
  0xc8   : > { %v7655_v56 = vpop.trf.xlu0  ;;  %v7688_v6 = vpop.trf.xlu1 }
  0xc9   : > { %9936 = vst [vmem:[#allocation25_spill] sm:$0xff] %v7655_v56  ;;  %v286_v58 = vpack.c.bf16 %v7655_v56, %v7653_v55  ;;  %9943 = vst [vmem:[#allocation32_spill] sm:$0xff] %v7688_v6  ;;  %v294_v9 = vpack.c.bf16 %v7688_v6, %v7680_v3 }
  0xcb   : > { %6943 = vmatprep.mubr.msk.bf16.mxu0 %vm315_vm0, %v286_v58 }
  0xcc   : > { %v7662_v59 = vpop.trf.xlu0  ;;  %v7692_v7 = vpop.trf.xlu1 }
  0xcd   : > { %9938 = vst [vmem:[#allocation27_spill] sm:$0xff] %v7662_v59  ;;  %9944 = vst [vmem:[#allocation33_spill] sm:$0xff] %v7692_v7 }
  0xd0   : > { %v7668_v62 = vpop.trf.xlu0  ;;  %v7699_v10 = vpop.trf.xlu1 }
  0xd1   : > { %9940 = vst [vmem:[#allocation29_spill] sm:$0xff] %v7668_v62  ;;  %v287_v63 = vpack.c.bf16 %v7668_v62, %v7662_v59  ;;  %9945 = vst [vmem:[#allocation34_spill] sm:$0xff] %v7699_v10  ;;  %v295_v11 = vpack.c.bf16 %v7699_v10, %v7692_v7 }
  0xd3   : > { %6944 = vmatmul.mubr.msk.bf16.gmra.mrb[12].mxu0 %vm315_vm0, %v287_v63 }
  0xd4   : > { %6947 = vmatprep.mubr.msk.bf16.mxu0 %vm315_vm0, %v288_v61 }
  0xdb   : > { %6948 = vmatmul.mubr.msk.bf16.gmra.mrb[16].mxu0 %vm315_vm0, %v289_v1 }
  0xdc   : > { %6951 = vmatprep.mubr.msk.bf16.mxu0 %vm315_vm0, %v290_v2 }
  0xe3   : > { %6952 = vmatmul.mubr.msk.bf16.gmra.mrb[20].mxu0 %vm315_vm0, %v291_v4 }
  0xe4   : > { %6955 = vmatprep.mubr.msk.bf16.mxu0 %vm315_vm0, %v292_v5 }
  0xeb   : > { %6956 = vmatmul.mubr.msk.bf16.gmra.mrb[24].mxu0 %vm315_vm0, %v293_v8 }
  0xec   : > { %6959 = vmatprep.mubr.msk.bf16.mxu0 %vm315_vm0, %v294_v9 }
  0xf3   : > { %6960 = vmatmul.mubr.msk.bf16.gmra.mrb[28].mxu0 %vm315_vm0, %v295_v11 }
 0x176   : > { %v6933_v14 = vpop.f32.mrb[0].mxu0 }
 0x177   : > { %v7713_v15 = vadd.f32 %v6933_v14, %v7710_v13  ;;  %v398_v16 = vpop.f32.mrb[1].mxu0 }
 0x178   : > { %v7716_v17 = vadd.f32 %v7710_v13, %v398_v16  ;;  %v6934_v18 = vpop.f32.mrb[2].mxu0 }
 0x179   : > { %v559_v19 = vmin.f32 %v7713_v15, 20.0  ;;  %v7720_v20 = vadd.f32 %v6934_v18, %v7710_v13  ;;  %v401_v21 = vpop.f32.mrb[3].mxu0  ;;  %vm527_vm1 = vcmp.gt.f32.partialorder %v7713_v15, 20.0 }
 0x17a   : > { %9946 = vst [vmem:[#allocation35_spill] sm:$0xff] %v7716_v17  ;;  %v557_v22 = vmin.f32 %v7716_v17, 20.0  ;;  %v7724_v23 = vadd.f32 %v7710_v13, %v401_v21  ;;  %vm525_vm4 = vcmp.gt.f32.partialorder %v7716_v17, 20.0 }
 0x17b   : > { %9947 = vst [vmem:[#allocation36_spill] sm:$0xff] %v7720_v20  ;;  %v593_v24 = vmul.f32 1.442695, %v559_v19  ;;  %v560_v25 = vmin.f32 %v7720_v20, 20.0  ;;  %vm528_vm2 = vcmp.gt.f32.partialorder %v7720_v20, 20.0 }
 0x17c   : > { %9948 = vst [vmem:[#allocation37_spill] sm:$0xff] %v7724_v23  ;;  %v558_v26 = vmin.f32 %v7724_v23, 20.0  ;;  %v2205_v27 = vpack.c.bf16 %v7724_v23, %v7716_v17  ;;  %v589_v31 = vmul.f32 1.442695, %v557_v22  ;;  %vm526_vm5 = vcmp.gt.f32.partialorder %v7724_v23, 20.0 }
 0x17d   : > { %7363 = vpow2.f32 %v593_v24  ;;  %v595_v36 = vmul.f32 1.442695, %v560_v25 }
 0x17e   : > { %v591_v40 = vmul.f32 1.442695, %v558_v26  ;;  %6964 = vmatpush3.bf16.msra.mxu1 %v2205_v27 }
 0x17f   : > { %6969 = vmatprep.subr.bf16.mxu1 %v9803_v12  ;;  %7365 = vpow2.f32 %v595_v36 }
 0x180   : > { %7367 = vpow2.f32 %v589_v31 }
 0x181   : > { %7369 = vpow2.f32 %v591_v40 }
 0x186   : > { %v6937_v45 = vpop.f32.mrb[4].mxu0 }
 0x187   : > { %v7364_v49 = vpop.eup %7363  ;;  %v7732_v53 = vadd.f32 %v6937_v45, %v7710_v13  ;;  %v414_v58 = vpop.f32.mrb[5].mxu0 }
 0x188   : > { %v7735_v61 = vadd.f32 %v7710_v13, %v414_v58  ;;  %v6938_v63 = vpop.f32.mrb[6].mxu0  ;;  %v671_v1 = vadd.f32 1.0, %v7364_v49  ;;  %v674_v31 = vmul.f32 -0.5, %v7364_v49  ;;  %v677_v58 = vand.u32 2147483647, %v7364_v49 }
 0x189   : > { %v563_v2 = vmin.f32 %v7732_v53, 20.0  ;;  %v7739_v4 = vadd.f32 %v6938_v63, %v7710_v13  ;;  %v417_v5 = vpop.f32.mrb[7].mxu0  ;;  %v7366_v8 = vpop.eup %7365  ;;  %vm531_vm9 = vcmp.gt.f32.partialorder %v7732_v53, 20.0 }
 0x18a   : > { %v561_v9 = vmin.f32 %v7735_v61, 20.0  ;;  %v7743_v11 = vadd.f32 %v7710_v13, %v417_v5  ;;  %v7368_v14 = vpop.eup %7367  ;;  %7371 = vlog2.f32 %v671_v1  ;;  %v680_v24 = vadd.f32 1.0, %v7366_v8 }
 0x18b   : > { %9949 = vst [vmem:[#allocation38_spill] sm:$0xff] %v7739_v4  ;;  %v601_v16 = vmul.f32 1.442695, %v563_v2  ;;  %v564_v18 = vmin.f32 %v7739_v4, 20.0  ;;  %v7746_v19 = vpop.eup %7369  ;;  %v653_v26 = vadd.f32 1.0, %v7368_v14  ;;  %v656_v36 = vmul.f32 -0.5, %v7368_v14 }
 0x18c   : > { %9950 = vst [vmem:[#allocation39_spill] sm:$0xff] %v7743_v11  ;;  %v597_v21 = vmul.f32 1.442695, %v561_v9  ;;  %v562_v25 = vmin.f32 %v7743_v11, 20.0  ;;  %v662_v27 = vadd.f32 1.0, %v7746_v19  ;;  %v683_v45 = vmul.f32 -0.5, %v7366_v8 }
 0x18d   : > { %7373 = vpow2.f32 %v601_v16  ;;  %v603_v22 = vmul.f32 1.442695, %v564_v18  ;;  %v675_v1 = vadd.f32 1.0, %v674_v31  ;;  %v686_v2 = vand.u32 2147483647, %v7366_v8 }
 0x18e   : > { %7375 = vpow2.f32 %v597_v21  ;;  %v599_v40 = vmul.f32 1.442695, %v562_v25  ;;  %v657_v5 = vadd.f32 1.0, %v656_v36  ;;  %v684_v16 = vadd.f32 1.0, %v683_v45 }
 0x18f   : > { %7377 = vpow2.f32 %v603_v22  ;;  %v659_v18 = vand.u32 2147483647, %v7368_v14  ;;  %v665_v21 = vmul.f32 -0.5, %v7746_v19  ;;  %vm7758_vm3 = vcmp.lt.f32.partialorder %v677_v58, 0.0004427343 }
 0x190   : > { %7379 = vlog2.f32 %v680_v24  ;;  %v676_v10 = vmul.f32 %v7364_v49, %v675_v1  ;;  %vm7771_vm6 = vcmp.lt.f32.partialorder %v686_v2, 0.0004427343  ;;  %v685_v62 = vmul.f32 %v7366_v8, %v684_v16 }
 0x191   : > { %7381 = vlog2.f32 %v653_v26  ;;  %v658_v7 = vmul.f32 %v7368_v14, %v657_v5  ;;  %vm7777_vm7 = vcmp.lt.f32.partialorder %v659_v18, 0.0004427343  ;;  %v666_v6 = vadd.f32 1.0, %v665_v21 }
 0x192   : > { %7383 = vlog2.f32 %v662_v27  ;;  %v668_v55 = vand.u32 2147483647, %v7746_v19  ;;  %vm532_vm12 = vcmp.gt.f32.partialorder %v7739_v4, 20.0  ;;  %vm529_vm15 = vcmp.gt.f32.partialorder %v7735_v61, 20.0 }
 0x193   : > { %7385 = vpow2.f32 %v599_v40  ;;  %vm530_vm0 = vcmp.gt.f32.partialorder %v7743_v11, 20.0 }
 0x194   : > { %v7372_v63 = vpop.eup %7371  ;;  %vm669_vm8 = vcmp.lt.f32.partialorder %v668_v55, 0.0004427343 }
 0x195   : > { %v673_v26 = vmul.f32 0.6931472, %v7372_v63 }
 0x196   : > { %v6941_v9 = vpop.f32.mrb[8].mxu0 }
 0x197   : > { %v7751_v12 = vpop.eup %7373  ;;  %v7754_v22 = vadd.f32 %v6941_v9, %v7710_v13  ;;  %v430_v24 = vpop.f32.mrb[9].mxu0  ;;  %v679_v8 = vsel %vm7758_vm3, %v676_v10, %v673_v26 }
 0x198   : > { %v6942_v25 = vpop.f32.mrb[10].mxu0  ;;  %v707_v31 = vadd.f32 1.0, %v7751_v12  ;;  %v7765_v36 = vpop.eup %7375  ;;  %v7784_v1 = vadd.f32 %v7710_v13, %v430_v24  ;;  %v667_v24 = vmul.f32 %v7746_v19, %v666_v6  ;;  %v7799_v27 = vsel %vm527_vm1, %v7713_v15, %v679_v8 }
 0x199   : > { %9951 = vst [vmem:[#allocation40_spill] sm:$0xff] %v7754_v22  ;;  %v567_v40 = vmin.f32 %v7754_v22, 20.0  ;;  %v7769_v45 = vadd.f32 %v6942_v25, %v7710_v13  ;;  %v433_v9 = vpop.f32.mrb[11].mxu0  ;;  %v7775_v63 = vpop.eup %7377  ;;  %v689_v0 = vadd.f32 1.0, %v7765_v36  ;;  %vm535_vm1 = vcmp.gt.f32.partialorder %v7754_v22, 20.0 }
 0x19a   : > { %v7380_v56 = vpop.eup %7379  ;;  %7387 = vlog2.f32 %v707_v31  ;;  %9959 = vst [vmem:[#allocation42_spill] sm:$0xff] %v7784_v1  ;;  %v7787_v2 = vadd.f32 %v7710_v13, %v433_v9  ;;  %v716_v21 = vadd.f32 1.0, %v7775_v63  ;;  %v565_v6 = vmin.f32 %v7784_v1, 20.0 }
 0x19b   : > { %9954 = vst [vmem:[#allocation41_spill] sm:$0xff] %v7769_v45  ;;  %v609_v3 = vmul.f32 1.442695, %v567_v40  ;;  %v568_v25 = vmin.f32 %v7769_v45, 20.0  ;;  %v7382_v49 = vpop.eup %7381  ;;  %v682_v14 = vmul.f32 0.6931472, %v7380_v56 }
 0x19c   : > { %v7384_v5 = vpop.eup %7383  ;;  %v655_v18 = vmul.f32 0.6931472, %v7382_v49  ;;  %v566_v26 = vmin.f32 %v7787_v2, 20.0  ;;  %v719_v58 = vmul.f32 -0.5, %v7775_v63  ;;  %v605_v49 = vmul.f32 1.442695, %v565_v6 }
 0x19d   : > { %7389 = vpow2.f32 %v609_v3  ;;  %v611_v16 = vmul.f32 1.442695, %v568_v25  ;;  %v688_v31 = vsel %vm7771_vm6, %v685_v62, %v682_v14  ;;  %v664_v40 = vmul.f32 0.6931472, %v7384_v5  ;;  %v7808_v62 = vpop.eup %7385 }
 0x19e   : > { %v7804_v56 = vsel %vm528_vm2, %v7720_v20, %v688_v31  ;;  %v661_v3 = vsel %vm7777_vm7, %v658_v7, %v655_v18  ;;  %v710_v7 = vmul.f32 -0.5, %v7751_v12  ;;  %v698_v25 = vadd.f32 1.0, %v7808_v62 }
 0x19f   : > { %9960 = vst [vmem:[#allocation43_spill] sm:$0xff] %v7804_v56  ;;  %7391 = vpow2.f32 %v611_v16  ;;  %v7813_v10 = vpack.c.bf16 %v7804_v56, %v7799_v27  ;;  %v670_v19 = vsel %vm669_vm8, %v667_v24, %v664_v40  ;;  %v7819_v9 = vsel %vm525_vm4, %v7716_v17, %v661_v3 }
 0x1a0   : > { %v7824_v55 = vsel %vm526_vm5, %v7724_v23, %v670_v19  ;;  %7393 = vlog2.f32 %v716_v21  ;;  %v607_v14 = vmul.f32 1.442695, %v566_v26  ;;  %v711_v16 = vadd.f32 1.0, %v710_v7 }
 0x1a1   : > { %9961 = vst [vmem:[#allocation44_spill] sm:$0xff] %v7813_v10  ;;  %9962 = vst [vmem:[#allocation45_spill] sm:$0xff] %v7824_v55  ;;  %2286 = vrot.lane.b32.xlu1 %v7813_v10, %s7501_s14  ;;  %v7830_v59 = vpack.c.bf16 %v7824_v55, %v7819_v9  ;;  %7395 = vlog2.f32 %v689_v0  ;;  %v692_v18 = vmul.f32 -0.5, %v7765_v36  ;;  %v713_v40 = vand.u32 2147483647, %v7751_v12 }
 0x1a2   : > { %7397 = vlog2.f32 %v698_v25  ;;  %v720_v24 = vadd.f32 1.0, %v719_v58  ;;  %v701_v3 = vmul.f32 -0.5, %v7808_v62  ;;  %v722_v26 = vand.u32 2147483647, %v7775_v63 }
 0x1a3   : > { %9963 = vst [vmem:[#allocation46_spill] sm:$0xff] %v7830_v59  ;;  %2222 = vrot.lane.b32.xlu0 %v7830_v59, %s7501_s14  ;;  %7399 = vpow2.f32 %v605_v49  ;;  %v712_v58 = vmul.f32 %v7751_v12, %v711_v16  ;;  %v693_v60 = vadd.f32 1.0, %v692_v18  ;;  %v695_v49 = vand.u32 2147483647, %v7765_v36 }
 0x1a4   : > { %v7388_v8 = vpop.eup %7387  ;;  %7401 = vpow2.f32 %v607_v14  ;;  %vm7856_vm10 = vcmp.lt.f32.partialorder %v713_v40, 0.0004427343  ;;  %v702_v14 = vadd.f32 1.0, %v701_v3  ;;  %v721_v46 = vmul.f32 %v7775_v63, %v720_v24 }
 0x1a5   : > { %v709_v19 = vmul.f32 0.6931472, %v7388_v8  ;;  %vm723_vm11 = vcmp.lt.f32.partialorder %v722_v26, 0.0004427343  ;;  %v704_v18 = vand.u32 2147483647, %v7808_v62 }
 0x1a6   : > { %v6945_v5 = vpop.f32.mrb[12].mxu0  ;;  %vm7868_vm13 = vcmp.lt.f32.partialorder %v695_v49, 0.0004427343  ;;  %vm536_vm4 = vcmp.gt.f32.partialorder %v7769_v45, 20.0  ;;  %vm533_vm5 = vcmp.gt.f32.partialorder %v7784_v1, 20.0  ;;  %vm534_vm6 = vcmp.gt.f32.partialorder %v7787_v2, 20.0 }
 0x1a7   : > { %v7838_v21 = vpop.eup %7389  ;;  %v7841_v31 = vadd.f32 %v6945_v5, %v7710_v13  ;;  %v446_v0 = vpop.f32.mrb[13].mxu0  ;;  %v715_v48 = vsel %vm7856_vm10, %v712_v58, %v709_v19  ;;  %vm705_vm14 = vcmp.lt.f32.partialorder %v704_v18, 0.0004427343 }
 0x1a8   : > { %v6946_v6 = vpop.f32.mrb[14].mxu0  ;;  %v743_v7 = vadd.f32 1.0, %v7838_v21  ;;  %v7875_v24 = vsel %vm531_vm9, %v7732_v53, %v715_v48  ;;  %v746_v49 = vmul.f32 -0.5, %v7838_v21  ;;  %v7889_v48 = vadd.f32 %v7710_v13, %v446_v0 }
 0x1a9   : > { %9964 = vst [vmem:[#allocation47_spill] sm:$0xff] %v7841_v31  ;;  %v7848_v25 = vadd.f32 %v6946_v6, %v7710_v13  ;;  %v449_v52 = vpop.f32.mrb[15].mxu0  ;;  %v7850_v5 = vpop.eup %7391  ;;  %v571_v8 = vmin.f32 %v7841_v31, 20.0  ;;  %9970 = vst [vmem:[#allocation49_spill] sm:$0xff] %v7875_v24 }
 0x1aa   : > { %v7394_v50 = vpop.eup %7393  ;;  %7403 = vlog2.f32 %v743_v7  ;;  %v752_v40 = vadd.f32 1.0, %v7850_v5  ;;  %v694_v7 = vmul.f32 %v7765_v36, %v693_v60  ;;  %9973 = vst [vmem:[#allocation52_spill] sm:$0xff] %v7889_v48  ;;  %v758_v47 = vand.u32 2147483647, %v7850_v5 }
 0x1ab   : > { %9965 = vst [vmem:[#allocation48_spill] sm:$0xff] %v7848_v25  ;;  %v7396_v6 = vpop.eup %7395  ;;  %v718_v54 = vmul.f32 0.6931472, %v7394_v50  ;;  %v572_v12 = vmin.f32 %v7848_v25, 20.0  ;;  %v617_v63 = vmul.f32 1.442695, %v571_v8 }
 0x1ac   : > { %v691_v16 = vmul.f32 0.6931472, %v7396_v6  ;;  %v7398_v50 = vpop.eup %7397  ;;  %7405 = vlog2.f32 %v752_v40  ;;  %v747_v40 = vadd.f32 1.0, %v746_v49  ;;  %vm7942_vm3 = vcmp.lt.f32.partialorder %v758_v47, 0.0004427343 }
 0x1ad   : > { %v724_v51 = vsel %vm723_vm11, %v721_v46, %v718_v54  ;;  %v703_v46 = vmul.f32 %v7808_v62, %v702_v14  ;;  %v700_v58 = vmul.f32 0.6931472, %v7398_v50  ;;  %v619_v8 = vmul.f32 1.442695, %v572_v12  ;;  %v7891_v6 = vpop.eup %7399 }
 0x1ae   : > { %v6949_v3 = vpop.f32.mrb[16].mxu0  ;;  %v7878_v19 = vsel %vm532_vm12, %v7739_v4, %v724_v51  ;;  %v697_v36 = vsel %vm7868_vm13, %v694_v7, %v691_v16  ;;  %v755_v14 = vmul.f32 -0.5, %v7850_v5  ;;  %v7898_v16 = vpop.eup %7401  ;;  %7407 = vpow2.f32 %v617_v63 }
 0x1af   : > { %9971 = vst [vmem:[#allocation50_spill] sm:$0xff] %v7878_v19  ;;  %v462_v26 = vpop.f32.mrb[17].mxu0  ;;  %v7883_v54 = vpack.c.bf16 %v7878_v19, %v7875_v24  ;;  %v706_v62 = vsel %vm705_vm14, %v703_v46, %v700_v58  ;;  %v7901_v0 = vsel %vm529_vm15, %v7735_v61, %v697_v36  ;;  %v749_v7 = vand.u32 2147483647, %v7838_v21 }
 0x1b0   : > { %v6950_v60 = vpop.f32.mrb[18].mxu0  ;;  %v7904_v12 = vsel %vm530_vm0, %v7743_v11, %v706_v62  ;;  %v569_v50 = vmin.f32 %v7889_v48, 20.0  ;;  %7409 = vpow2.f32 %v619_v8  ;;  %v7913_v46 = vadd.f32 %v7710_v13, %v449_v52 }
 0x1b1   : > { %9972 = vst [vmem:[#allocation51_spill] sm:$0xff] %v7883_v54  ;;  %v465_v51 = vpop.f32.mrb[19].mxu0  ;;  %2412 = vrot.lane.b32.xlu1 %v7883_v54, %s7501_s14  ;;  %9974 = vst [vmem:[#allocation53_spill] sm:$0xff] %v7904_v12  ;;  %v7908_v18 = vpack.c.bf16 %v7904_v12, %v7901_v0  ;;  %v725_v63 = vadd.f32 1.0, %v7891_v6  ;;  %v7917_v36 = vadd.f32 %v6949_v3, %v7710_v13  ;;  %v756_v62 = vadd.f32 1.0, %v755_v14 }
 0x1b2   : > { %9976 = vst [vmem:[#allocation55_spill] sm:$0xff] %v7913_v46  ;;  %v734_v49 = vadd.f32 1.0, %v7898_v16  ;;  %v748_v8 = vmul.f32 %v7838_v21, %v747_v40  ;;  %vm7925_vm2 = vcmp.lt.f32.partialorder %v749_v7, 0.0004427343  ;;  %v613_v3 = vmul.f32 1.442695, %v569_v50 }
 0x1b3   : > { %9975 = vst [vmem:[#allocation54_spill] sm:$0xff] %v7908_v18  ;;  %v570_v39 = vmin.f32 %v7913_v46, 20.0  ;;  %v7931_v14 = vadd.f32 %v6950_v60, %v7710_v13  ;;  %7411 = vlog2.f32 %v725_v63  ;;  %v575_v37 = vmin.f32 %v7917_v36, 20.0 }
 0x1b4   : > { %v7404_v57 = vpop.eup %7403  ;;  %v757_v38 = vmul.f32 %v7850_v5, %v756_v62  ;;  %7413 = vlog2.f32 %v734_v49  ;;  %v737_v60 = vmul.f32 -0.5, %v7898_v16  ;;  %v7948_v63 = vadd.f32 %v7710_v13, %v462_v26 }
 0x1b5   : > { %2349 = vrot.lane.b32.xlu1 %v7908_v18, %s7501_s14  ;;  %v745_v52 = vmul.f32 0.6931472, %v7404_v57  ;;  %9979 = vst [vmem:[#allocation56_spill] sm:$0xff] %v7931_v14  ;;  %v728_v57 = vmul.f32 -0.5, %v7891_v6  ;;  %v615_v49 = vmul.f32 1.442695, %v570_v39  ;;  %v7957_v47 = vadd.f32 %v7710_v13, %v465_v51 }
 0x1b6   : > { %v6953_v58 = vpop.f32.mrb[20].mxu0  ;;  %v7406_v21 = vpop.eup %7405  ;;  %7415 = vpow2.f32 %v613_v3  ;;  %v625_v26 = vmul.f32 1.442695, %v575_v37  ;;  %v731_v37 = vand.u32 2147483647, %v7891_v6  ;;  %v573_v3 = vmin.f32 %v7948_v63, 20.0 }
 0x1b7   : > { %v478_v43 = vpop.f32.mrb[21].mxu0  ;;  %v751_v5 = vsel %vm7925_vm2, %v748_v8, %v745_v52  ;;  %v754_v62 = vmul.f32 0.6931472, %v7406_v21  ;;  %9984 = vst [vmem:[#allocation59_spill] sm:$0xff] %v7957_v47  ;;  %v729_v33 = vadd.f32 1.0, %v728_v57  ;;  %7417 = vpow2.f32 %v615_v49 }
 0x1b8   : > { %v6954_v42 = vpop.f32.mrb[22].mxu0  ;;  %v7937_v40 = vadd.f32 %v7710_v13, %v478_v43  ;;  %v7953_v43 = vpop.eup %7407  ;;  %v7970_v39 = vsel %vm535_vm1, %v7754_v22, %v751_v5  ;;  %v740_v21 = vand.u32 2147483647, %v7898_v16  ;;  %v9988_v5 = vmov 0.0  }
 0x1b9   : > { %v481_v41 = vpop.f32.mrb[23].mxu0  ;;  %v760_v34 = vsel %vm7942_vm3, %v757_v38, %v754_v62  ;;  %9985 = vst [vmem:[#allocation60_spill] sm:$0xff] %v7970_v39  ;;  %v738_v38 = vadd.f32 1.0, %v737_v60  ;;  %v574_v60 = vmin.f32 %v7957_v47, 20.0  ;;  %v7993_v30 = vadd.f32 %v6954_v42, %v7710_v13 }
 0x1ba   : > { %9980 = vst [vmem:[#allocation57_spill] sm:$0xff] %v7937_v40  ;;  %v7940_v7 = vadd.f32 %v7710_v13, %v481_v41  ;;  %v576_v41 = vmin.f32 %v7931_v14, 20.0  ;;  %v7965_v52 = vpop.eup %7409  ;;  %v7973_v51 = vsel %vm536_vm4, %v7769_v45, %v760_v34  ;;  %v779_v34 = vadd.f32 1.0, %v7953_v43 }
 0x1bb   : > { %9986 = vst [vmem:[#allocation61_spill] sm:$0xff] %v7973_v51  ;;  %v7981_v57 = vpack.c.bf16 %v7973_v51, %v7970_v39  ;;  %9990 = vst [vmem:[#allocation64_spill] sm:$0xff] %v7993_v30  ;;  %v730_v29 = vmul.f32 %v7891_v6, %v729_v33  ;;  %v788_v28 = vadd.f32 1.0, %v7965_v52  ;;  %vm7999_vm7 = vcmp.lt.f32.partialorder %v731_v37, 0.0004427343 }
 0x1bc   : > { %9981 = vst [vmem:[#allocation58_spill] sm:$0xff] %v7940_v7  ;;  %v2215_v35 = vpack.c.bf16 %v7940_v7, %v7937_v40  ;;  %v627_v62 = vmul.f32 1.442695, %v576_v41  ;;  %7419 = vlog2.f32 %v779_v34  ;;  %v782_v41 = vmul.f32 -0.5, %v7953_v43 }
 0x1bd   : > { %9987 = vst [vmem:[#allocation62_spill] sm:$0xff] %v7981_v57  ;;  %2538 = vrot.lane.b32.xlu0 %v7981_v57, %s7501_s14  ;;  %v7412_v23 = vpop.eup %7411  ;;  %7421 = vpow2.f32 %v625_v26  ;;  %v621_v17 = vmul.f32 1.442695, %v573_v3  ;;  %vm8005_vm8 = vcmp.lt.f32.partialorder %v740_v21, 0.0004427343  ;;  %v577_v37 = vmin.f32 %v7937_v40, 20.0 }
 0x1be   : > { %v7963_v44 = vpop.f32.mrb[24].mxu0  ;;  %7024 = vmatpush3.bf16.msra.mxu0 %v2215_v35  ;;  %v7990_v35 = vadd.f32 %v6953_v58, %v7710_v13  ;;  %v739_v58 = vmul.f32 %v7898_v16, %v738_v38  ;;  %v7414_v42 = vpop.eup %7413  ;;  %v727_v54 = vmul.f32 0.6931472, %v7412_v23  ;;  %7423 = vlog2.f32 %v788_v28 }
 0x1bf   : > { %v494_v8 = vpop.f32.mrb[25].mxu0  ;;  %7035 = vmatprep.subr.bf16.mxu0 %v9988_v5  ;;  %7425 = vpow2.f32 %v627_v62  ;;  %v623_v33 = vmul.f32 1.442695, %v574_v60  ;;  %v736_v26 = vmul.f32 0.6931472, %v7414_v42  ;;  %v580_v34 = vmin.f32 %v7993_v30, 20.0 }
 0x1c0   : > { %v7984_v50 = vpop.f32.mrb[26].mxu0  ;;  %9989 = vst [vmem:[#allocation63_spill] sm:$0xff] %v7990_v35  ;;  %v579_v6 = vmin.f32 %v7990_v35, 20.0  ;;  %v733_v16 = vsel %vm7999_vm7, %v730_v29, %v727_v54  ;;  %v791_v23 = vmul.f32 -0.5, %v7965_v52  ;;  %v578_v3 = vmin.f32 %v7940_v7, 20.0  ;;  %v8025_v42 = vpop.eup %7415 }
 0x1c1   : > { %v497_v32 = vpop.f32.mrb[27].mxu0  ;;  %v742_v28 = vsel %vm8005_vm8, %v739_v58, %v736_v26  ;;  %v8021_v21 = vadd.f32 %v7710_v13, %v494_v8  ;;  %v783_v60 = vadd.f32 1.0, %v782_v41  ;;  %v8030_v29 = vsel %vm533_vm5, %v7784_v1, %v733_v16  ;;  %v8050_v18 = vpop.eup %7417 }
 0x1c2   : > { %v8035_v54 = vsel %vm534_vm6, %v7787_v2, %v742_v28  ;;  %v8038_v57 = vadd.f32 %v7710_v13, %v497_v32  ;;  %v785_v49 = vand.u32 2147483647, %v7953_v43  ;;  %v633_v58 = vmul.f32 1.442695, %v579_v6 }
 0x1c3   : > { %9995 = vst [vmem:[#allocation65_spill] sm:$0xff] %v8021_v21  ;;  %9996 = vst [vmem:[#allocation66_spill] sm:$0xff] %v8035_v54  ;;  %v8045_v41 = vpack.c.bf16 %v8035_v54, %v8030_v29  ;;  %v792_v16 = vadd.f32 1.0, %v791_v23  ;;  %7427 = vpow2.f32 %v621_v17  ;;  %v629_v10 = vmul.f32 1.442695, %v577_v37 }
 0x1c4   : > { %v794_v28 = vand.u32 2147483647, %v7965_v52  ;;  %7429 = vpow2.f32 %v623_v33  ;;  %v635_v32 = vmul.f32 1.442695, %v580_v34  ;;  %v581_v6 = vmin.f32 %v8021_v21, 20.0 }
 0x1c5   : > { %9997 = vst [vmem:[#allocation67_spill] sm:$0xff] %v8045_v41  ;;  %2475 = vrot.lane.b32.xlu1 %v8045_v41, %s7501_s14  ;;  %v784_v59 = vmul.f32 %v7953_v43, %v783_v60  ;;  %v631_v19 = vmul.f32 1.442695, %v578_v3  ;;  %v582_v56 = vmin.f32 %v8038_v57, 20.0  ;;  %vm8057_vm9 = vcmp.lt.f32.partialorder %v785_v49, 0.0004427343 }
 0x1c6   : > { %v8014_v38 = vpop.f32.mrb[28].mxu0  ;;  %v7420_v51 = vpop.eup %7419  ;;  %7431 = vpow2.f32 %v633_v58  ;;  %v793_v34 = vmul.f32 %v7965_v52, %v792_v16  ;;  %v761_v23 = vadd.f32 1.0, %v8025_v42  ;;  %vm795_vm10 = vcmp.lt.f32.partialorder %v794_v28, 0.0004427343 }
 0x1c7   : > { %v8023_v62 = vpop.f32.mrb[29].mxu0  ;;  %v8061_v37 = vpop.eup %7421  ;;  %v781_v33 = vmul.f32 0.6931472, %v7420_v51  ;;  %7433 = vpow2.f32 %v629_v10  ;;  %v770_v43 = vadd.f32 1.0, %v8050_v18  ;;  %v637_v60 = vmul.f32 1.442695, %v581_v6 }
 0x1c8   : > { %v8040_v8 = vpop.f32.mrb[30].mxu0  ;;  %v7424_v41 = vpop.eup %7423  ;;  %7435 = vpow2.f32 %v635_v32  ;;  %v639_v58 = vmul.f32 1.442695, %v582_v56  ;;  %vm539_vm11 = vcmp.gt.f32.partialorder %v7841_v31, 20.0  ;;  %vm540_vm12 = vcmp.gt.f32.partialorder %v7848_v25, 20.0 }
 0x1c9   : > { %v8047_v26 = vpop.f32.mrb[31].mxu0  ;;  %v8066_v3 = vpop.eup %7425  ;;  %v787_v49 = vsel %vm8057_vm9, %v784_v59, %v781_v33  ;;  %v790_v54 = vmul.f32 0.6931472, %v7424_v41  ;;  %7437 = vpow2.f32 %v631_v19  ;;  %v764_v16 = vmul.f32 -0.5, %v8025_v42 }
 0x1ca   : > { %7439 = vlog2.f32 %v761_v23  ;;  %v8073_v10 = vsel %vm539_vm11, %v7841_v31, %v787_v49  ;;  %v773_v56 = vmul.f32 -0.5, %v8050_v18  ;;  %v815_v19 = vadd.f32 1.0, %v8061_v37 }
 0x1cb   : > { %v796_v52 = vsel %vm795_vm10, %v793_v34, %v790_v54  ;;  %10000 = vst [vmem:[#allocation68_spill] sm:$0xff] %v8073_v10  ;;  %7441 = vlog2.f32 %v770_v43  ;;  %v818_v41 = vmul.f32 -0.5, %v8061_v37  ;;  %v824_v28 = vadd.f32 1.0, %v8066_v3 }
 0x1cc   : > { %v8076_v51 = vsel %vm540_vm12, %v7848_v25, %v796_v52  ;;  %7443 = vpow2.f32 %v637_v60  ;;  %v767_v6 = vand.u32 2147483647, %v8025_v42  ;;  %v765_v17 = vadd.f32 1.0, %v764_v16 }
 0x1cd   : > { %10001 = vst [vmem:[#allocation69_spill] sm:$0xff] %v8076_v51  ;;  %v8081_v59 = vpack.c.bf16 %v8076_v51, %v8073_v10  ;;  %v8085_v54 = vpop.eup %7427  ;;  %7445 = vpow2.f32 %v639_v58  ;;  %v776_v33 = vand.u32 2147483647, %v8050_v18  ;;  %v774_v23 = vadd.f32 1.0, %v773_v56 }
 0x1ce   : > { %v8089_v32 = vpop.eup %7429  ;;  %7447 = vlog2.f32 %v815_v19  ;;  %v821_v43 = vand.u32 2147483647, %v8061_v37  ;;  %v827_v60 = vmul.f32 -0.5, %v8066_v3  ;;  %v797_v49 = vadd.f32 1.0, %v8085_v54 }
 0x1cf   : > { %10002 = vst [vmem:[#allocation70_spill] sm:$0xff] %v8081_v59  ;;  %2664 = vrot.lane.b32.xlu0 %v8081_v59, %s7501_s14  ;;  %7449 = vlog2.f32 %v824_v28  ;;  %vm537_vm13 = vcmp.gt.f32.partialorder %v7889_v48, 20.0  ;;  %vm538_vm14 = vcmp.gt.f32.partialorder %v7913_v46, 20.0  ;;  %v819_v52 = vadd.f32 1.0, %v818_v41 }
 0x1d0   : > { %v8095_v34 = vpop.eup %7431  ;;  %v806_v16 = vadd.f32 1.0, %v8089_v32  ;;  %vm8107_vm15 = vcmp.lt.f32.partialorder %v767_v6, 0.0004427343  ;;  %7451 = vlog2.f32 %v797_v49  ;;  %v800_v56 = vmul.f32 -0.5, %v8085_v54 }
 0x1d1   : > { %v8100_v58 = vpop.eup %7433  ;;  %v809_v59 = vmul.f32 -0.5, %v8089_v32  ;;  %v766_v12 = vmul.f32 %v8025_v42, %v765_v17  ;;  %vm8116_vm0 = vcmp.lt.f32.partialorder %v776_v33, 0.0004427343  ;;  %v830_v41 = vand.u32 2147483647, %v8066_v3 }
 0x1d2   : > { %v8105_v19 = vpop.eup %7435  ;;  %7453 = vlog2.f32 %v806_v16  ;;  %v775_v31 = vmul.f32 %v8050_v18, %v774_v23  ;;  %vm543_vm1 = vcmp.gt.f32.partialorder %v7917_v36, 20.0  ;;  %vm544_vm2 = vcmp.gt.f32.partialorder %v7931_v14, 20.0 }
 0x1d3   : > { %v8113_v51 = vpop.eup %7437  ;;  %vm8124_vm3 = vcmp.lt.f32.partialorder %v821_v43, 0.0004427343  ;;  %v828_v55 = vadd.f32 1.0, %v827_v60  ;;  %v851_v42 = vadd.f32 1.0, %v8095_v34  ;;  %v820_v10 = vmul.f32 %v8061_v37, %v819_v52 }
 0x1d4   : > { %v7440_v6 = vpop.eup %7439  ;;  %v803_v16 = vand.u32 2147483647, %v8085_v54  ;;  %v860_v39 = vadd.f32 1.0, %v8105_v19  ;;  %v801_v45 = vadd.f32 1.0, %v800_v56  ;;  %v810_v22 = vadd.f32 1.0, %v809_v59 }
 0x1d5   : > { %v7442_v17 = vpop.eup %7441  ;;  %v763_v33 = vmul.f32 0.6931472, %v7440_v6  ;;  %7455 = vlog2.f32 %v851_v42  ;;  %vm8138_vm4 = vcmp.lt.f32.partialorder %v830_v41, 0.0004427343  ;;  %v854_v37 = vmul.f32 -0.5, %v8095_v34 }
 0x1d6   : > { %v8132_v18 = vpop.eup %7443  ;;  %v772_v23 = vmul.f32 0.6931472, %v7442_v17  ;;  %7457 = vlog2.f32 %v860_v39  ;;  %v829_v56 = vmul.f32 %v8066_v3, %v828_v55  ;;  %vm541_vm5 = vcmp.gt.f32.partialorder %v7948_v63, 20.0 }
 0x1d7   : > { %v8134_v43 = vpop.eup %7445  ;;  %v769_v60 = vsel %vm8107_vm15, %v766_v12, %v763_v33  ;;  %vm542_vm6 = vcmp.gt.f32.partialorder %v7957_v47, 20.0  ;;  %v812_v59 = vand.u32 2147483647, %v8089_v32  ;;  %v863_v12 = vmul.f32 -0.5, %v8105_v19 }
 0x1d8   : > { %v7448_v52 = vpop.eup %7447  ;;  %v778_v6 = vsel %vm8116_vm0, %v775_v31, %v772_v23  ;;  %v8153_v41 = vsel %vm537_vm13, %v7889_v48, %v769_v60  ;;  %vm8160_vm7 = vcmp.lt.f32.partialorder %v803_v16, 0.0004427343  ;;  %v802_v42 = vmul.f32 %v8085_v54, %v801_v45 }
 0x1d9   : > { %v7450_v28 = vpop.eup %7449  ;;  %v8158_v31 = vsel %vm538_vm14, %v7913_v46, %v778_v6  ;;  %v817_v55 = vmul.f32 0.6931472, %v7448_v52  ;;  %v811_v17 = vmul.f32 %v8089_v32, %v810_v22  ;;  %v855_v23 = vadd.f32 1.0, %v854_v37 }
 0x1da   : > { %v8166_v39 = vpack.c.bf16 %v8158_v31, %v8153_v41  ;;  %v826_v3 = vmul.f32 0.6931472, %v7450_v28  ;;  %v857_v60 = vand.u32 2147483647, %v8095_v34  ;;  %v833_v16 = vadd.f32 1.0, %v8100_v58  ;;  %v7452_v52 = vpop.eup %7451 }
 0x1db   : > { %v823_v33 = vsel %vm8124_vm3, %v820_v10, %v817_v55  ;;  %v864_v28 = vadd.f32 1.0, %v863_v12  ;;  %v866_v45 = vand.u32 2147483647, %v8105_v19  ;;  %v842_v22 = vadd.f32 1.0, %v8113_v51 }
 0x1dc   : > { %10013 = vst [vmem:[#allocation71_spill] sm:$0xff] %v8166_v39  ;;  %2601 = vrot.lane.b32.xlu1 %v8166_v39, %s7501_s14  ;;  %v832_v6 = vsel %vm8138_vm4, %v829_v56, %v826_v3  ;;  %v7454_v54 = vpop.eup %7453  ;;  %v8183_v10 = vsel %vm543_vm1, %v7917_v36, %v823_v33  ;;  %v799_v49 = vmul.f32 0.6931472, %v7452_v52  ;;  %7459 = vlog2.f32 %v833_v16 }
 0x1dd   : > { %v8188_v32 = vsel %vm544_vm2, %v7931_v14, %v832_v6  ;;  %v808_v37 = vmul.f32 0.6931472, %v7454_v54  ;;  %v836_v56 = vmul.f32 -0.5, %v8100_v58  ;;  %7461 = vlog2.f32 %v842_v22 }
 0x1de   : > { %10014 = vst [vmem:[#allocation72_spill] sm:$0xff] %v8188_v32  ;;  %v8192_v24 = vpack.c.bf16 %v8188_v32, %v8183_v10  ;;  %v805_v12 = vsel %vm8160_vm7, %v802_v42, %v799_v49  ;;  %vm813_vm8 = vcmp.lt.f32.partialorder %v812_v59, 0.0004427343  ;;  %v856_v55 = vmul.f32 %v8095_v34, %v855_v23 }
 0x1df   : > { %v845_v3 = vmul.f32 -0.5, %v8113_v51  ;;  %v7456_v33 = vpop.eup %7455  ;;  %v814_v16 = vsel %vm813_vm8, %v811_v17, %v808_v37  ;;  %vm547_vm9 = vcmp.gt.f32.partialorder %v7990_v35, 20.0  ;;  %vm8202_vm10 = vcmp.lt.f32.partialorder %v857_v60, 0.0004427343 }
 0x1e0   : > { %10015 = vst [vmem:[#allocation73_spill] sm:$0xff] %v8192_v24  ;;  %2790 = vrot.lane.b32.xlu1 %v8192_v24, %s7501_s14  ;;  %v865_v6 = vmul.f32 %v8105_v19, %v864_v28  ;;  %v7458_v25 = vpop.eup %7457  ;;  %v8210_v34 = vsel %vm541_vm5, %v7948_v63, %v805_v12  ;;  %v8215_v59 = vsel %vm542_vm6, %v7957_v47, %v814_v16  ;;  %v853_v42 = vmul.f32 0.6931472, %v7456_v33 }
 0x1e1   : > { %vm8217_vm11 = vcmp.lt.f32.partialorder %v866_v45, 0.0004427343  ;;  %v8223_v23 = vpack.c.bf16 %v8215_v59, %v8210_v34  ;;  %v862_v19 = vmul.f32 0.6931472, %v7458_v25  ;;  %v837_v60 = vadd.f32 1.0, %v836_v56 }
 0x1e2   : > { %v869_v28 = vadd.f32 1.0, %v8132_v18  ;;  %v859_v22 = vsel %vm8202_vm10, %v856_v55, %v853_v42  ;;  %v839_v54 = vand.u32 2147483647, %v8100_v58  ;;  %v846_v49 = vadd.f32 1.0, %v845_v3 }
 0x1e3   : > { %10020 = vst [vmem:[#allocation74_spill] sm:$0xff] %v8223_v23  ;;  %v878_v37 = vadd.f32 1.0, %v8134_v43  ;;  %2727 = vrot.lane.b32.xlu0 %v8223_v23, %s7501_s14  ;;  %vm548_vm12 = vcmp.gt.f32.partialorder %v7993_v30, 20.0  ;;  %v868_v45 = vsel %vm8217_vm11, %v865_v6, %v862_v19  ;;  %v848_v56 = vand.u32 2147483647, %v8113_v51 }
 0x1e4   : > { %7463 = vlog2.f32 %v869_v28  ;;  %v8239_v12 = vsel %vm547_vm9, %v7990_v35, %v859_v22  ;;  %v8242_v55 = vsel %vm548_vm12, %v7993_v30, %v868_v45  ;;  %v872_v3 = vmul.f32 -0.5, %v8132_v18 }
 0x1e5   : > { %10021 = vst [vmem:[#allocation75_spill] sm:$0xff] %v8242_v55  ;;  %7465 = vlog2.f32 %v878_v37  ;;  %v8247_v33 = vpack.c.bf16 %v8242_v55, %v8239_v12  ;;  %v838_v16 = vmul.f32 %v8100_v58, %v837_v60  ;;  %v881_v52 = vmul.f32 -0.5, %v8134_v43 }
 0x1e6   : > { %v7460_v6 = vpop.eup %7459  ;;  %vm8251_vm13 = vcmp.lt.f32.partialorder %v839_v54, 0.0004427343  ;;  %v847_v42 = vmul.f32 %v8113_v51, %v846_v49  ;;  %vm849_vm14 = vcmp.lt.f32.partialorder %v848_v56, 0.0004427343  ;;  %v873_v22 = vadd.f32 1.0, %v872_v3 }
 0x1e7   : > { %10022 = vst [vmem:[#allocation76_spill] sm:$0xff] %v8247_v33  ;;  %v7462_v17 = vpop.eup %7461  ;;  %2916 = vrot.lane.b32.xlu0 %v8247_v33, %s7501_s14  ;;  %v835_v19 = vmul.f32 0.6931472, %v7460_v6  ;;  %v875_v60 = vand.u32 2147483647, %v8132_v18  ;;  %v882_v37 = vadd.f32 1.0, %v881_v52  ;;  %v8272_v56 = vadd.f32 %v7710_v13, %v8023_v62 }
 0x1e8   : > { %v844_v28 = vmul.f32 0.6931472, %v7462_v17  ;;  %vm545_vm15 = vcmp.gt.f32.partialorder %v7937_v40, 20.0  ;;  %vm546_vm0 = vcmp.gt.f32.partialorder %v7940_v7, 20.0  ;;  %v884_v51 = vand.u32 2147483647, %v8134_v43 }
 0x1e9   : > { %v841_v58 = vsel %vm8251_vm13, %v838_v16, %v835_v19  ;;  %10025 = vst [vmem:[#allocation77_spill] sm:$0xff] %v8272_v56  ;;  %v874_v16 = vmul.f32 %v8132_v18, %v873_v22  ;;  %v8281_v6 = vadd.f32 %v7710_v13, %v8047_v26  ;;  %vm8283_vm1 = vcmp.lt.f32.partialorder %v875_v60, 0.0004427343 }
 0x1ea   : > { %v850_v54 = vsel %vm849_vm14, %v847_v42, %v844_v28  ;;  %v8265_v49 = vsel %vm545_vm15, %v7937_v40, %v841_v58  ;;  %v883_v42 = vmul.f32 %v8134_v43, %v882_v37  ;;  %v585_v62 = vmin.f32 %v8272_v56, 20.0 }
 0x1eb   : > { %v8268_v45 = vsel %vm546_vm0, %v7940_v7, %v850_v54  ;;  %10027 = vst [vmem:[#allocation79_spill] sm:$0xff] %v8281_v6  ;;  %vm885_vm2 = vcmp.lt.f32.partialorder %v884_v51, 0.0004427343  ;;  %v586_v18 = vmin.f32 %v8281_v6, 20.0  ;;  %v8294_v26 = vadd.f32 %v8014_v38, %v7710_v13 }
 0x1ec   : > { %v8276_v3 = vpack.c.bf16 %v8268_v45, %v8265_v49  ;;  %v8300_v43 = vadd.f32 %v8040_v8, %v7710_v13  ;;  %vm549_vm3 = vcmp.gt.f32.partialorder %v8021_v21, 20.0  ;;  %vm550_vm4 = vcmp.gt.f32.partialorder %v8038_v57, 20.0  ;;  %v7491_v8 = vld [vmem:[%s9800_s2] ss:$0 sm:$0xff] }
 0x1ed   : > { %10030 = vst [vmem:[#allocation80_spill] sm:$0xff] %v8294_v26  ;;  %v587_v60 = vmin.f32 %v8294_v26, 20.0  ;;  %v645_v37 = vmul.f32 1.442695, %v585_v62  ;;  %v8325_v25 = vadd.f32 %v7491_v8, %v7963_v44  ;;  %vm7502_vm5 = vmmov 0  }
 0x1ee   : > { %10026 = vst [vmem:[#allocation78_spill] sm:$0xff] %v8276_v3  ;;  %v7464_v52 = vpop.eup %7463  ;;  %2853 = vrot.lane.b32.xlu1 %v8276_v3, %s7501_s14  ;;  %10031 = vst [vmem:[#allocation81_spill] sm:$0xff] %v8300_v43  ;;  %v588_v51 = vmin.f32 %v8300_v43, 20.0  ;;  %6965 = vmatprep.mubr.msk.bf16.mxu1 %vm7502_vm5, %v9988_v5  ;;  %vm553_vm8 = vcmp.gt.f32.partialorder %v8272_v56, 20.0  ;;  %vm554_vm9 = vcmp.gt.f32.partialorder %v8281_v6, 20.0  ;;  %vm555_vm12 = vcmp.gt.f32.partialorder %v8294_v26, 20.0 }
 0x1ef   : > { %v7466_v17 = vpop.eup %7465  ;;  %v871_v19 = vmul.f32 0.6931472, %v7464_v52  ;;  %v8320_v52 = vadd.f32 %v7491_v8, %v7984_v50  ;;  %10035 = vst [vmem:[#allocation85_spill] sm:$0xff] %v8325_v25  ;;  %7467 = vpow2.f32 %v645_v37  ;;  %7025 = vmatprep.mubr.msk.bf16.mxu0 %vm7502_vm5, %v9988_v5  ;;  %v583_v62 = vmin.f32 %v8325_v25, 20.0 }
 0x1f0   : > { %v880_v28 = vmul.f32 0.6931472, %v7466_v17  ;;  %v651_v17 = vmul.f32 1.442695, %v588_v51  ;;  %vm556_vm13 = vcmp.gt.f32.partialorder %v8300_v43, 20.0 }
 0x1f1   : > { %v877_v22 = vsel %vm8283_vm1, %v874_v16, %v871_v19  ;;  %v647_v16 = vmul.f32 1.442695, %v586_v18  ;;  %10034 = vst [vmem:[#allocation84_spill] sm:$0xff] %v8320_v52  ;;  %v584_v50 = vmin.f32 %v8320_v52, 20.0  ;;  %v641_v44 = vmul.f32 1.442695, %v583_v62 }
 0x1f2   : > { %v886_v58 = vsel %vm885_vm2, %v883_v42, %v880_v28  ;;  %v8306_v54 = vsel %vm549_vm3, %v8021_v21, %v877_v22  ;;  %v649_v42 = vmul.f32 1.442695, %v587_v60  ;;  %vm552_vm0 = vcmp.gt.f32.partialorder %v8320_v52, 20.0 }
 0x1f3   : > { %v8309_v38 = vsel %vm550_vm4, %v8038_v57, %v886_v58  ;;  %7469 = vpow2.f32 %v647_v16  ;;  %v643_v19 = vmul.f32 1.442695, %v584_v50  ;;  %vm551_vm1 = vcmp.gt.f32.partialorder %v8325_v25, 20.0 }
 0x1f4   : > { %10032 = vst [vmem:[#allocation82_spill] sm:$0xff] %v8309_v38  ;;  %v8314_v13 = vpack.c.bf16 %v8309_v38, %v8306_v54  ;;  %7471 = vpow2.f32 %v649_v42  ;;  %vm2241_vm2 = vcmask 130048   ;;  %vm3252_vm3 = vcmask 1043456  }
 0x1f5   : > { %7473 = vpow2.f32 %v651_v17  ;;  %vm3248_vm4 = vcmask 64512  }
 0x1f6   : > { %10033 = vst [vmem:[#allocation83_spill] sm:$0xff] %v8314_v13  ;;  %2979 = vrot.lane.b32.xlu0 %v8314_v13, %s7501_s14  ;;  %7475 = vpow2.f32 %v643_v19 }
 0x1f7   : > { %7477 = vpow2.f32 %v641_v44 }
 0x1f9   : > { %v7468_v18 = vpop.eup %7467 }
 0x1fa   : > { %v905_v22 = vadd.f32 1.0, %v7468_v18  ;;  %v908_v42 = vmul.f32 -0.5, %v7468_v18  ;;  %v911_v33 = vand.u32 2147483647, %v7468_v18 }
 0x1fc   : > { %7479 = vlog2.f32 %v905_v22  ;;  %v909_v40 = vadd.f32 1.0, %v908_v42  ;;  %vm8339_vm6 = vcmp.lt.f32.partialorder %v911_v33, 0.0004427343 }
 0x1fd   : > { %v7470_v28 = vpop.eup %7469 }
 0x1fe   : > { %v7472_v58 = vpop.eup %7471  ;;  %v914_v60 = vadd.f32 1.0, %v7470_v28  ;;  %v917_v17 = vmul.f32 -0.5, %v7470_v28  ;;  %v920_v3 = vand.u32 2147483647, %v7470_v28 }
 0x1ff   : > { %v7474_v37 = vpop.eup %7473  ;;  %v923_v51 = vadd.f32 1.0, %v7472_v58  ;;  %v926_v22 = vmul.f32 -0.5, %v7472_v58 }
 0x200   : > { %7481 = vlog2.f32 %v914_v60  ;;  %v932_v16 = vadd.f32 1.0, %v7474_v37  ;;  %v8333_v8 = vpop.eup %7475  ;;  %v935_v24 = vmul.f32 -0.5, %v7474_v37  ;;  %v918_v13 = vadd.f32 1.0, %v917_v17 }
 0x201   : > { %7483 = vlog2.f32 %v923_v51  ;;  %v8335_v7 = vpop.eup %7477  ;;  %v896_v50 = vadd.f32 1.0, %v8333_v8  ;;  %v927_v39 = vadd.f32 1.0, %v926_v22  ;;  %vm8343_vm7 = vcmp.lt.f32.partialorder %v920_v3, 0.0004427343 }
 0x202   : > { %7485 = vlog2.f32 %v932_v16  ;;  %v887_v19 = vadd.f32 1.0, %v8335_v7  ;;  %v910_v16 = vmul.f32 %v7468_v18, %v909_v40  ;;  %v936_v55 = vadd.f32 1.0, %v935_v24 }
 0x203   : > { %7487 = vlog2.f32 %v896_v50  ;;  %v919_v35 = vmul.f32 %v7470_v28, %v918_v13  ;;  %v929_v50 = vand.u32 2147483647, %v7472_v58  ;;  %v928_v40 = vmul.f32 %v7472_v58, %v927_v39 }
 0x204   : > { %7489 = vlog2.f32 %v887_v19  ;;  %v899_v19 = vmul.f32 -0.5, %v8333_v8  ;;  %v937_v33 = vmul.f32 %v7474_v37, %v936_v55  ;;  %v890_v24 = vmul.f32 -0.5, %v8335_v7 }
 0x205   : > { %vm8355_vm10 = vcmp.lt.f32.partialorder %v929_v50, 0.0004427343  ;;  %v902_v58 = vand.u32 2147483647, %v8333_v8 }
 0x206   : > { %v7480_v60 = vpop.eup %7479  ;;  %v900_v39 = vadd.f32 1.0, %v899_v19 }
 0x207   : > { %v907_v42 = vmul.f32 0.6931472, %v7480_v60  ;;  %vm903_vm14 = vcmp.lt.f32.partialorder %v902_v58, 0.0004427343 }
 0x209   : > { %v913_v13 = vsel %vm8339_vm6, %v910_v16, %v907_v42  ;;  %v901_v42 = vmul.f32 %v8333_v8, %v900_v39 }
 0x20a   : > { %v7482_v51 = vpop.eup %7481  ;;  %v8365_v23 = vsel %vm553_vm8, %v8272_v56, %v913_v13 }
 0x20b   : > { %v7484_v32 = vpop.eup %7483  ;;  %v916_v30 = vmul.f32 0.6931472, %v7482_v51  ;;  %v893_v51 = vand.u32 2147483647, %v8335_v7 }
 0x20c   : > { %v7486_v17 = vpop.eup %7485  ;;  %v925_v18 = vmul.f32 0.6931472, %v7484_v32 }
 0x20d   : > { %v922_v3 = vsel %vm8343_vm7, %v919_v35, %v916_v30  ;;  %v934_v28 = vmul.f32 0.6931472, %v7486_v17  ;;  %v7488_v55 = vpop.eup %7487  ;;  %v891_v35 = vadd.f32 1.0, %v890_v24  ;;  %vm894_vm15 = vcmp.lt.f32.partialorder %v893_v51, 0.0004427343 }
 0x20e   : > { %v8368_v30 = vsel %vm554_vm9, %v8281_v6, %v922_v3  ;;  %v7490_v32 = vpop.eup %7489  ;;  %v931_v38 = vsel %vm8355_vm10, %v928_v40, %v925_v18  ;;  %v898_v16 = vmul.f32 0.6931472, %v7488_v55 }
 0x20f   : > { %v8380_v17 = vpack.c.bf16 %v8368_v30, %v8365_v23  ;;  %v889_v40 = vmul.f32 0.6931472, %v7490_v32 }
 0x210   : > { %v904_v8 = vsel %vm903_vm14, %v901_v42, %v898_v16  ;;  %v2207_v16 = vpack.c.bf16 %v7743_v11, %v7735_v61 }
 0x211   : > { %v8399_v3 = vsel %vm552_vm0, %v8320_v52, %v904_v8 }
 0x213   : > { %v2287_v44 = vpop.permute.xlu1 %2286 }
 0x214   : > { %2289 = vxpose.xlu0.c.b16.start.end [1/1] (short) (narrow) %v2287_v44, 16 }
 0x215   : > { %v2223_v62 = vpop.permute.xlu0 %2222 }
 0x216   : > { %2225 = vxpose.xlu1.c.b16.start.end [1/1] (short) (narrow) %v2223_v62, 16  ;;  %v938_v62 = vand.u32 2147483647, %v7474_v37 }
 0x218   : > { %vm8359_vm11 = vcmp.lt.f32.partialorder %v938_v62, 0.0004427343  ;;  %v8383_v62 = vsel %vm555_vm12, %v8294_v26, %v931_v38 }
 0x219   : > { %v940_v60 = vsel %vm8359_vm11, %v937_v33, %v934_v28  ;;  %v892_v33 = vmul.f32 %v8335_v7, %v891_v35 }
 0x21a   : > { %v8386_v19 = vsel %vm556_vm13, %v8300_v43, %v940_v60  ;;  %v2206_v60 = vpack.c.bf16 %v7720_v20, %v7713_v15 }
 0x21b   : > { %v8393_v24 = vpack.c.bf16 %v8386_v19, %v8383_v62  ;;  %v895_v13 = vsel %vm894_vm15, %v892_v33, %v889_v40  ;;  %v2209_v33 = vpack.c.bf16 %v7787_v2, %v7784_v1 }
 0x21c   : > { %v8403_v7 = vsel %vm551_vm1, %v8325_v25, %v895_v13 }
 0x21d   : > { %v8407_v18 = vpack.c.bf16 %v8399_v3, %v8403_v7 }
 0x223   : > { %v2413_v37 = vpop.permute.xlu1 %2412 }
 0x224   : > { %2415 = vxpose.xlu1.c.b16.start.end [1/1] (short) (narrow) %v2413_v37, 16 }
 0x227   : > { %v2350_v50 = vpop.permute.xlu1 %2349 }
 0x228   : > { %2352 = vxpose.xlu0.c.b16.start.end [1/1] (short) (narrow) %v2350_v50, 16  ;;  %3105 = vrot.lane.b32.xlu1 %v8380_v17, %s7501_s14  ;;  %v2208_v50 = vpack.c.bf16 %v7739_v4, %v7732_v53 }
 0x22c   : > { %3168 = vrot.lane.b32.xlu1 %v8393_v24, %s7501_s14 }
 0x22f   : > { %v2539_v28 = vpop.permute.xlu0 %2538 }
 0x231   : > { %3042 = vrot.lane.b32.xlu0 %v8407_v18, %s7501_s14 }
 0x237   : > { %v2476_v44 = vpop.permute.xlu1 %2475 }
 0x241   : > { %v2665_v39 = vpop.permute.xlu0 %2664 }
 0x24e   : > { %v2602_v22 = vpop.permute.xlu1 %2601 }
 0x24f   : > { %2478 = vxpose.xlu0.c.b16.start.end [1/1] (short) (narrow) %v2476_v44, 16  ;;  %2541 = vxpose.xlu1.c.b16.start.end [1/1] (short) (narrow) %v2539_v28, 16 }
 0x252   : > { %v2791_v58 = vpop.permute.xlu1 %2790 }
 0x253   : > { %2604 = vxpose.xlu0.c.b16.start.end [1/1] (short) (narrow) %v2602_v22, 16  ;;  %v10045_v22 = vld [vmem:[#allocation40_spill] sm:$0xff] }
 0x255   : > { %v2728_v55 = vpop.permute.xlu0 %2727 }
 0x257   : > { %2667 = vxpose.xlu0.c.b16.start.end [1/1] (short) (narrow) %v2665_v39, 16  ;;  %v10046_v39 = vld [vmem:[#allocation41_spill] sm:$0xff] }
 0x259   : > { %v2917_v37 = vpop.permute.xlu0 %2916 }
 0x25b   : > { %2730 = vxpose.xlu0.c.b16.start.end [1/1] (short) (narrow) %v2728_v55, 16  ;;  %v2211_v55 = vpack.c.bf16 %v7913_v46, %v7889_v48 }
 0x25f   : > { %2793 = vxpose.xlu0.c.b16.start.end [1/1] (short) (narrow) %v2791_v58, 16  ;;  %v10049_v58 = vld [vmem:[#allocation45_spill] sm:$0xff] }
 0x260   : > { %v2854_v35 = vpop.permute.xlu1 %2853 }
 0x263   : > { %2919 = vxpose.xlu0.c.b16.start.end [1/1] (short) (narrow) %v2917_v37, 16  ;;  %v10050_v37 = vld [vmem:[#allocation47_spill] sm:$0xff] }
 0x267   : > { %2856 = vxpose.xlu0.c.b16.start.end [1/1] (short) (narrow) %v2854_v35, 16  ;;  %v10051_v35 = vld [vmem:[#allocation48_spill] sm:$0xff] }
 0x268   : > { %v2980_v32 = vpop.permute.xlu0 %2979 }
 0x26b   : > { %2982 = vxpose.xlu0.c.b16.start.end [1/1] (short) (narrow) %v2980_v32, 16  ;;  %v2212_v32 = vpack.c.bf16 %v10051_v35, %v10050_v37 }
 0x27a   : > { %v2297_v51 = vpop.trf.xlu0 }
 0x27c   : > { %v2233_v38 = vpop.trf.xlu1 }
 0x27d   : > { %6966 = vmatmul.mubr.msk.bf16.vlgmr.msra.gmra.mrb[0].mxu1 %vm2241_vm2, %v2233_v38  ;;  %v10052_v38 = vld [vmem:[#allocation53_spill] sm:$0xff] }
 0x27e   : > { %6970 = vmatpush3.bf16.msra.mxu1 %v2206_v60  ;;  %6971 = vmatprep.mubr.msk.bf16.mxu1 %vm7502_vm5, %v9988_v5  ;;  %v2213_v60 = vpack.c.bf16 %v7957_v47, %v7948_v63 }
 0x27f   : > { %6975 = vmatprep.subr.bf16.mxu1 %v9988_v5 }
 0x285   : > { %6972 = vmatmul.mubr.msk.bf16.vlgmr.msra.gmra.mrb[4].mxu1 %vm2241_vm2, %v2297_v51 }
 0x286   : > { %6976 = vmatpush3.bf16.msra.mxu1 %v2207_v16  ;;  %6977 = vmatprep.mubr.msk.bf16.mxu1 %vm7502_vm5, %v9988_v5  ;;  %v2217_v16 = vpack.c.bf16 %v8038_v57, %v8021_v21 }
 0x287   : > { %6981 = vmatprep.subr.bf16.mxu1 %v9988_v5 }
 0x28a   : > { %v2423_v40 = vpop.trf.xlu1 }
 0x28e   : > { %v2360_v42 = vpop.trf.xlu0 }
 0x28f   : > { %6978 = vmatmul.mubr.msk.bf16.vlgmr.msra.gmra.mrb[8].mxu1 %vm2241_vm2, %v2360_v42  ;;  %v2214_v42 = vpack.c.bf16 %v7931_v14, %v7917_v36 }
 0x290   : > { %6982 = vmatpush3.bf16.msra.mxu1 %v2208_v50  ;;  %6983 = vmatprep.mubr.msk.bf16.mxu1 %vm7502_vm5, %v9988_v5  ;;  %v2219_v50 = vpack.c.bf16 %v8281_v6, %v8272_v56 }
 0x291   : > { %6987 = vmatprep.subr.bf16.mxu1 %v9988_v5 }
 0x297   : > { %6984 = vmatmul.mubr.msk.bf16.vlgmr.msra.gmra.mrb[12].mxu1 %vm2241_vm2, %v2423_v40  ;;  %v10057_v40 = vld [vmem:[#allocation82_spill] sm:$0xff] }
 0x298   : > { %6988 = vmatpush3.bf16.msra.mxu1 %v2209_v33  ;;  %6989 = vmatprep.mubr.msk.bf16.mxu1 %vm7502_vm5, %v9988_v5  ;;  %v10059_v33 = vld [vmem:[#allocation63_spill] sm:$0xff] }
 0x299   : > { %6993 = vmatprep.subr.bf16.mxu1 %v9988_v5 }
 0x29a   : > { %v3106_v8 = vpop.permute.xlu1 %3105 }
 0x29e   : > { %v3169_v13 = vpop.permute.xlu1 %3168 }
 0x29f   : > { %3171 = vxpose.xlu1.c.b16.start.end [1/1] (short) (narrow) %v3169_v13, 16 }
 0x2a3   : > { %1553 = vrot.lane.b32.xlu1 %v7799_v27, %s7503_s19  ;;  %v3043_v28 = vpop.permute.xlu0 %3042  ;;  %v10044_v27 = vld [vmem:[#allocation49_spill] sm:$0xff] }
 0x2a4   : > { %3045 = vxpose.xlu0.c.b16.start.end [1/1] (short) (narrow) %v3043_v28, 16  ;;  %v10061_v28 = vld [vmem:[#allocation72_spill] sm:$0xff] }
 0x2a7   : > { %1557 = vrot.lane.b32.xlu1 %v7901_v0, %s7503_s19  ;;  %v2210_v0 = vpack.c.bf16 %v10046_v39, %v10045_v22 }
 0x2a8   : > { %3108 = vxpose.xlu0.c.b16.start.end [1/1] (short) (narrow) %v3106_v8, 16  ;;  %v10060_v8 = vld [vmem:[#allocation64_spill] sm:$0xff] }
 0x2a9   : > { %v2216_v13 = vpack.c.bf16 %v10060_v8, %v10059_v33 }
 0x2ab   : > { %1565 = vrot.lane.b32.xlu1 %v8030_v29, %s7503_s19 }
 0x2af   : > { %1573 = vrot.lane.b32.xlu1 %v8153_v41, %s7503_s19 }
 0x2b1   : > { %1549 = vrot.lane.b32.xlu0 %v7819_v9, %s7503_s19  ;;  %v10047_v9 = vld [vmem:[#allocation60_spill] sm:$0xff] }
 0x2b3   : > { %1581 = vrot.lane.b32.xlu1 %v8210_v34, %s7503_s19  ;;  %v10048_v34 = vld [vmem:[#allocation68_spill] sm:$0xff] }
 0x2b5   : > { %1561 = vrot.lane.b32.xlu0 %v10044_v27, %s7503_s19  ;;  %v2486_v44 = vpop.trf.xlu0  ;;  %v2549_v41 = vpop.trf.xlu1  ;;  %v10062_v27 = vld [vmem:[#allocation46_spill] sm:$0xff] }
 0x2b6   : > { %6990 = vmatmul.mubr.msk.bf16.vlgmr.msra.gmra.mrb[16].mxu1 %vm2241_vm2, %v2486_v44  ;;  %v10063_v44 = vld [vmem:[#allocation75_spill] sm:$0xff] }
 0x2b7   : > { %6994 = vmatpush3.bf16.msra.mxu1 %v2210_v0  ;;  %1589 = vrot.lane.b32.xlu1 %v8265_v49, %s7503_s19  ;;  %v2218_v0 = vpack.c.bf16 %v8320_v52, %v8325_v25 }
 0x2b8   : > { %6995 = vmatprep.mubr.msk.bf16.mxu1 %vm7502_vm5, %v9988_v5  ;;  %6999 = vmatprep.subr.bf16.mxu1 %v9988_v5 }
 0x2b9   : > { %1569 = vrot.lane.b32.xlu0 %v10047_v9, %s7503_s19  ;;  %v2612_v29 = vpop.trf.xlu0  ;;  %v10065_v9 = vld [vmem:[#allocation67_spill] sm:$0xff] }
 0x2bb   : > { %1597 = vrot.lane.b32.xlu1 %v8306_v54, %s7503_s19 }
 0x2bd   : > { %1577 = vrot.lane.b32.xlu0 %v10048_v34, %s7503_s19  ;;  %v2675_v49 = vpop.trf.xlu0  ;;  %v10068_v34 = vld [vmem:[#allocation74_spill] sm:$0xff] }
 0x2be   : > { %6996 = vmatmul.mubr.msk.bf16.vlgmr.msra.gmra.mrb[20].mxu1 %vm2241_vm2, %v2549_v41  ;;  %v10067_v41 = vld [vmem:[#allocation44_spill] sm:$0xff] }
 0x2bf   : > { %7000 = vmatpush3.bf16.msra.mxu1 %v2211_v55  ;;  %1605 = vrot.lane.b32.xlu1 %v8365_v23, %s7503_s19  ;;  %v10069_v55 = vld [vmem:[#allocation51_spill] sm:$0xff] }
 0x2c0   : > { %7001 = vmatprep.mubr.msk.bf16.mxu1 %vm7502_vm5, %v9988_v5  ;;  %7005 = vmatprep.subr.bf16.mxu1 %v9988_v5 }
 0x2c1   : > { %1585 = vrot.lane.b32.xlu0 %v8183_v10, %s7503_s19  ;;  %v2738_v54 = vpop.trf.xlu0 }
 0x2c3   : > { %1551 = vrot.lane.b32.xlu1 %v10049_v58, %s7503_s19  ;;  %v10074_v58 = vld [vmem:[#allocation73_spill] sm:$0xff] }
 0x2c5   : > { %1593 = vrot.lane.b32.xlu0 %v8239_v12, %s7503_s19  ;;  %v2801_v23 = vpop.trf.xlu0  ;;  %v10053_v12 = vld [vmem:[#allocation66_spill] sm:$0xff] }
 0x2c6   : > { %7002 = vmatmul.mubr.msk.bf16.vlgmr.msra.gmra.mrb[24].mxu1 %vm2241_vm2, %v2612_v29  ;;  %v10066_v29 = vld [vmem:[#allocation71_spill] sm:$0xff] }
 0x2c7   : > { %7006 = vmatpush3.bf16.msra.mxu1 %v2212_v32  ;;  %1559 = vrot.lane.b32.xlu1 %v10052_v38, %s7503_s19  ;;  %v10075_v32 = vld [vmem:[#allocation76_spill] sm:$0xff]  ;;  %v2220_v38 = vpack.c.bf16 %v8300_v43, %v8294_v26 }
 0x2c8   : > { %7007 = vmatprep.mubr.msk.bf16.mxu1 %vm7502_vm5, %v9988_v5  ;;  %7011 = vmatprep.subr.bf16.mxu1 %v9988_v5 }
 0x2c9   : > { %1601 = vrot.lane.b32.xlu0 %v8403_v7, %s7503_s19  ;;  %v2927_v10 = vpop.trf.xlu0 }
 0x2cb   : > { %1567 = vrot.lane.b32.xlu1 %v10053_v12, %s7503_s19 }
 0x2cd   : > { %1609 = vrot.lane.b32.xlu0 %v8383_v62, %s7503_s19  ;;  %v2864_v51 = vpop.trf.xlu0  ;;  %v10054_v62 = vld [vmem:[#allocation43_spill] sm:$0xff] }
 0x2ce   : > { %7008 = vmatmul.mubr.msk.bf16.vlgmr.msra.gmra.mrb[28].mxu1 %vm2241_vm2, %v2675_v49  ;;  %7026 = vmatmul.mubr.msk.bf16.vlgmr.msra.gmra.mrb[32].mxu0 %vm2241_vm2, %v2864_v51  ;;  %v10071_v49 = vld [vmem:[#allocation62_spill] sm:$0xff] }
 0x2cf   : > { %7012 = vmatpush3.bf16.msra.mxu1 %v2213_v60  ;;  %1575 = vrot.lane.b32.xlu1 %v8158_v31, %s7503_s19  ;;  %v10055_v31 = vld [vmem:[#allocation50_spill] sm:$0xff] }
 0x2d0   : > { %7013 = vmatprep.mubr.msk.bf16.mxu1 %vm7502_vm5, %v9988_v5  ;;  %7036 = vmatpush3.bf16.msra.mxu0 %v2217_v16 }
 0x2d1   : > { %1555 = vrot.lane.b32.xlu0 %v10054_v62, %s7503_s19  ;;  %7017 = vmatprep.subr.bf16.mxu1 %v9988_v5  ;;  %v2990_v7 = vpop.trf.xlu0 }
 0x2d2   : > { %7037 = vmatprep.mubr.msk.bf16.mxu0 %vm7502_vm5, %v9988_v5  ;;  %7047 = vmatprep.subr.bf16.mxu0 %v9988_v5 }
 0x2d3   : > { %1583 = vrot.lane.b32.xlu1 %v8215_v59, %s7503_s19  ;;  %v10056_v59 = vld [vmem:[#allocation61_spill] sm:$0xff] }
 0x2d5   : > { %1563 = vrot.lane.b32.xlu0 %v10055_v31, %s7503_s19 }
 0x2d6   : > { %7014 = vmatmul.mubr.msk.bf16.vlgmr.msra.gmra.mrb[32].mxu1 %vm2241_vm2, %v2738_v54  ;;  %7038 = vmatmul.mubr.msk.bf16.vlgmr.msra.gmra.mrb[36].mxu0 %vm2241_vm2, %v2990_v7  ;;  %v10073_v54 = vld [vmem:[#allocation70_spill] sm:$0xff] }
 0x2d7   : > { %7018 = vmatpush3.bf16.msra.mxu1 %v2214_v42  ;;  %1591 = vrot.lane.b32.xlu1 %v8268_v45, %s7503_s19  ;;  %v10058_v45 = vld [vmem:[#allocation69_spill] sm:$0xff] }
 0x2d8   : > { %7019 = vmatprep.mubr.msk.bf16.mxu1 %vm7502_vm5, %v9988_v5  ;;  %7048 = vmatpush3.bf16.msra.mxu0 %v2219_v50 }
 0x2d9   : > { %1571 = vrot.lane.b32.xlu0 %v10056_v59, %s7503_s19  ;;  %7029 = vmatprep.subr.bf16.mxu1 %v9988_v5 }
 0x2da   : > { %7049 = vmatprep.mubr.msk.bf16.mxu0 %vm7502_vm5, %v9988_v5  ;;  %7059 = vmatprep.subr.bf16.mxu0 %v9988_v5 }
 0x2db   : > { %1599 = vrot.lane.b32.xlu1 %v10057_v40, %s7503_s19  ;;  %v7504_v40 = vmov 1983009808  }
 0x2dd   : > { %1579 = vrot.lane.b32.xlu0 %v10058_v45, %s7503_s19  ;;  %v976_v45 = vunpack.c.l.s4 %v7504_v40 }
 0x2de   : > { %7020 = vmatmul.mubr.msk.bf16.vlgmr.msra.gmra.mrb[36].mxu1 %vm2241_vm2, %v2801_v23 }
 0x2df   : > { %7030 = vmatpush3.bf16.msra.mxu1 %v2216_v13  ;;  %1607 = vrot.lane.b32.xlu1 %v8368_v30, %s7503_s19  ;;  %v10064_v30 = vld [vmem:[#allocation54_spill] sm:$0xff]  ;;  %v978_v13 = vlaneseq }
 0x2e0   : > { %7031 = vmatprep.mubr.msk.bf16.mxu1 %vm7502_vm5, %v9988_v5  ;;  %7041 = vmatprep.subr.bf16.mxu1 %v9988_v5 }
 0x2e1   : > { %1587 = vrot.lane.b32.xlu0 %v10061_v28, %s7503_s19 }
 0x2e3   : > { %3246 = vrot.lane.b32.xlu1 %v10062_v27, %s7503_s19 }
 0x2e5   : > { %1595 = vrot.lane.b32.xlu0 %v10063_v44, %s7503_s19  ;;  %v7505_v44 = vmov 1934713408  }
 0x2e6   : > { %7032 = vmatmul.mubr.msk.bf16.vlgmr.msra.gmra.mrb[40].mxu1 %vm2241_vm2, %v2927_v10 }
 0x2e7   : > { %7042 = vmatpush3.bf16.msra.mxu1 %v2218_v0  ;;  %3346 = vrot.lane.b32.xlu1 %v10064_v30, %s7503_s19  ;;  %v1040_v0 = vunpack.c.l.s4 %v7505_v44  ;;  %v977_v30 = vunpack.c.0.s8 %v976_v45 }
 0x2e8   : > { %7043 = vmatprep.mubr.msk.bf16.mxu1 %vm7502_vm5, %v9988_v5  ;;  %7053 = vmatprep.subr.bf16.mxu1 %v9988_v5 }
 0x2e9   : > { %1603 = vrot.lane.b32.xlu0 %v8399_v3, %s7503_s19  ;;  %v10070_v3 = vld [vmem:[#allocation78_spill] sm:$0xff] }
 0x2eb   : > { %3444 = vrot.lane.b32.xlu1 %v10065_v9, %s7503_s19  ;;  %v979_v9 = vshrl.u32 %v978_v13, 7 }
 0x2ed   : > { %1611 = vrot.lane.b32.xlu0 %v8386_v19, %s7503_s19  ;;  %v10072_v19 = vld [vmem:[#allocation83_spill] sm:$0xff] }
 0x2ef   : > { %3542 = vrot.lane.b32.xlu1 %v10066_v29, %s7503_s19 }
 0x2f1   : > { %3297 = vrot.lane.b32.xlu0 %v10067_v41, %s7503_s19 }
 0x2f3   : > { %3640 = vrot.lane.b32.xlu1 %v10068_v34, %s7503_s19 }
 0x2f5   : > { %3395 = vrot.lane.b32.xlu0 %v10069_v55, %s7503_s19  ;;  %v1041_v55 = vunpack.c.0.s8 %v1040_v0 }
 0x2f7   : > { %3738 = vrot.lane.b32.xlu1 %v10070_v3, %s7503_s19  ;;  %v8621_v40 = vsub.s32 %v1041_v55, %v979_v9 }
 0x2f9   : > { %3493 = vrot.lane.b32.xlu0 %v10071_v49, %s7503_s19  ;;  %v8611_v49 = vsub.s32 %v977_v30, %v979_v9 }
 0x2fb   : > { %3836 = vrot.lane.b32.xlu1 %v10072_v19, %s7503_s19 }
 0x2fd   : > { %3591 = vrot.lane.b32.xlu0 %v10073_v54, %s7503_s19 }
 0x2ff   : > { %3934 = vrot.lane.b32.xlu1 %v8380_v17, %s7503_s19 }
 0x301   : > { %3689 = vrot.lane.b32.xlu0 %v10074_v58, %s7503_s19 }
 0x305   : > { %3787 = vrot.lane.b32.xlu0 %v10075_v32, %s7503_s19  ;;  %v3179_v10 = vpop.trf.xlu1 }
 0x309   : > { %3885 = vrot.lane.b32.xlu0 %v8407_v18, %s7503_s19 }
 0x30a   : > { %v3053_v23 = vpop.trf.xlu0 }
 0x30b   : > { %7044 = vmatmul.mubr.msk.bf16.vlgmr.msra.gmra.mrb[44].mxu1 %vm2241_vm2, %v3053_v23 }
 0x30c   : > { %7054 = vmatpush3.bf16.msra.mxu1 %v2220_v38  ;;  %7055 = vmatprep.mubr.msk.bf16.mxu1 %vm7502_vm5, %v9988_v5 }
 0x30d   : > { %3983 = vrot.lane.b32.xlu0 %v8393_v24, %s7503_s19  ;;  %7065 = vmatprep.subr.bf16.mxu1 %v9988_v5 }
 0x30e   : > { %v3116_v17 = vpop.trf.xlu0 }
 0x30f   : > { %7050 = vmatmul.mubr.msk.bf16.vlgmr.msra.gmra.mrb[40].mxu0 %vm2241_vm2, %v3116_v17 }
 0x310   : > { %7061 = vmatprep.mubr.msk.bf16.mxu0 %vm7502_vm5, %v9988_v5 }
 0x313   : > { %7056 = vmatmul.mubr.msk.bf16.vlgmr.msra.gmra.mrb[48].mxu1 %vm2241_vm2, %v3179_v10 }
 0x314   : > { %7067 = vmatprep.mubr.msk.bf16.mxu1 %vm7502_vm5, %v9988_v5 }
 0x315   : > { %v8597_v18 = vpop.permute.xlu1 %1553 }
 0x319   : > { %v8599_v12 = vpop.permute.xlu1 %1557 }
 0x31d   : > { %v1566_v60 = vpop.permute.xlu1 %1565 }
 0x321   : > { %v1574_v24 = vpop.permute.xlu1 %1573 }
 0x322   : > { %v1677_v19 = vcombine.low %v1566_v60, %v1574_v24  ;;  %v1678_v54 = vcombine.high %v1566_v60, %v1574_v24 }
 0x323   : > { %v8601_v51 = vpop.permute.xlu0 %1549 }
 0x324   : > { %v1645_v38 = vcombine.low %v8601_v51, %v8599_v12  ;;  %v1685_v60 = vrot.slane %v1677_v19, %v8611_v49  ;;  %v8626_v24 = vrot.slane %v1678_v54, %v8611_v49 }
 0x325   : > { %v8603_v16 = vpop.permute.xlu1 %1581 }
 0x326   : > { %v1653_v9 = vrot.slane %v1645_v38, %v8611_v49 }
 0x327   : > { %v1562_v62 = vpop.permute.xlu0 %1561 }
 0x328   : > { %v1661_v58 = vcombine.low %v8597_v18, %v1562_v62  ;;  %v1662_v55 = vcombine.high %v8597_v18, %v1562_v62 }
 0x329   : > { %v8605_v31 = vpop.permute.xlu1 %1589 }
 0x32a   : > { %v1781_v23 = vcombine.low %v8603_v16, %v8605_v31  ;;  %v1669_v44 = vrot.slane %v1661_v58, %v8611_v49  ;;  %v1676_v38 = vrot.slane %v1662_v55, %v8611_v49 }
 0x32b   : > { %v1570_v7 = vpop.permute.xlu0 %1569 }
 0x32c   : > { %v1789_v20 = vrot.slane %v1781_v23, %v8611_v49 }
 0x32d   : > { %v1598_v42 = vpop.permute.xlu1 %1597 }
 0x32f   : > { %v1578_v50 = vpop.permute.xlu0 %1577 }
 0x330   : > { %v1693_v41 = vcombine.low %v1570_v7, %v1578_v50  ;;  %v1694_v0 = vcombine.high %v1570_v7, %v1578_v50  ;;  %v1709_v50 = vcombine.low %v1653_v9, %v1669_v44 }
 0x331   : > { %v1606_v59 = vpop.permute.xlu1 %1605 }
 0x332   : > { %v1701_v17 = vrot.slane %v1693_v41, %v8611_v49  ;;  %v1813_v45 = vcombine.low %v1598_v42, %v1606_v59  ;;  %v1814_v4 = vcombine.high %v1598_v42, %v1606_v59  ;;  %v1646_v42 = vcombine.high %v8601_v51, %v8599_v12 }
 0x333   : > { %v1586_v28 = vpop.permute.xlu0 %1585  ;;  %v1782_v59 = vcombine.high %v8603_v16, %v8605_v31  ;;  %v1708_v18 = vrot.slane %v1694_v0, %v8611_v49 }
 0x334   : > { %v1741_v14 = vcombine.low %v1685_v60, %v1701_v17  ;;  %v1821_v19 = vrot.slane %v1813_v45, %v8611_v49 }
 0x335   : > { %v8607_v27 = vpop.permute.xlu1 %1551 }
 0x337   : > { %v1594_v29 = vpop.permute.xlu0 %1593 }
 0x338   : > { %v1797_v3 = vcombine.low %v1586_v28, %v1594_v29 }
 0x339   : > { %v8609_v34 = vpop.permute.xlu1 %1559 }
 0x33a   : > { %v1805_v13 = vrot.slane %v1797_v3, %v8611_v49  ;;  %v1798_v3 = vcombine.high %v1586_v28, %v1594_v29  ;;  %v1742_v28 = vcombine.high %v1685_v60, %v1701_v17  ;;  %v1828_v29 = vrot.slane %v1814_v4, %v8611_v49 }
 0x33b   : > { %v1602_v32 = vpop.permute.xlu0 %1601  ;;  %v1660_v17 = vrot.slane %v1646_v42, %v8611_v49  ;;  %v1717_v4 = vrot.slane %v1709_v50, %v8621_v40  ;;  %v1796_v60 = vrot.slane %v1782_v59, %v8611_v49 }
 0x33c   : > { %v1845_v54 = vcombine.low %v1789_v20, %v1805_v13  ;;  %v1812_v45 = vrot.slane %v1798_v3, %v8611_v49  ;;  %v1846_v12 = vcombine.high %v1789_v20, %v1805_v13  ;;  %v1756_v20 = vrot.slane %v1742_v28, %v8621_v40 }
 0x33d   : > { %v8619_v10 = vpop.permute.xlu1 %1567  ;;  %v1757_v13 = vcombine.low %v8626_v24, %v1708_v18  ;;  %v1725_v50 = vcombine.low %v1660_v17, %v1676_v38 }
 0x33e   : > { %v1853_v16 = vrot.slane %v1845_v54, %v8621_v40  ;;  %v1860_v55 = vrot.slane %v1846_v12, %v8621_v40  ;;  %v1861_v3 = vcombine.low %v1796_v60, %v1812_v45  ;;  %v1758_v12 = vcombine.high %v8626_v24, %v1708_v18 }
 0x33f   : > { %v1610_v30 = vpop.permute.xlu0 %1609  ;;  %v1765_v39 = vrot.slane %v1757_v13, %v8621_v40 }
 0x340   : > { %v1829_v41 = vcombine.low %v1602_v32, %v1610_v30  ;;  %v1830_v11 = vcombine.high %v1602_v32, %v1610_v30  ;;  %v1710_v30 = vcombine.high %v1653_v9, %v1669_v44 }
 0x341   : > { %v8632_v8 = vpop.permute.xlu1 %1575 }
 0x342   : > { %v1837_v58 = vrot.slane %v1829_v41, %v8611_v49  ;;  %v1844_v7 = vrot.slane %v1830_v11, %v8611_v49  ;;  %v1749_v11 = vrot.slane %v1741_v14, %v8621_v40  ;;  %v1724_v42 = vrot.slane %v1710_v30, %v8621_v40 }
 0x343   : > { %v8642_v62 = vpop.permute.xlu0 %1555  ;;  %v1869_v30 = vrot.slane %v1861_v3, %v8621_v40 }
 0x344   : > { %v1877_v32 = vcombine.low %v1821_v19, %v1837_v58  ;;  %v1878_v23 = vcombine.high %v1821_v19, %v1837_v58  ;;  %v1893_v0 = vcombine.low %v1828_v29, %v1844_v7  ;;  %v1774_v54 = vcombine.high %v1717_v4, %v1749_v11 }
 0x345   : > { %v8648_v51 = vpop.permute.xlu1 %1583  ;;  %v1773_v58 = vcombine.low %v1717_v4, %v1749_v11  ;;  %v1894_v59 = vcombine.high %v1828_v29, %v1844_v7  ;;  %v1776_v35 = vcombine.high %v1724_v42, %v1756_v20  ;;  %v1862_v11 = vcombine.high %v1796_v60, %v1812_v45 }
 0x346   : > { %v1885_v31 = vrot.slane %v1877_v32, %v8621_v40  ;;  %v1892_v41 = vrot.slane %v1878_v23, %v8621_v40  ;;  %v1901_v32 = vrot.slane %v1893_v0, %v8621_v40  ;;  %v1775_v29 = vcombine.low %v1724_v42, %v1756_v20 }
 0x347   : > { %v8656_v14 = vpop.permute.xlu0 %1563  ;;  %v1726_v0 = vcombine.high %v1660_v17, %v1676_v38  ;;  %v1733_v4 = vrot.slane %v1725_v50, %v8621_v40  ;;  %v1908_v24 = vrot.slane %v1894_v59, %v8621_v40 }
 0x348   : > { %v1910_v44 = vcombine.high %v1853_v16, %v1885_v31  ;;  %v1909_v9 = vcombine.low %v1853_v16, %v1885_v31  ;;  %v1912_v16 = vcombine.high %v1860_v55, %v1892_v41  ;;  %v1911_v31 = vcombine.low %v1860_v55, %v1892_v41 }
 0x349   : > { %v8661_v19 = vpop.permute.xlu1 %1591  ;;  %v1914_v41 = vcombine.high %v1869_v30, %v1901_v32  ;;  %v1913_v13 = vcombine.low %v1869_v30, %v1901_v32  ;;  %v1778_v17 = vcombine.high %v1733_v4, %v1765_v39  ;;  %v1777_v20 = vcombine.low %v1733_v4, %v1765_v39 }
 0x34a   : > { %v8667_v28 = vpack.c.bf16 %v1910_v44, %v1774_v54  ;;  %v8669_v47 = vpack.c.bf16 %v1909_v9, %v1773_v58  ;;  %v8684_v45 = vpack.c.bf16 %v1912_v16, %v1776_v35  ;;  %v8686_v60 = vpack.c.bf16 %v1911_v31, %v1775_v29 }
 0x34b   : > { %v8665_v23 = vpop.permute.xlu0 %1571  ;;  %v1772_v44 = vrot.slane %v1758_v12, %v8621_v40  ;;  %v1876_v9 = vrot.slane %v1862_v11, %v8621_v40  ;;  %v1740_v35 = vrot.slane %v1726_v0, %v8621_v40  ;;  %v8699_v58 = vpack.c.bf16 %v1914_v41, %v1778_v17 }
 0x34c   : > { %4128 = vrot.lane.b32.xlu0 %v8667_v28, %s7506_s20  ;;  %4065 = vrot.lane.b32.xlu1 %v8669_v47, %s7506_s20  ;;  %v8701_v42 = vpack.c.bf16 %v1913_v13, %v1777_v20  ;;  %v1933_v13 = vcombine.low %v8642_v62, %v8656_v14  ;;  %v1918_v20 = vcombine.high %v8607_v27, %v8609_v34 }
 0x34d   : > { %v8678_v7 = vpop.permute.xlu1 %1599  ;;  %v1916_v50 = vcombine.high %v1876_v9, %v1908_v24  ;;  %v1915_v32 = vcombine.low %v1876_v9, %v1908_v24  ;;  %v1780_v39 = vcombine.high %v1740_v35, %v1772_v44  ;;  %v1779_v30 = vcombine.low %v1740_v35, %v1772_v44 }
 0x34e   : > { %v1949_v24 = vcombine.low %v8619_v10, %v8632_v8  ;;  %v1917_v44 = vcombine.low %v8607_v27, %v8609_v34  ;;  %v1950_v35 = vcombine.high %v8619_v10, %v8632_v8 }
 0x34f   : > { %v8682_v18 = vpop.permute.xlu0 %1579  ;;  %v8710_v4 = vpack.c.bf16 %v1916_v50, %v1780_v39  ;;  %v8715_v41 = vpack.c.bf16 %v1915_v32, %v1779_v30  ;;  %v1934_v39 = vcombine.high %v8642_v62, %v8656_v14 }
 0x350   : > { %4254 = vrot.lane.b32.xlu0 %v8684_v45, %s7506_s20  ;;  %4191 = vrot.lane.b32.xlu1 %v8686_v60, %s7506_s20  ;;  %v2279_v55 = vpop.f32.mrb[0].mxu1  ;;  %v1965_v29 = vcombine.low %v8665_v23, %v8682_v18  ;;  %v1957_v32 = vrot.slane %v1949_v24, %v8611_v49  ;;  %v1966_v27 = vcombine.high %v8665_v23, %v8682_v18 }
 0x351   : > { %v8694_v38 = vpop.permute.xlu1 %1607  ;;  %v3230_v3 = vpack.c.bf16 %v2279_v55, %v2279_v55  ;;  %v6967_v59 = vpop.f32.mrb[1].mxu1  ;;  %10076 = vst [vmem:[#allocation49_spill] sm:$0xff] %v8710_v4  ;;  %v1925_v10 = vrot.slane %v1917_v44, %v8611_v49  ;;  %v8751_v62 = vrot.slane %v1950_v35, %v8611_v49  ;;  %v2054_v35 = vcombine.high %v8648_v51, %v8661_v19 }
 0x352   : > { %v2282_v16 = vpop.f32.mrb[2].mxu1  ;;  %v1973_v55 = vrot.slane %v1965_v29, %v8611_v49  ;;  %v8748_v29 = vrot.slane %v1918_v20, %v8611_v49  ;;  %v2086_v23 = vcombine.high %v8678_v7, %v8694_v38 }
 0x353   : > { %v8697_v54 = vpop.permute.xlu0 %1587  ;;  %v3254_v31 = vsel %vm3252_vm3, %v3230_v3, 0  ;;  %v6968_v12 = vpop.f32.mrb[3].mxu1  ;;  %v2053_v16 = vcombine.low %v8648_v51, %v8661_v19 }
 0x354   : > { %4380 = vrot.lane.b32.xlu0 %v8699_v58, %s7506_s20  ;;  %4317 = vrot.lane.b32.xlu1 %v8701_v42, %s7506_s20  ;;  %v1941_v12 = vrot.slane %v1933_v13, %v8611_v49  ;;  %v2013_v14 = vcombine.low %v1957_v32, %v1973_v55 }
 0x355   : > { %7060 = vmatpush3.bf16.msra.mxu0 %v3254_v31  ;;  %v3247_v11 = vpop.permute.xlu1 %3246  ;;  %v2061_v24 = vrot.slane %v2053_v16, %v8611_v49 }
 0x356   : > { %7071 = vmatprep.subr.bf16.mxu0 %v9988_v5  ;;  %v1981_v20 = vcombine.low %v1925_v10, %v1941_v12 }
 0x357   : > { %v1596_v0 = vpop.permute.xlu0 %1595 }
 0x358   : > { %7062 = vmatmul.mubr.msk.bf16.vlgmr.msra.gmra.mrb[44].mxu0 %vm3248_vm4, %v3247_v11  ;;  %4506 = vrot.lane.b32.xlu0 %v8710_v4, %s7506_s20  ;;  %v2069_v9 = vcombine.low %v8697_v54, %v1596_v0  ;;  %v2342_v17 = vpop.f32.mrb[4].mxu1  ;;  %v2085_v11 = vcombine.low %v8678_v7, %v8694_v38  ;;  %v2070_v13 = vcombine.high %v8697_v54, %v1596_v0 }
 0x359   : > { %4443 = vrot.lane.b32.xlu1 %v8715_v41, %s7506_s20  ;;  %7073 = vmatprep.mubr.msk.bf16.mxu0 %vm7502_vm5, %v9988_v5  ;;  %v3231_v50 = vpack.c.bf16 %v2342_v17, %v2342_v17  ;;  %v6973_v59 = vpop.f32.mrb[5].mxu1  ;;  %v8759_v17 = vrot.slane %v1934_v39, %v8611_v49  ;;  %v2014_v0 = vcombine.high %v1957_v32, %v1973_v55 }
 0x35a   : > { %v2345_v31 = vpop.f32.mrb[6].mxu1  ;;  %v2077_v30 = vrot.slane %v2069_v9, %v8611_v49  ;;  %v2093_v7 = vrot.slane %v2085_v11, %v8611_v49  ;;  %v2084_v51 = vrot.slane %v2070_v13, %v8611_v49 }
 0x35b   : > { %v1604_v3 = vpop.permute.xlu0 %1603  ;;  %v3303_v8 = vsel %vm3252_vm3, %v3231_v50, 0  ;;  %v6974_v34 = vpop.f32.mrb[7].mxu1  ;;  %v8764_v50 = vrot.slane %v1966_v27, %v8611_v49  ;;  %v2100_v31 = vrot.slane %v2086_v23, %v8611_v49 }
 0x35c   : > { %7066 = vmatpush3.bf16.msra.mxu1 %v3303_v8  ;;  %v2117_v38 = vcombine.low %v2061_v24, %v2077_v30  ;;  %v2118_v19 = vcombine.high %v2061_v24, %v2077_v30 }
 0x35d   : > { %7077 = vmatprep.subr.bf16.mxu1 %v9988_v5 }
 0x35e   : > { %v2125_v23 = vrot.slane %v2117_v38, %v8621_v40 }
 0x35f   : > { %v1612_v18 = vpop.permute.xlu0 %1611 }
 0x360   : > { %v2101_v44 = vcombine.low %v1604_v3, %v1612_v18  ;;  %v2102_v9 = vcombine.high %v1604_v3, %v1612_v18  ;;  %v2021_v3 = vrot.slane %v2013_v14, %v8621_v40  ;;  %v2068_v14 = vrot.slane %v2054_v35, %v8611_v49  ;;  %v3347_v35 = vpop.permute.xlu1 %3346 }
 0x362   : > { %v2109_v59 = vrot.slane %v2101_v44, %v8611_v49  ;;  %v2116_v16 = vrot.slane %v2102_v9, %v8611_v49  ;;  %v2405_v54 = vpop.f32.mrb[8].mxu1  ;;  %v1982_v44 = vcombine.high %v1925_v10, %v1941_v12  ;;  %v1989_v9 = vrot.slane %v1981_v20, %v8621_v40 }
 0x363   : > { %v3232_v39 = vpack.c.bf16 %v2405_v54, %v2405_v54  ;;  %v3298_v8 = vpop.permute.xlu0 %3297  ;;  %v6979_v34 = vpop.f32.mrb[9].mxu1  ;;  %v2028_v12 = vrot.slane %v2014_v0, %v8621_v40  ;;  %v2029_v10 = vcombine.low %v8751_v62, %v8764_v50 }
 0x364   : > { %v2149_v27 = vcombine.low %v2093_v7, %v2109_v59  ;;  %v2150_v18 = vcombine.high %v2093_v7, %v2109_v59  ;;  %7068 = vmatmul.mubr.msk.bf16.vlgmr.msra.gmra.mrb[52].mxu1 %vm3248_vm4, %v3298_v8  ;;  %v2408_v11 = vpop.f32.mrb[10].mxu1  ;;  %v2165_v4 = vcombine.low %v2100_v31, %v2116_v16  ;;  %v2046_v13 = vcombine.high %v1989_v9, %v2021_v3 }
 0x365   : > { %v3352_v55 = vsel %vm3252_vm3, %v3232_v39, 0  ;;  %v6980_v32 = vpop.f32.mrb[11].mxu1  ;;  %7079 = vmatprep.mubr.msk.bf16.mxu1 %vm7502_vm5, %v9988_v5  ;;  %v2045_v20 = vcombine.low %v1989_v9, %v2021_v3  ;;  %v2132_v7 = vrot.slane %v2118_v19, %v8621_v40  ;;  %v2133_v59 = vcombine.low %v2068_v14, %v2084_v51 }
 0x366   : > { %v2157_v30 = vrot.slane %v2149_v27, %v8621_v40  ;;  %v2164_v24 = vrot.slane %v2150_v18, %v8621_v40  ;;  %7072 = vmatpush3.bf16.msra.mxu0 %v3352_v55  ;;  %v1996_v39 = vrot.slane %v1982_v44, %v8621_v40  ;;  %v1997_v8 = vcombine.low %v8748_v29, %v8759_v17 }
 0x367   : > { %7083 = vmatprep.subr.bf16.mxu0 %v9988_v5  ;;  %v2166_v34 = vcombine.high %v2100_v31, %v2116_v16  ;;  %v2173_v0 = vrot.slane %v2165_v4, %v8621_v40  ;;  %v2030_v44 = vcombine.high %v8751_v62, %v8764_v50  ;;  %v2037_v9 = vrot.slane %v2029_v10, %v8621_v40 }
 0x368   : > { %v2182_v54 = vcombine.high %v2125_v23, %v2157_v30  ;;  %v2181_v38 = vcombine.low %v2125_v23, %v2157_v30  ;;  %v2184_v19 = vcombine.high %v2132_v7, %v2164_v24  ;;  %v2183_v11 = vcombine.low %v2132_v7, %v2164_v24 }
 0x369   : > { %7074 = vmatmul.mubr.msk.bf16.vlgmr.msra.gmra.mrb[48].mxu0 %vm3248_vm4, %v3347_v35  ;;  %v2048_v31 = vcombine.high %v1996_v39, %v2028_v12  ;;  %v2134_v55 = vcombine.high %v2068_v14, %v2084_v51  ;;  %v2141_v32 = vrot.slane %v2133_v59, %v8621_v40  ;;  %v2047_v23 = vcombine.low %v1996_v39, %v2028_v12 }
 0x36a   : > { %v2468_v27 = vpop.f32.mrb[12].mxu1  ;;  %v8791_v3 = vpack.c.bf16 %v2182_v54, %v2046_v13  ;;  %v8793_v18 = vpack.c.bf16 %v2181_v38, %v2045_v20  ;;  %7085 = vmatprep.mubr.msk.bf16.mxu0 %vm7502_vm5, %v9988_v5  ;;  %v1998_v24 = vcombine.high %v8748_v29, %v8759_v17  ;;  %v2005_v62 = vrot.slane %v1997_v8, %v8621_v40  ;;  %v3396_v17 = vpop.permute.xlu0 %3395 }
 0x36b   : > { %v3233_v16 = vpack.c.bf16 %v2468_v27, %v2468_v27  ;;  %v6985_v4 = vpop.f32.mrb[13].mxu1  ;;  %v2180_v50 = vrot.slane %v2166_v34, %v8621_v40  ;;  %v8810_v14 = vpack.c.bf16 %v2184_v19, %v2048_v31  ;;  %v8812_v13 = vpack.c.bf16 %v2183_v11, %v2047_v23 }
 0x36c   : > { %4632 = vrot.lane.b32.xlu0 %v8791_v3, %s7506_s20  ;;  %4569 = vrot.lane.b32.xlu1 %v8793_v18, %s7506_s20  ;;  %v2471_v30 = vpop.f32.mrb[14].mxu1  ;;  %v2186_v20 = vcombine.high %v2141_v32, %v2173_v0  ;;  %v2185_v7 = vcombine.low %v2141_v32, %v2173_v0  ;;  %v2044_v12 = vrot.slane %v2030_v44, %v8621_v40  ;;  %v3445_v32 = vpop.permute.xlu1 %3444 }
 0x36d   : > { %v3401_v10 = vsel %vm3252_vm3, %v3233_v16, 0  ;;  %v6986_v51 = vpop.f32.mrb[15].mxu1  ;;  %v2148_v29 = vrot.slane %v2134_v55, %v8621_v40  ;;  %v2050_v59 = vcombine.high %v2005_v62, %v2037_v9  ;;  %v2049_v35 = vcombine.low %v2005_v62, %v2037_v9 }
 0x36e   : > { %7078 = vmatpush3.bf16.msra.mxu1 %v3401_v10  ;;  %v2012_v54 = vrot.slane %v1998_v24, %v8621_v40  ;;  %v3494_v51 = vpop.permute.xlu0 %3493 }
 0x36f   : > { %7089 = vmatprep.subr.bf16.mxu1 %v9988_v5  ;;  %v8823_v38 = vpack.c.bf16 %v2186_v20, %v2050_v59  ;;  %v8825_v39 = vpack.c.bf16 %v2185_v7, %v2049_v35  ;;  %v2188_v8 = vcombine.high %v2148_v29, %v2180_v50  ;;  %v2187_v34 = vcombine.low %v2148_v29, %v2180_v50 }
 0x370   : > { %4758 = vrot.lane.b32.xlu0 %v8810_v14, %s7506_s20  ;;  %4695 = vrot.lane.b32.xlu1 %v8812_v13, %s7506_s20  ;;  %v2052_v0 = vcombine.high %v2012_v54, %v2044_v12  ;;  %v2051_v27 = vcombine.low %v2012_v54, %v2044_v12  ;;  %v3543_v35 = vpop.permute.xlu1 %3542 }
 0x371   : > { %7080 = vmatmul.mubr.msk.bf16.vlgmr.msra.gmra.mrb[56].mxu1 %vm3248_vm4, %v3396_v17  ;;  %10077 = vst [vmem:[#allocation60_spill] sm:$0xff] %v8823_v38  ;;  %10078 = vst [vmem:[#allocation68_spill] sm:$0xff] %v8825_v39 }
 0x372   : > { %7091 = vmatprep.mubr.msk.bf16.mxu1 %vm7502_vm5, %v9988_v5  ;;  %v8833_v19 = vpack.c.bf16 %v2188_v8, %v2052_v0  ;;  %v8835_v11 = vpack.c.bf16 %v2187_v34, %v2051_v27  ;;  %v3592_v8 = vpop.permute.xlu0 %3591 }
 0x374   : > { %4884 = vrot.lane.b32.xlu0 %v8823_v38, %s7506_s20  ;;  %4821 = vrot.lane.b32.xlu1 %v8825_v39, %s7506_s20  ;;  %10079 = vst [vmem:[#allocation45_spill] sm:$0xff] %v8833_v19  ;;  %10080 = vst [vmem:[#allocation53_spill] sm:$0xff] %v8835_v11 }
 0x378   : > { %5010 = vrot.lane.b32.xlu0 %v8833_v19, %s7506_s20  ;;  %4947 = vrot.lane.b32.xlu1 %v8835_v11, %s7506_s20 }
 0x389   : > { %v2531_v44 = vpop.f32.mrb[16].mxu1 }
 0x38a   : > { %v3234_v9 = vpack.c.bf16 %v2531_v44, %v2531_v44  ;;  %v6991_v16 = vpop.f32.mrb[17].mxu1 }
 0x38b   : > { %v2534_v31 = vpop.f32.mrb[18].mxu1 }
 0x38c   : > { %v3450_v4 = vsel %vm3252_vm3, %v3234_v9, 0  ;;  %v6992_v55 = vpop.f32.mrb[19].mxu1 }
 0x38d   : > { %7084 = vmatpush3.bf16.msra.mxu0 %v3450_v4 }
 0x38e   : > { %7095 = vmatprep.subr.bf16.mxu0 %v9988_v5 }
 0x390   : > { %7086 = vmatmul.mubr.msk.bf16.vlgmr.msra.gmra.mrb[52].mxu0 %vm3248_vm4, %v3445_v32  ;;  %v3641_v32 = vpop.permute.xlu1 %3640 }
 0x391   : > { %v2594_v23 = vpop.f32.mrb[20].mxu1  ;;  %7097 = vmatprep.mubr.msk.bf16.mxu0 %vm7502_vm5, %v9988_v5 }
 0x392   : > { %v3235_v30 = vpack.c.bf16 %v2594_v23, %v2594_v23  ;;  %v6997_v24 = vpop.f32.mrb[21].mxu1  ;;  %v3690_v23 = vpop.permute.xlu0 %3689 }
 0x393   : > { %v2597_v62 = vpop.f32.mrb[22].mxu1 }
 0x394   : > { %v3499_v50 = vsel %vm3252_vm3, %v3235_v30, 0  ;;  %v6998_v10 = vpop.f32.mrb[23].mxu1 }
 0x395   : > { %7090 = vmatpush3.bf16.msra.mxu1 %v3499_v50 }
 0x396   : > { %7101 = vmatprep.subr.bf16.mxu1 %v9988_v5 }
 0x398   : > { %7092 = vmatmul.mubr.msk.bf16.vlgmr.msra.gmra.mrb[60].mxu1 %vm3248_vm4, %v3494_v51 }
 0x399   : > { %v2657_v20 = vpop.f32.mrb[24].mxu1  ;;  %7103 = vmatprep.mubr.msk.bf16.mxu1 %vm7502_vm5, %v9988_v5 }
 0x39a   : > { %v3236_v7 = vpack.c.bf16 %v2657_v20, %v2657_v20  ;;  %v7003_v12 = vpop.f32.mrb[25].mxu1 }
 0x39b   : > { %v2660_v29 = vpop.f32.mrb[26].mxu1 }
 0x39c   : > { %v3548_v17 = vsel %vm3252_vm3, %v3236_v7, 0  ;;  %v7004_v59 = vpop.f32.mrb[27].mxu1 }
 0x39d   : > { %7096 = vmatpush3.bf16.msra.mxu0 %v3548_v17  ;;  %v3739_v17 = vpop.permute.xlu1 %3738 }
 0x39e   : > { %7107 = vmatprep.subr.bf16.mxu0 %v9988_v5 }
 0x3a0   : > { %7098 = vmatmul.mubr.msk.bf16.vlgmr.msra.gmra.mrb[56].mxu0 %vm3248_vm4, %v3543_v35 }
 0x3a1   : > { %v2720_v54 = vpop.f32.mrb[28].mxu1  ;;  %7109 = vmatprep.mubr.msk.bf16.mxu0 %vm7502_vm5, %v9988_v5  ;;  %v2909_v44 = vpop.f32.mrb[32].mxu0 }
 0x3a2   : > { %v3237_v34 = vpack.c.bf16 %v2720_v54, %v2720_v54  ;;  %v7009_v0 = vpop.f32.mrb[29].mxu1  ;;  %v7027_v31 = vpop.f32.mrb[33].mxu0  ;;  %v3240_v50 = vpack.c.bf16 %v2909_v44, %v2909_v44 }
 0x3a3   : > { %v2723_v27 = vpop.f32.mrb[30].mxu1  ;;  %v2912_v4 = vpop.f32.mrb[34].mxu0 }
 0x3a4   : > { %v3597_v9 = vsel %vm3252_vm3, %v3237_v34, 0  ;;  %v7010_v16 = vpop.f32.mrb[31].mxu1  ;;  %v7028_v55 = vpop.f32.mrb[35].mxu0  ;;  %v3744_v59 = vsel %vm3252_vm3, %v3240_v50, 0 }
 0x3a5   : > { %7102 = vmatpush3.bf16.msra.mxu1 %v3597_v9  ;;  %v3788_v54 = vpop.permute.xlu0 %3787  ;;  %v3837_v9 = vpop.permute.xlu1 %3836 }
 0x3a6   : > { %7113 = vmatprep.subr.bf16.mxu1 %v9988_v5 }
 0x3a8   : > { %7104 = vmatmul.mubr.msk.bf16.vlgmr.msra.gmra.mrb[64].mxu1 %vm3248_vm4, %v3592_v8 }
 0x3a9   : > { %v2783_v30 = vpop.f32.mrb[32].mxu1  ;;  %7115 = vmatprep.mubr.msk.bf16.mxu1 %vm7502_vm5, %v9988_v5  ;;  %v3035_v51 = vpop.f32.mrb[36].mxu0 }
 0x3aa   : > { %v3238_v24 = vpack.c.bf16 %v2783_v30, %v2783_v30  ;;  %v7015_v62 = vpop.f32.mrb[33].mxu1  ;;  %v7039_v12 = vpop.f32.mrb[37].mxu0  ;;  %v3242_v27 = vpack.c.bf16 %v3035_v51, %v3035_v51 }
 0x3ab   : > { %v2786_v10 = vpop.f32.mrb[34].mxu1  ;;  %v3038_v29 = vpop.f32.mrb[38].mxu0 }
 0x3ac   : > { %v3646_v20 = vsel %vm3252_vm3, %v3238_v24, 0  ;;  %v7016_v7 = vpop.f32.mrb[35].mxu1  ;;  %v7040_v35 = vpop.f32.mrb[39].mxu0  ;;  %v3842_v55 = vsel %vm3252_vm3, %v3242_v27, 0  ;;  %v1021_v27 = vcombine.low %v10045_v22, %v10050_v37 }
 0x3ad   : > { %7108 = vmatpush3.bf16.msra.mxu0 %v3646_v20  ;;  %v8869_v4 = vpop.permute.xlu0 %3885  ;;  %v8877_v30 = vpop.permute.xlu1 %3934 }
 0x3ae   : > { %7119 = vmatprep.subr.bf16.mxu0 %v9988_v5 }
 0x3b0   : > { %7110 = vmatmul.mubr.msk.bf16.vlgmr.msra.gmra.mrb[60].mxu0 %vm3248_vm4, %v3641_v32 }
 0x3b1   : > { %v2846_v8 = vpop.f32.mrb[36].mxu1  ;;  %7120 = vmatpush3.bf16.msra.mxu0 %v3744_v59  ;;  %7121 = vmatprep.mubr.msk.bf16.mxu0 %vm7502_vm5, %v9988_v5  ;;  %v8882_v50 = vpop.permute.xlu0 %3983 }
 0x3b2   : > { %v3239_v34 = vpack.c.bf16 %v2846_v8, %v2846_v8  ;;  %v7021_v0 = vpop.f32.mrb[37].mxu1  ;;  %7131 = vmatprep.subr.bf16.mxu0 %v9988_v5 }
 0x3b3   : > { %v2849_v44 = vpop.f32.mrb[38].mxu1  ;;  %v1005_v0 = vcombine.low %v7784_v1, %v7889_v48 }
 0x3b4   : > { %v3695_v16 = vsel %vm3252_vm3, %v3239_v34, 0  ;;  %v7022_v31 = vpop.f32.mrb[39].mxu1  ;;  %v1157_v34 = vcombine.low %v8325_v25, %v8294_v26  ;;  %v10081_v44 = vld [vmem:[#allocation57_spill] sm:$0xff] }
 0x3b5   : > { %7114 = vmatpush3.bf16.msra.mxu1 %v3695_v16  ;;  %v1125_v16 = vcombine.low %v7917_v36, %v10059_v33  ;;  %v10082_v31 = vld [vmem:[#allocation35_spill] sm:$0xff] }
 0x3b6   : > { %7125 = vmatprep.subr.bf16.mxu1 %v9988_v5 }
 0x3b8   : > { %7116 = vmatmul.mubr.msk.bf16.vlgmr.msra.gmra.mrb[68].mxu1 %vm3248_vm4, %v3690_v23  ;;  %7122 = vmatmul.mubr.msk.bf16.vlgmr.msra.gmra.mrb[64].mxu0 %vm3248_vm4, %v3739_v17 }
 0x3b9   : > { %v2972_v32 = vpop.f32.mrb[40].mxu1  ;;  %7132 = vmatpush3.bf16.msra.mxu0 %v3842_v55  ;;  %7133 = vmatprep.mubr.msk.bf16.mxu0 %vm7502_vm5, %v9988_v5  ;;  %v973_v55 = vcombine.low %v10082_v31, %v7735_v61 }
 0x3ba   : > { %v3241_v24 = vpack.c.bf16 %v2972_v32, %v2972_v32  ;;  %7127 = vmatprep.mubr.msk.bf16.mxu1 %vm7502_vm5, %v9988_v5  ;;  %v7033_v62 = vpop.f32.mrb[41].mxu1  ;;  %7143 = vmatprep.subr.bf16.mxu0 %v9988_v5  ;;  %v989_v32 = vcombine.low %v7713_v15, %v7732_v53 }
 0x3bb   : > { %v2975_v10 = vpop.f32.mrb[42].mxu1  ;;  %v8912_v62 = vrot.slane %v1157_v34, %v8611_v49 }
 0x3bc   : > { %v3793_v23 = vsel %vm3252_vm3, %v3241_v24, 0  ;;  %v7034_v51 = vpop.f32.mrb[43].mxu1  ;;  %v8915_v10 = vrot.slane %v1005_v0, %v8611_v49 }
 0x3bd   : > { %7126 = vmatpush3.bf16.msra.mxu1 %v3793_v23  ;;  %v8918_v23 = vrot.slane %v1021_v27, %v8611_v49 }
 0x3be   : > { %7137 = vmatprep.subr.bf16.mxu1 %v9988_v5  ;;  %v4066_v20 = vpop.permute.xlu1 %4065  ;;  %v4129_v7 = vpop.permute.xlu0 %4128 }
 0x3bf   : > { %4068 = vxpose.xlu1.c.b16.start.end [1/1] (short) (narrow) %v4066_v20, 16  ;;  %4131 = vxpose.xlu0.c.b16.start.end [1/1] (short) (narrow) %v4129_v7, 16  ;;  %v8924_v20 = vrot.slane %v1125_v16, %v8611_v49  ;;  %v8927_v7 = vrot.slane %v973_v55, %v8611_v49 }
 0x3c0   : > { %7128 = vmatmul.mubr.msk.bf16.vlgmr.msra.gmra.mrb[72].mxu1 %vm3248_vm4, %v3788_v54  ;;  %7134 = vmatmul.mubr.msk.bf16.vlgmr.msra.gmra.mrb[68].mxu0 %vm3248_vm4, %v3837_v9  ;;  %v1141_v54 = vcombine.low %v8021_v21, %v8272_v56  ;;  %v1109_v9 = vcombine.low %v7948_v63, %v10081_v44 }
 0x3c1   : > { %7139 = vmatprep.mubr.msk.bf16.mxu1 %vm7502_vm5, %v9988_v5  ;;  %7145 = vmatprep.mubr.msk.bf16.mxu0 %vm7502_vm5, %v9988_v5 }
 0x3c2   : > { %v4192_v12 = vpop.permute.xlu1 %4191  ;;  %v4255_v29 = vpop.permute.xlu0 %4254  ;;  %v8909_v24 = vrot.slane %v1141_v54, %v8611_v49  ;;  %v8921_v51 = vrot.slane %v1109_v9, %v8611_v49 }
 0x3c3   : > { %4194 = vxpose.xlu0.c.b16.start.end [1/1] (short) (narrow) %v4192_v12, 16  ;;  %4257 = vxpose.xlu1.c.b16.start.end [1/1] (short) (narrow) %v4255_v29, 16  ;;  %v8930_v12 = vrot.slane %v989_v32, %v8611_v49 }
 0x3c4   : > { %v1205_v29 = vcombine.low %v8909_v24, %v8912_v62 }
 0x3c5   : > { %v1037_v9 = vcombine.low %v8927_v7, %v8930_v12 }
 0x3c6   : > { %v4318_v17 = vpop.permute.xlu1 %4317  ;;  %v4381_v59 = vpop.permute.xlu0 %4380  ;;  %v1213_v16 = vrot.slane %v1205_v29, %v8621_v40 }
 0x3c7   : > { %4320 = vxpose.xlu0.c.b16.start.end [1/1] (short) (narrow) %v4318_v17, 16  ;;  %4383 = vxpose.xlu1.c.b16.start.end [1/1] (short) (narrow) %v4381_v59, 16 }
 0x3ca   : > { %v4507_v35 = vpop.permute.xlu0 %4506 }
 0x3cb   : > { %v4444_v8 = vpop.permute.xlu1 %4443  ;;  %4509 = vxpose.xlu1.c.b16.start.end [1/1] (short) (narrow) %v4507_v35, 16  ;;  %v1069_v35 = vcombine.low %v8915_v10, %v8918_v23 }
 0x3cc   : > { %4446 = vxpose.xlu0.c.b16.start.end [1/1] (short) (narrow) %v4444_v8, 16  ;;  %v1173_v8 = vcombine.low %v8921_v51, %v8924_v20 }
 0x3cd   : > { %v1077_v38 = vrot.slane %v1069_v35, %v8621_v40 }
 0x3de   : > { %v3098_v17 = vpop.f32.mrb[44].mxu1  ;;  %v4570_v59 = vpop.permute.xlu1 %4569 }
 0x3df   : > { %v3243_v54 = vpack.c.bf16 %v3098_v17, %v3098_v17  ;;  %v4633_v34 = vpop.permute.xlu0 %4632  ;;  %4572 = vxpose.xlu0.c.b16.start.end [1/1] (short) (narrow) %v4570_v59, 16  ;;  %v7045_v0 = vpop.f32.mrb[45].mxu1  ;;  %v1181_v17 = vrot.slane %v1173_v8, %v8621_v40 }
 0x3e0   : > { %4635 = vxpose.xlu1.c.b16.start.end [1/1] (short) (narrow) %v4633_v34, 16  ;;  %v3101_v27 = vpop.f32.mrb[46].mxu1  ;;  %v1045_v0 = vrot.slane %v1037_v9, %v8621_v40 }
 0x3e1   : > { %v3891_v55 = vsel %vm3252_vm3, %v3243_v54, 0  ;;  %v7046_v32 = vpop.f32.mrb[47].mxu1  ;;  %v1237_v29 = vcombine.low %v1181_v17, %v1213_v16 }
 0x3e2   : > { %v3161_v19 = vpop.f32.mrb[40].mxu0  ;;  %v4696_v11 = vpop.permute.xlu1 %4695  ;;  %7138 = vmatpush3.bf16.msra.mxu1 %v3891_v55 }
 0x3e3   : > { %v3244_v39 = vpack.c.bf16 %v3161_v19, %v3161_v19  ;;  %v4759_v59 = vpop.permute.xlu0 %4758  ;;  %4698 = vxpose.xlu0.c.b16.start.end [1/1] (short) (narrow) %v4696_v11, 16  ;;  %7149 = vmatprep.subr.bf16.mxu1 %v9988_v5  ;;  %v7051_v34 = vpop.f32.mrb[41].mxu0  ;;  %v1101_v19 = vcombine.low %v1045_v0, %v1077_v38 }
 0x3e4   : > { %4761 = vxpose.xlu1.c.b16.start.end [1/1] (short) (narrow) %v4759_v59, 16  ;;  %v3164_v27 = vpop.f32.mrb[42].mxu0 }
 0x3e5   : > { %v3940_v54 = vsel %vm3252_vm3, %v3244_v39, 0  ;;  %7140 = vmatmul.mubr.msk.bf16.vlgmr.msra.gmra.mrb[76].mxu1 %vm3248_vm4, %v8869_v4  ;;  %v7052_v55 = vpop.f32.mrb[43].mxu0  ;;  %v4048_v59 = vpack.c.bf16 %v1237_v29, %v1101_v19  ;;  %v1238_v39 = vcombine.high %v1181_v17, %v1213_v16  ;;  %v1158_v16 = vcombine.high %v8325_v25, %v8294_v26  ;;  %v10088_v26 = vld [vmem:[#allocation56_spill] sm:$0xff]  ;;  %v10090_v25 = vld [vmem:[#allocation37_spill] sm:$0xff] }
 0x3e6   : > { %v3224_v35 = vpop.f32.mrb[48].mxu1  ;;  %7144 = vmatpush3.bf16.msra.mxu0 %v3940_v54  ;;  %v4822_v8 = vpop.permute.xlu1 %4821  ;;  %7151 = vmatprep.mubr.msk.bf16.mxu1 %vm7502_vm5, %v9988_v5  ;;  %v1102_v55 = vcombine.high %v1045_v0, %v1077_v38  ;;  %v1206_v38 = vcombine.high %v8909_v24, %v8912_v62  ;;  %v1022_v17 = vcombine.high %v10045_v22, %v10050_v37 }
 0x3e7   : > { %v3245_v11 = vpack.c.bf16 %v3224_v35, %v3224_v35  ;;  %v4885_v32 = vpop.permute.xlu0 %4884  ;;  %4824 = vxpose.xlu0.c.b16.start.end [1/1] (short) (narrow) %v4822_v8, 16  ;;  %7155 = vmatprep.subr.bf16.mxu0 %v9988_v5  ;;  %v7057_v9 = vpop.f32.mrb[49].mxu1  ;;  %v1070_v0 = vcombine.high %v8915_v10, %v8918_v23  ;;  %v1174_v29 = vcombine.high %v8921_v51, %v8924_v20 }
 0x3e8   : > { %4887 = vxpose.xlu1.c.b16.start.end [1/1] (short) (narrow) %v4885_v32, 16  ;;  %v3227_v34 = vpop.f32.mrb[50].mxu1  ;;  %v4049_v8 = vpack.c.bf16 %v1238_v39, %v1102_v55  ;;  %v1110_v24 = vcombine.high %v7948_v63, %v10081_v44  ;;  %v1126_v62 = vcombine.high %v7917_v36, %v10059_v33  ;;  %v974_v19 = vcombine.high %v10082_v31, %v7735_v61 }
 0x3e9   : > { %v3989_v4 = vsel %vm3252_vm3, %v3245_v11, 0  ;;  %7146 = vmatmul.mubr.msk.bf16.vlgmr.msra.gmra.mrb[72].mxu0 %vm3248_vm4, %v8877_v30  ;;  %v7058_v27 = vpop.f32.mrb[51].mxu1  ;;  %v1142_v30 = vcombine.high %v8021_v21, %v8272_v56  ;;  %v990_v11 = vcombine.high %v7713_v15, %v7732_v53  ;;  %v1038_v32 = vcombine.high %v8927_v7, %v8930_v12  ;;  %v10091_v21 = vld [vmem:[#allocation38_spill] sm:$0xff] }
 0x3ea   : > { %7156 = vmatpush3.bf16.msra.mxu0 %v4048_v59  ;;  %v4948_v54 = vpop.permute.xlu1 %4947  ;;  %7150 = vmatpush3.bf16.msra.mxu1 %v3989_v4  ;;  %v1220_v10 = vrot.slane %v1206_v38, %v8621_v40  ;;  %v1172_v51 = vrot.slane %v1158_v16, %v8611_v49  ;;  %v1036_v9 = vrot.slane %v1022_v17, %v8611_v49 }
 0x3eb   : > { %v5011_v35 = vpop.permute.xlu0 %5010  ;;  %4950 = vxpose.xlu0.c.b16.start.end [1/1] (short) (narrow) %v4948_v54, 16  ;;  %7161 = vmatprep.subr.bf16.mxu1 %v9988_v5  ;;  %v1156_v23 = vrot.slane %v1142_v30, %v8611_v49  ;;  %v1084_v59 = vrot.slane %v1070_v0, %v8621_v40  ;;  %v1188_v39 = vrot.slane %v1174_v29, %v8621_v40 }
 0x3ec   : > { %5013 = vxpose.xlu1.c.b16.start.end [1/1] (short) (narrow) %v5011_v35, 16  ;;  %7157 = vmatprep.mubr.msk.bf16.mxu0 %vm7502_vm5, %v9988_v5  ;;  %v8998_v34 = vrot.slane %v1110_v24, %v8611_v49  ;;  %v9001_v7 = vrot.slane %v1126_v62, %v8611_v49  ;;  %v9004_v12 = vrot.slane %v974_v19, %v8611_v49 }
 0x3ed   : > { %7152 = vmatmul.mubr.msk.bf16.vlgmr.msra.gmra.mrb[80].mxu1 %vm3248_vm4, %v8882_v50  ;;  %7167 = vmatprep.subr.bf16.mxu0 %v9988_v5  ;;  %v1006_v50 = vcombine.high %v7784_v1, %v7889_v48  ;;  %v9007_v4 = vrot.slane %v990_v11, %v8611_v49  ;;  %v1052_v27 = vrot.slane %v1038_v32, %v8621_v40  ;;  %v10089_v48 = vld [vmem:[#allocation39_spill] sm:$0xff] }
 0x3ee   : > { %7162 = vmatpush3.bf16.msra.mxu1 %v4049_v8  ;;  %7163 = vmatprep.mubr.msk.bf16.mxu1 %vm7502_vm5, %v9988_v5  ;;  %v1239_v54 = vcombine.low %v1188_v39, %v1220_v10  ;;  %v1240_v55 = vcombine.high %v1188_v39, %v1220_v10  ;;  %v1221_v35 = vcombine.low %v1156_v23, %v1172_v51 }
 0x3ef   : > { %7173 = vmatprep.subr.bf16.mxu1 %v9988_v5  ;;  %v8992_v20 = vrot.slane %v1006_v50, %v8611_v49  ;;  %v1103_v38 = vcombine.low %v1052_v27, %v1084_v59  ;;  %v1104_v30 = vcombine.high %v1052_v27, %v1084_v59  ;;  %v1189_v16 = vcombine.low %v8998_v34, %v9001_v7 }
 0x3f0   : > { %v1053_v50 = vcombine.low %v9004_v12, %v9007_v4  ;;  %v1229_v62 = vrot.slane %v1221_v35, %v8621_v40  ;;  %v1222_v10 = vcombine.high %v1156_v23, %v1172_v51  ;;  %v1413_v59 = vcombine.low %v8038_v57, %v8281_v6  ;;  %v10083_v51 = vld [vmem:[#allocation48_spill] sm:$0xff] }
 0x3f1   : > { %v1085_v8 = vcombine.low %v8992_v20, %v1036_v9  ;;  %v4050_v29 = vpack.c.bf16 %v1239_v54, %v1103_v38  ;;  %v4051_v24 = vpack.c.bf16 %v1240_v55, %v1104_v30  ;;  %v1197_v11 = vrot.slane %v1189_v16, %v8621_v40  ;;  %v10084_v38 = vld [vmem:[#allocation41_spill] sm:$0xff] }
 0x3f2   : > { %v1061_v32 = vrot.slane %v1053_v50, %v8621_v40  ;;  %v1429_v54 = vcombine.low %v8320_v52, %v8300_v43  ;;  %v1277_v23 = vcombine.low %v7787_v2, %v7913_v46  ;;  %v1293_v30 = vcombine.low %v10084_v38, %v10083_v51 }
 0x3f3   : > { %v1093_v19 = vrot.slane %v1085_v8, %v8621_v40  ;;  %v1241_v39 = vcombine.low %v1197_v11, %v1229_v62  ;;  %v1242_v27 = vcombine.high %v1197_v11, %v1229_v62  ;;  %v1086_v8 = vcombine.high %v8992_v20, %v1036_v9  ;;  %v10087_v11 = vld [vmem:[#allocation64_spill] sm:$0xff] }
 0x3f4   : > { %v1397_v37 = vcombine.low %v10088_v26, %v10087_v11  ;;  %v1054_v9 = vcombine.high %v9004_v12, %v9007_v4  ;;  %v1236_v56 = vrot.slane %v1222_v10, %v8621_v40  ;;  %v1245_v22 = vcombine.low %v10090_v25, %v10089_v48 }
 0x3f5   : > { %v1105_v35 = vcombine.low %v1061_v32, %v1093_v19  ;;  %v9054_v33 = vrot.slane %v1413_v59, %v8611_v49  ;;  %v1100_v12 = vrot.slane %v1086_v8, %v8621_v40  ;;  %v9063_v4 = vrot.slane %v1277_v23, %v8611_v49 }
 0x3f6   : > { %v9066_v10 = vrot.slane %v1293_v30, %v8611_v49 }
 0x3f8   : > { %v1341_v23 = vcombine.low %v9063_v4, %v9066_v10 }
 0x425   : > { %v4076_v17 = vpop.trf.xlu1  ;;  %v4139_v0 = vpop.trf.xlu0 }
 0x426   : > { %7158 = vmatmul.mubr.msk.bf16.vlgmr.msra.gmra.mrb[76].mxu0 %vm2241_vm2, %v4076_v17  ;;  %7164 = vmatmul.mubr.msk.bf16.vlgmr.msra.gmra.mrb[84].mxu1 %vm2241_vm2, %v4139_v0  ;;  %v1106_v17 = vcombine.high %v1061_v32, %v1093_v19  ;;  %v1190_v0 = vcombine.high %v8998_v34, %v9001_v7  ;;  %v10092_v19 = vld [vmem:[#allocation36_spill] sm:$0xff]  ;;  %v4052_v34 = vpack.c.bf16 %v1241_v39, %v1105_v35 }
 0x427   : > { %7168 = vmatpush3.bf16.msra.mxu0 %v4050_v29  ;;  %7174 = vmatpush3.bf16.msra.mxu1 %v4051_v24  ;;  %v10085_v29 = vld [vmem:[#allocation58_spill] sm:$0xff]  ;;  %v10086_v24 = vld [vmem:[#allocation59_spill] sm:$0xff]  ;;  %v1261_v32 = vcombine.low %v10092_v19, %v10091_v21 }
 0x428   : > { %7169 = vmatprep.mubr.msk.bf16.mxu0 %vm7502_vm5, %v9988_v5  ;;  %7179 = vmatprep.subr.bf16.mxu0 %v9988_v5  ;;  %v1381_v62 = vcombine.low %v10086_v24, %v10085_v29  ;;  %v4053_v7 = vpack.c.bf16 %v1242_v27, %v1106_v17  ;;  %v1204_v59 = vrot.slane %v1190_v0, %v8621_v40 }
 0x429   : > { %7175 = vmatprep.mubr.msk.bf16.mxu1 %vm7502_vm5, %v9988_v5  ;;  %7185 = vmatprep.subr.bf16.mxu1 %v9988_v5  ;;  %v4265_v55 = vpop.trf.xlu1  ;;  %v4202_v50 = vpop.trf.xlu0  ;;  %v1068_v27 = vrot.slane %v1054_v9, %v8621_v40 }
 0x42a   : > { %v9070_v39 = vrot.slane %v1381_v62, %v8611_v49  ;;  %v1244_v35 = vcombine.high %v1204_v59, %v1236_v56 }
 0x42b   : > { %v9036_v16 = vpop.f32.mrb[44].mxu0  ;;  %v1107_v17 = vcombine.low %v1068_v27, %v1100_v12 }
 0x42c   : > { %v7063_v20 = vpop.f32.mrb[45].mxu0 }
 0x42d   : > { %v9051_v1 = vpop.f32.mrb[46].mxu0  ;;  %v9057_v20 = vrot.slane %v1429_v54, %v8611_v49  ;;  %v9081_v54 = vrot.slane %v1245_v22, %v8611_v49  ;;  %v4391_v30 = vpop.trf.xlu1  ;;  %v1108_v22 = vcombine.high %v1068_v27, %v1100_v12 }
 0x42e   : > { %v7064_v44 = vpop.f32.mrb[47].mxu0  ;;  %7170 = vmatmul.mubr.msk.bf16.vlgmr.msra.gmra.mrb[80].mxu0 %vm2241_vm2, %v4202_v50  ;;  %7176 = vmatmul.mubr.msk.bf16.vlgmr.msra.gmra.mrb[88].mxu1 %vm2241_vm2, %v4265_v55  ;;  %v9084_v55 = vrot.slane %v1261_v32, %v8611_v49  ;;  %v4328_v50 = vpop.trf.xlu0 }
 0x42f   : > { %7180 = vmatpush3.bf16.msra.mxu0 %v4052_v34  ;;  %7186 = vmatpush3.bf16.msra.mxu1 %v4053_v7  ;;  %v9073_v44 = vrot.slane %v1397_v37, %v8611_v49  ;;  %v1243_v37 = vcombine.low %v1204_v59, %v1236_v56  ;;  %v1477_v8 = vcombine.low %v9054_v33, %v9057_v20 }
 0x430   : > { %7181 = vmatprep.mubr.msk.bf16.mxu0 %vm7502_vm5, %v9988_v5  ;;  %7187 = vmatprep.mubr.msk.bf16.mxu1 %vm7502_vm5, %v9988_v5  ;;  %v1309_v62 = vcombine.low %v9081_v54, %v9084_v55  ;;  %v4055_v32 = vpack.c.bf16 %v1244_v35, %v1108_v22  ;;  %v1349_v7 = vrot.slane %v1341_v23, %v8621_v40 }
 0x431   : > { %7191 = vmatprep.subr.bf16.mxu0 %v9988_v5  ;;  %7197 = vmatprep.subr.bf16.mxu1 %v9988_v5  ;;  %v1445_v0 = vcombine.low %v9070_v39, %v9073_v44  ;;  %v4054_v9 = vpack.c.bf16 %v1243_v37, %v1107_v17  ;;  %v1485_v56 = vrot.slane %v1477_v8, %v8621_v40  ;;  %v4517_v22 = vpop.trf.xlu1 }
 0x432   : > { %v1317_v37 = vrot.slane %v1309_v62, %v8621_v40  ;;  %v1478_v35 = vcombine.high %v9054_v33, %v9057_v20  ;;  %v1414_v8 = vcombine.high %v8038_v57, %v8281_v6  ;;  %v1430_v17 = vcombine.high %v8320_v52, %v8300_v43 }
 0x433   : > { %v1453_v59 = vrot.slane %v1445_v0, %v8621_v40  ;;  %v1342_v62 = vcombine.high %v9063_v4, %v9066_v10  ;;  %v1446_v33 = vcombine.high %v9070_v39, %v9073_v44  ;;  %v1278_v20 = vcombine.high %v7787_v2, %v7913_v46 }
 0x434   : > { %v1373_v0 = vcombine.low %v1317_v37, %v1349_v7  ;;  %v1310_v10 = vcombine.high %v9081_v54, %v9084_v55  ;;  %v1492_v39 = vrot.slane %v1478_v35, %v8621_v40  ;;  %v1246_v44 = vcombine.high %v10090_v25, %v10089_v48 }
 0x435   : > { %v1428_v6 = vrot.slane %v1414_v8, %v8611_v49  ;;  %v1444_v46 = vrot.slane %v1430_v17, %v8611_v49  ;;  %v1356_v55 = vrot.slane %v1342_v62, %v8621_v40  ;;  %v1460_v35 = vrot.slane %v1446_v33, %v8621_v40 }
 0x436   : > { %7182 = vmatmul.mubr.msk.bf16.vlgmr.msra.gmra.mrb[84].mxu0 %vm2241_vm2, %v4328_v50  ;;  %7188 = vmatmul.mubr.msk.bf16.vlgmr.msra.gmra.mrb[92].mxu1 %vm2241_vm2, %v4391_v30  ;;  %v1509_v30 = vcombine.low %v1453_v59, %v1485_v56  ;;  %v1510_v50 = vcombine.high %v1453_v59, %v1485_v56  ;;  %v1294_v56 = vcombine.high %v10084_v38, %v10083_v51 }
 0x437   : > { %v9099_v34 = vpop.f32.mrb[52].mxu1  ;;  %7192 = vmatpush3.bf16.msra.mxu0 %v4054_v9  ;;  %7198 = vmatpush3.bf16.msra.mxu1 %v4055_v32  ;;  %v4454_v32 = vpop.trf.xlu0  ;;  %v1382_v59 = vcombine.high %v10086_v24, %v10085_v29  ;;  %v1324_v17 = vrot.slane %v1310_v10, %v8621_v40  ;;  %v1493_v62 = vcombine.low %v1428_v6, %v1444_v46 }
 0x438   : > { %v7069_v12 = vpop.f32.mrb[53].mxu1  ;;  %7193 = vmatprep.mubr.msk.bf16.mxu0 %vm7502_vm5, %v9988_v5  ;;  %7199 = vmatprep.mubr.msk.bf16.mxu1 %vm7502_vm5, %v9988_v5  ;;  %v4056_v43 = vpack.c.bf16 %v1509_v30, %v1373_v0  ;;  %v1308_v30 = vrot.slane %v1294_v56, %v8611_v49 }
 0x439   : > { %v9103_v27 = vpop.f32.mrb[54].mxu1  ;;  %7203 = vmatprep.subr.bf16.mxu0 %v9988_v5  ;;  %7209 = vmatprep.subr.bf16.mxu1 %v9988_v5  ;;  %v1374_v12 = vcombine.high %v1317_v37, %v1349_v7  ;;  %v1262_v7 = vcombine.high %v10092_v19, %v10091_v21  ;;  %v1501_v38 = vrot.slane %v1493_v62, %v8621_v40 }
 0x43a   : > { %v7070_v23 = vpop.f32.mrb[55].mxu1  ;;  %v1494_v62 = vcombine.high %v1428_v6, %v1444_v46 }
 0x43b   : > { %v1398_v23 = vcombine.high %v10088_v26, %v10087_v11  ;;  %v4057_v51 = vpack.c.bf16 %v1510_v50, %v1374_v12  ;;  %v1396_v50 = vrot.slane %v1382_v59, %v8611_v49  ;;  %v1276_v0 = vrot.slane %v1262_v7, %v8611_v49 }
 0x43c   : > { %v9124_v9 = vpop.f32.mrb[48].mxu0 }
 0x43d   : > { %v7075_v4 = vpop.f32.mrb[49].mxu0  ;;  %v1412_v8 = vrot.slane %v1398_v23, %v8611_v49 }
 0x43e   : > { %v9139_v37 = vpop.f32.mrb[50].mxu0  ;;  %7194 = vmatmul.mubr.msk.bf16.vlgmr.msra.gmra.mrb[88].mxu0 %vm2241_vm2, %v4454_v32  ;;  %7200 = vmatmul.mubr.msk.bf16.vlgmr.msra.gmra.mrb[96].mxu1 %vm2241_vm2, %v4517_v22  ;;  %v1292_v4 = vrot.slane %v1278_v20, %v8611_v49  ;;  %v1260_v22 = vrot.slane %v1246_v44, %v8611_v49  ;;  %v1375_v20 = vcombine.low %v1324_v17, %v1356_v55 }
 0x43f   : > { %10093 = vst [vmem:[#allocation66_spill] sm:$0xff] %v9139_v37  ;;  %v7076_v54 = vpop.f32.mrb[51].mxu0  ;;  %7204 = vmatpush3.bf16.msra.mxu0 %v4056_v43  ;;  %7210 = vmatpush3.bf16.msra.mxu1 %v4057_v51  ;;  %v1511_v43 = vcombine.low %v1460_v35, %v1492_v39  ;;  %v1512_v51 = vcombine.high %v1460_v35, %v1492_v39 }
 0x440   : > { %7205 = vmatprep.mubr.msk.bf16.mxu0 %vm7502_vm5, %v9988_v5  ;;  %7211 = vmatprep.mubr.msk.bf16.mxu1 %vm7502_vm5, %v9988_v5  ;;  %v1376_v32 = vcombine.high %v1324_v17, %v1356_v55  ;;  %v1357_v12 = vcombine.low %v1292_v4, %v1308_v30  ;;  %v1461_v56 = vcombine.low %v1396_v50, %v1412_v8 }
 0x441   : > { %7215 = vmatprep.subr.bf16.mxu0 %v9988_v5  ;;  %7221 = vmatprep.subr.bf16.mxu1 %v9988_v5  ;;  %v1325_v10 = vcombine.low %v1260_v22, %v1276_v0  ;;  %v4058_v7 = vpack.c.bf16 %v1511_v43, %v1375_v20 }
 0x442   : > { %v4059_v52 = vpack.c.bf16 %v1512_v51, %v1376_v32  ;;  %v1365_v55 = vrot.slane %v1357_v12, %v8621_v40  ;;  %v1469_v35 = vrot.slane %v1461_v56, %v8621_v40  ;;  %v1358_v56 = vcombine.high %v1292_v4, %v1308_v30 }
 0x443   : > { %v1333_v17 = vrot.slane %v1325_v10, %v8621_v40 }
 0x444   : > { %v9160_v33 = vpop.f32.mrb[56].mxu1  ;;  %v1513_v43 = vcombine.low %v1469_v35, %v1501_v38  ;;  %v1514_v51 = vcombine.high %v1469_v35, %v1501_v38  ;;  %v1372_v38 = vrot.slane %v1358_v56, %v8621_v40 }
 0x445   : > { %v7081_v59 = vpop.f32.mrb[57].mxu1  ;;  %v4580_v23 = vpop.trf.xlu0  ;;  %v1377_v32 = vcombine.low %v1333_v17, %v1365_v55  ;;  %v1378_v12 = vcombine.high %v1333_v17, %v1365_v55 }
 0x446   : > { %v4643_v54 = vpop.trf.xlu1  ;;  %v9162_v44 = vpop.f32.mrb[58].mxu1  ;;  %7206 = vmatmul.mubr.msk.bf16.vlgmr.msra.gmra.mrb[92].mxu0 %vm2241_vm2, %v4580_v23  ;;  %v1462_v59 = vcombine.high %v1396_v50, %v1412_v8 }
 0x447   : > { %10094 = vst [vmem:[#allocation43_spill] sm:$0xff] %v9162_v44  ;;  %7212 = vmatmul.mubr.msk.bf16.vlgmr.msra.gmra.mrb[100].mxu1 %vm2241_vm2, %v4643_v54  ;;  %v7082_v39 = vpop.f32.mrb[59].mxu1  ;;  %7216 = vmatpush3.bf16.msra.mxu0 %v4058_v7  ;;  %v4060_v23 = vpack.c.bf16 %v1513_v43, %v1377_v32  ;;  %v4061_v54 = vpack.c.bf16 %v1514_v51, %v1378_v12 }
 0x448   : > { %7222 = vmatpush3.bf16.msra.mxu1 %v4059_v52  ;;  %7217 = vmatprep.mubr.msk.bf16.mxu0 %vm7502_vm5, %v9988_v5  ;;  %v1326_v7 = vcombine.high %v1260_v22, %v1276_v0  ;;  %v1508_v39 = vrot.slane %v1494_v62, %v8621_v40  ;;  %v1476_v46 = vrot.slane %v1462_v59, %v8621_v40 }
 0x449   : > { %7223 = vmatprep.mubr.msk.bf16.mxu1 %vm7502_vm5, %v9988_v5  ;;  %7227 = vmatprep.subr.bf16.mxu0 %v9988_v5  ;;  %v4706_v20 = vpop.trf.xlu0 }
 0x44a   : > { %7233 = vmatprep.subr.bf16.mxu1 %v9988_v5  ;;  %v4769_v52 = vpop.trf.xlu1  ;;  %v1340_v6 = vrot.slane %v1326_v7, %v8621_v40  ;;  %v1515_v4 = vcombine.low %v1476_v46, %v1508_v39  ;;  %v1516_v30 = vcombine.high %v1476_v46, %v1508_v39 }
 0x44c   : > { %v1379_v22 = vcombine.low %v1340_v6, %v1372_v38  ;;  %v1380_v0 = vcombine.high %v1340_v6, %v1372_v38 }
 0x44d   : > { %v4832_v8 = vpop.trf.xlu0 }
 0x44e   : > { %7218 = vmatmul.mubr.msk.bf16.vlgmr.msra.gmra.mrb[96].mxu0 %vm2241_vm2, %v4706_v20  ;;  %v4895_v50 = vpop.trf.xlu1  ;;  %v4062_v10 = vpack.c.bf16 %v1515_v4, %v1379_v22  ;;  %v4063_v55 = vpack.c.bf16 %v1516_v30, %v1380_v0 }
 0x44f   : > { %7224 = vmatmul.mubr.msk.bf16.vlgmr.msra.gmra.mrb[104].mxu1 %vm2241_vm2, %v4769_v52  ;;  %7228 = vmatpush3.bf16.msra.mxu0 %v4060_v23 }
 0x450   : > { %7234 = vmatpush3.bf16.msra.mxu1 %v4061_v54  ;;  %7229 = vmatprep.mubr.msk.bf16.mxu0 %vm7502_vm5, %v9988_v5 }
 0x451   : > { %7235 = vmatprep.mubr.msk.bf16.mxu1 %vm7502_vm5, %v9988_v5  ;;  %7239 = vmatprep.subr.bf16.mxu0 %v9988_v5  ;;  %v4958_v17 = vpop.trf.xlu0 }
 0x452   : > { %7245 = vmatprep.subr.bf16.mxu1 %v9988_v5  ;;  %v5021_v35 = vpop.trf.xlu1 }
 0x456   : > { %7230 = vmatmul.mubr.msk.bf16.vlgmr.msra.gmra.mrb[100].mxu0 %vm2241_vm2, %v4832_v8 }
 0x457   : > { %7236 = vmatmul.mubr.msk.bf16.vlgmr.msra.gmra.mrb[108].mxu1 %vm2241_vm2, %v4895_v50  ;;  %7240 = vmatpush3.bf16.msra.mxu0 %v4062_v10 }
 0x458   : > { %7246 = vmatpush3.bf16.msra.mxu1 %v4063_v55  ;;  %7241 = vmatprep.mubr.msk.bf16.mxu0 %vm7502_vm5, %v9988_v5 }
 0x459   : > { %7247 = vmatprep.mubr.msk.bf16.mxu1 %vm7502_vm5, %v9988_v5  ;;  %7251 = vmatprep.subr.bf16.mxu0 %v9988_v5 }
 0x45a   : > { %7257 = vmatprep.subr.bf16.mxu1 %v9988_v5 }
 0x45e   : > { %7242 = vmatmul.mubr.msk.bf16.vlgmr.msra.gmra.mrb[104].mxu0 %vm2241_vm2, %v4958_v17 }
 0x45f   : > { %7248 = vmatmul.mubr.msk.bf16.vlgmr.msra.gmra.mrb[112].mxu1 %vm2241_vm2, %v5021_v35  ;;  %7253 = vmatprep.mubr.msk.bf16.mxu0 %vm7502_vm5, %v9988_v5 }
 0x460   : > { %7259 = vmatprep.mubr.msk.bf16.mxu1 %vm7502_vm5, %v9988_v5 }
 0x463   : > { %v9202_v43 = vpop.f32.mrb[52].mxu0 }
 0x464   : > { %v7087_v51 = vpop.f32.mrb[53].mxu0 }
 0x465   : > { %v9204_v62 = vpop.f32.mrb[54].mxu0 }
 0x466   : > { %10095 = vst [vmem:[#allocation50_spill] sm:$0xff] %v9204_v62  ;;  %v7088_v52 = vpop.f32.mrb[55].mxu0 }
 0x46b   : > { %v9206_v20 = vpop.f32.mrb[60].mxu1 }
 0x46c   : > { %v7093_v32 = vpop.f32.mrb[61].mxu1 }
 0x46d   : > { %v9208_v12 = vpop.f32.mrb[62].mxu1 }
 0x46e   : > { %10096 = vst [vmem:[#allocation61_spill] sm:$0xff] %v9208_v12  ;;  %v7094_v56 = vpop.f32.mrb[63].mxu1 }
 0x473   : > { %v9210_v59 = vpop.f32.mrb[56].mxu0 }
 0x474   : > { %10097 = vst [vmem:[#allocation82_spill] sm:$0xff] %v9210_v59  ;;  %v7099_v23 = vpop.f32.mrb[57].mxu0 }
 0x475   : > { %v9212_v54 = vpop.f32.mrb[58].mxu0 }
 0x476   : > { %10098 = vst [vmem:[#allocation69_spill] sm:$0xff] %v9212_v54  ;;  %v7100_v7 = vpop.f32.mrb[59].mxu0 }
 0x47b   : > { %v9214_v39 = vpop.f32.mrb[64].mxu1 }
 0x47c   : > { %10099 = vst [vmem:[#allocation72_spill] sm:$0xff] %v9214_v39  ;;  %v7105_v38 = vpop.f32.mrb[65].mxu1 }
 0x47d   : > { %v9216_v46 = vpop.f32.mrb[66].mxu1 }
 0x47e   : > { %10100 = vst [vmem:[#allocation46_spill] sm:$0xff] %v9216_v46  ;;  %v7106_v6 = vpop.f32.mrb[67].mxu1 }
 0x483   : > { %v9218_v4 = vpop.f32.mrb[60].mxu0 }
 0x484   : > { %v7111_v30 = vpop.f32.mrb[61].mxu0 }
 0x485   : > { %v9220_v50 = vpop.f32.mrb[62].mxu0 }
 0x486   : > { %10101 = vst [vmem:[#allocation75_spill] sm:$0xff] %v9220_v50  ;;  %v7112_v8 = vpop.f32.mrb[63].mxu0 }
 0x48b   : > { %v9222_v22 = vpop.f32.mrb[68].mxu1  ;;  %v9224_v0 = vpop.f32.mrb[64].mxu0 }
 0x48c   : > { %v7117_v10 = vpop.f32.mrb[69].mxu1  ;;  %v7123_v55 = vpop.f32.mrb[65].mxu0 }
 0x48d   : > { %v9226_v35 = vpop.f32.mrb[70].mxu1  ;;  %v9228_v17 = vpop.f32.mrb[66].mxu0 }
 0x48e   : > { %10102 = vst [vmem:[#allocation54_spill] sm:$0xff] %v9226_v35  ;;  %10103 = vst [vmem:[#allocation67_spill] sm:$0xff] %v9228_v17  ;;  %v7118_v51 = vpop.f32.mrb[71].mxu1  ;;  %v7124_v52 = vpop.f32.mrb[67].mxu0 }
 0x493   : > { %v9230_v32 = vpop.f32.mrb[72].mxu1  ;;  %v9232_v56 = vpop.f32.mrb[68].mxu0 }
 0x494   : > { %v7129_v23 = vpop.f32.mrb[73].mxu1  ;;  %v7135_v7 = vpop.f32.mrb[69].mxu0 }
 0x495   : > { %v9234_v38 = vpop.f32.mrb[74].mxu1  ;;  %v9236_v6 = vpop.f32.mrb[70].mxu0 }
 0x496   : > { %10104 = vst [vmem:[#allocation71_spill] sm:$0xff] %v9234_v38  ;;  %10105 = vst [vmem:[#allocation44_spill] sm:$0xff] %v9236_v6  ;;  %v7130_v30 = vpop.f32.mrb[75].mxu1  ;;  %v7136_v8 = vpop.f32.mrb[71].mxu0 }
 0x4b8   : > { %v9238_v10 = vpop.f32.mrb[76].mxu1 }
 0x4b9   : > { %v7141_v55 = vpop.f32.mrb[77].mxu1 }
 0x4ba   : > { %v9240_v46 = vpop.f32.mrb[78].mxu1 }
 0x4bb   : > { %10106 = vst [vmem:[#allocation74_spill] sm:$0xff] %v9240_v46  ;;  %v7142_v39 = vpop.f32.mrb[79].mxu1 }
 0x4bc   : > { %v9242_v51 = vpop.f32.mrb[72].mxu0 }
 0x4bd   : > { %10107 = vst [vmem:[#allocation51_spill] sm:$0xff] %v9242_v51  ;;  %v7147_v52 = vpop.f32.mrb[73].mxu0 }
 0x4be   : > { %v9244_v54 = vpop.f32.mrb[74].mxu0 }
 0x4bf   : > { %10108 = vst [vmem:[#allocation78_spill] sm:$0xff] %v9244_v54  ;;  %v7148_v12 = vpop.f32.mrb[75].mxu0 }
 0x4c0   : > { %v9246_v23 = vpop.f32.mrb[80].mxu1 }
 0x4c1   : > { %10109 = vst [vmem:[#allocation62_spill] sm:$0xff] %v9246_v23  ;;  %v7153_v7 = vpop.f32.mrb[81].mxu1 }
 0x4c2   : > { %v9248_v59 = vpop.f32.mrb[82].mxu1 }
 0x4c3   : > { %10110 = vst [vmem:[#allocation83_spill] sm:$0xff] %v9248_v59  ;;  %v7154_v6 = vpop.f32.mrb[83].mxu1 }
 0x4f9   : > { %v4121_v30 = vpop.f32.mrb[76].mxu0  ;;  %v4184_v8 = vpop.f32.mrb[84].mxu1 }
 0x4fa   : > { %v5072_v62 = vpack.c.bf16 %v4121_v30, %v4121_v30  ;;  %v5073_v38 = vpack.c.bf16 %v4184_v8, %v4184_v8  ;;  %v7159_v55 = vpop.f32.mrb[77].mxu0  ;;  %v7165_v17 = vpop.f32.mrb[85].mxu1 }
 0x4fb   : > { %v4124_v46 = vpop.f32.mrb[78].mxu0  ;;  %v4187_v39 = vpop.f32.mrb[86].mxu1 }
 0x4fc   : > { %v5092_v51 = vsel %vm3252_vm3, %v5072_v62, 0  ;;  %v5139_v52 = vsel %vm3252_vm3, %v5073_v38, 0  ;;  %v7160_v54 = vpop.f32.mrb[79].mxu0  ;;  %v7166_v12 = vpop.f32.mrb[87].mxu1 }
 0x4fd   : > { %7252 = vmatpush3.bf16.msra.mxu0 %v5092_v51  ;;  %7258 = vmatpush3.bf16.msra.mxu1 %v5139_v52 }
 0x4fe   : > { %7263 = vmatprep.subr.bf16.mxu0 %v9988_v5  ;;  %7269 = vmatprep.subr.bf16.mxu1 %v9988_v5 }
 0x500   : > { %7254 = vmatmul.mubr.msk.bf16.vlgmr.msra.gmra.mrb[108].mxu0 %vm3248_vm4, %v8669_v47  ;;  %7260 = vmatmul.mubr.msk.bf16.vlgmr.msra.gmra.mrb[116].mxu1 %vm3248_vm4, %v8667_v28 }
 0x501   : > { %v4247_v46 = vpop.f32.mrb[80].mxu0  ;;  %v4310_v17 = vpop.f32.mrb[88].mxu1  ;;  %7265 = vmatprep.mubr.msk.bf16.mxu0 %vm7502_vm5, %v9988_v5  ;;  %7271 = vmatprep.mubr.msk.bf16.mxu1 %vm7502_vm5, %v9988_v5 }
 0x502   : > { %v5074_v62 = vpack.c.bf16 %v4247_v46, %v4247_v46  ;;  %v5075_v54 = vpack.c.bf16 %v4310_v17, %v4310_v17  ;;  %v7171_v38 = vpop.f32.mrb[81].mxu0  ;;  %v7177_v6 = vpop.f32.mrb[89].mxu1 }
 0x503   : > { %v4250_v51 = vpop.f32.mrb[82].mxu0  ;;  %v4313_v7 = vpop.f32.mrb[90].mxu1 }
 0x504   : > { %v5186_v30 = vsel %vm3252_vm3, %v5074_v62, 0  ;;  %v5233_v47 = vsel %vm3252_vm3, %v5075_v54, 0  ;;  %v7172_v8 = vpop.f32.mrb[83].mxu0  ;;  %v7178_v28 = vpop.f32.mrb[91].mxu1 }
 0x505   : > { %7264 = vmatpush3.bf16.msra.mxu0 %v5186_v30  ;;  %7270 = vmatpush3.bf16.msra.mxu1 %v5233_v47 }
 0x506   : > { %7275 = vmatprep.subr.bf16.mxu0 %v9988_v5  ;;  %7281 = vmatprep.subr.bf16.mxu1 %v9988_v5 }
 0x508   : > { %7266 = vmatmul.mubr.msk.bf16.vlgmr.msra.gmra.mrb[112].mxu0 %vm3248_vm4, %v8686_v60  ;;  %7272 = vmatmul.mubr.msk.bf16.vlgmr.msra.gmra.mrb[120].mxu1 %vm3248_vm4, %v8684_v45 }
 0x509   : > { %v4373_v55 = vpop.f32.mrb[84].mxu0  ;;  %v4436_v39 = vpop.f32.mrb[92].mxu1  ;;  %7277 = vmatprep.mubr.msk.bf16.mxu0 %vm7502_vm5, %v9988_v5  ;;  %7283 = vmatprep.mubr.msk.bf16.mxu1 %vm7502_vm5, %v9988_v5 }
 0x50a   : > { %v5076_v52 = vpack.c.bf16 %v4373_v55, %v4373_v55  ;;  %v5077_v12 = vpack.c.bf16 %v4436_v39, %v4436_v39  ;;  %v7183_v46 = vpop.f32.mrb[85].mxu0  ;;  %v7189_v17 = vpop.f32.mrb[93].mxu1 }
 0x50b   : > { %v4376_v62 = vpop.f32.mrb[86].mxu0  ;;  %v4439_v54 = vpop.f32.mrb[94].mxu1  ;;  %v10111_v46 = vld [vmem:[#allocation49_spill] sm:$0xff] }
 0x50c   : > { %v5280_v38 = vsel %vm3252_vm3, %v5076_v52, 0  ;;  %v5327_v60 = vsel %vm3252_vm3, %v5077_v12, 0  ;;  %v7184_v6 = vpop.f32.mrb[87].mxu0  ;;  %v7190_v45 = vpop.f32.mrb[95].mxu1 }
 0x50d   : > { %7276 = vmatpush3.bf16.msra.mxu0 %v5280_v38  ;;  %7282 = vmatpush3.bf16.msra.mxu1 %v5327_v60 }
 0x50e   : > { %7287 = vmatprep.subr.bf16.mxu0 %v9988_v5  ;;  %7293 = vmatprep.subr.bf16.mxu1 %v9988_v5 }
 0x510   : > { %7278 = vmatmul.mubr.msk.bf16.vlgmr.msra.gmra.mrb[116].mxu0 %vm3248_vm4, %v8701_v42  ;;  %7284 = vmatmul.mubr.msk.bf16.vlgmr.msra.gmra.mrb[124].mxu1 %vm3248_vm4, %v8699_v58 }
 0x511   : > { %v4499_v51 = vpop.f32.mrb[88].mxu0  ;;  %v4562_v7 = vpop.f32.mrb[96].mxu1  ;;  %7289 = vmatprep.mubr.msk.bf16.mxu0 %vm7502_vm5, %v9988_v5  ;;  %7295 = vmatprep.mubr.msk.bf16.mxu1 %vm7502_vm5, %v9988_v5 }
 0x512   : > { %v5078_v30 = vpack.c.bf16 %v4499_v51, %v4499_v51  ;;  %v5079_v47 = vpack.c.bf16 %v4562_v7, %v4562_v7  ;;  %v7195_v8 = vpop.f32.mrb[89].mxu0  ;;  %v7201_v28 = vpop.f32.mrb[97].mxu1 }
 0x513   : > { %v4502_v55 = vpop.f32.mrb[90].mxu0  ;;  %v4565_v39 = vpop.f32.mrb[98].mxu1 }
 0x514   : > { %v5374_v52 = vsel %vm3252_vm3, %v5078_v30, 0  ;;  %v5421_v42 = vsel %vm3252_vm3, %v5079_v47, 0  ;;  %v7196_v12 = vpop.f32.mrb[91].mxu0  ;;  %v7202_v58 = vpop.f32.mrb[99].mxu1 }
 0x515   : > { %7288 = vmatpush3.bf16.msra.mxu0 %v5374_v52  ;;  %7294 = vmatpush3.bf16.msra.mxu1 %v5421_v42 }
 0x516   : > { %7299 = vmatprep.subr.bf16.mxu0 %v9988_v5  ;;  %7305 = vmatprep.subr.bf16.mxu1 %v9988_v5 }
 0x518   : > { %7290 = vmatmul.mubr.msk.bf16.vlgmr.msra.gmra.mrb[120].mxu0 %vm3248_vm4, %v8715_v41  ;;  %7296 = vmatmul.mubr.msk.bf16.vlgmr.msra.gmra.mrb[128].mxu1 %vm3248_vm4, %v10111_v46 }
 0x519   : > { %v4625_v17 = vpop.f32.mrb[92].mxu0  ;;  %7301 = vmatprep.mubr.msk.bf16.mxu0 %vm7502_vm5, %v9988_v5  ;;  %7307 = vmatprep.mubr.msk.bf16.mxu1 %vm7502_vm5, %v9988_v5 }
 0x51a   : > { %v4688_v62 = vpop.f32.mrb[100].mxu1  ;;  %v5080_v54 = vpack.c.bf16 %v4625_v17, %v4625_v17  ;;  %v7207_v60 = vpop.f32.mrb[93].mxu0 }
 0x51b   : > { %v5081_v38 = vpack.c.bf16 %v4688_v62, %v4688_v62  ;;  %v7213_v6 = vpop.f32.mrb[101].mxu1  ;;  %v4628_v45 = vpop.f32.mrb[94].mxu0 }
 0x51c   : > { %v4691_v51 = vpop.f32.mrb[102].mxu1  ;;  %v5468_v7 = vsel %vm3252_vm3, %v5080_v54, 0  ;;  %v7208_v30 = vpop.f32.mrb[95].mxu0 }
 0x51d   : > { %v5515_v41 = vsel %vm3252_vm3, %v5081_v38, 0  ;;  %v7214_v47 = vpop.f32.mrb[103].mxu1  ;;  %7300 = vmatpush3.bf16.msra.mxu0 %v5468_v7 }
 0x51e   : > { %7306 = vmatpush3.bf16.msra.mxu1 %v5515_v41  ;;  %7311 = vmatprep.subr.bf16.mxu0 %v9988_v5  ;;  %v10112_v47 = vld [vmem:[#allocation68_spill] sm:$0xff] }
 0x51f   : > { %7317 = vmatprep.subr.bf16.mxu1 %v9988_v5 }
 0x520   : > { %7302 = vmatmul.mubr.msk.bf16.vlgmr.msra.gmra.mrb[124].mxu0 %vm3248_vm4, %v8793_v18 }
 0x521   : > { %7308 = vmatmul.mubr.msk.bf16.vlgmr.msra.gmra.mrb[132].mxu1 %vm3248_vm4, %v8791_v3  ;;  %v4751_v8 = vpop.f32.mrb[96].mxu0  ;;  %7313 = vmatprep.mubr.msk.bf16.mxu0 %vm7502_vm5, %v9988_v5 }
 0x522   : > { %v4814_v28 = vpop.f32.mrb[104].mxu1  ;;  %7319 = vmatprep.mubr.msk.bf16.mxu1 %vm7502_vm5, %v9988_v5  ;;  %v5082_v55 = vpack.c.bf16 %v4751_v8, %v4751_v8  ;;  %v7219_v52 = vpop.f32.mrb[97].mxu0  ;;  %v10113_v8 = vld [vmem:[#allocation60_spill] sm:$0xff] }
 0x523   : > { %v5083_v39 = vpack.c.bf16 %v4814_v28, %v4814_v28  ;;  %v7225_v42 = vpop.f32.mrb[105].mxu1  ;;  %v4754_v12 = vpop.f32.mrb[98].mxu0 }
 0x524   : > { %v4817_v58 = vpop.f32.mrb[106].mxu1  ;;  %v5562_v46 = vsel %vm3252_vm3, %v5082_v55, 0  ;;  %v7220_v17 = vpop.f32.mrb[99].mxu0 }
 0x525   : > { %v5609_v18 = vsel %vm3252_vm3, %v5083_v39, 0  ;;  %v7226_v3 = vpop.f32.mrb[107].mxu1  ;;  %7312 = vmatpush3.bf16.msra.mxu0 %v5562_v46 }
 0x526   : > { %7318 = vmatpush3.bf16.msra.mxu1 %v5609_v18  ;;  %7323 = vmatprep.subr.bf16.mxu0 %v9988_v5 }
 0x527   : > { %7329 = vmatprep.subr.bf16.mxu1 %v9988_v5 }
 0x528   : > { %7314 = vmatmul.mubr.msk.bf16.vlgmr.msra.gmra.mrb[128].mxu0 %vm3248_vm4, %v8812_v13 }
 0x529   : > { %7320 = vmatmul.mubr.msk.bf16.vlgmr.msra.gmra.mrb[136].mxu1 %vm3248_vm4, %v8810_v14  ;;  %v4877_v62 = vpop.f32.mrb[100].mxu0  ;;  %7325 = vmatprep.mubr.msk.bf16.mxu0 %vm7502_vm5, %v9988_v5 }
 0x52a   : > { %v4940_v54 = vpop.f32.mrb[108].mxu1  ;;  %7331 = vmatprep.mubr.msk.bf16.mxu1 %vm7502_vm5, %v9988_v5  ;;  %v5084_v38 = vpack.c.bf16 %v4877_v62, %v4877_v62  ;;  %v7231_v6 = vpop.f32.mrb[101].mxu0 }
 0x52b   : > { %v5085_v60 = vpack.c.bf16 %v4940_v54, %v4940_v54  ;;  %v7237_v45 = vpop.f32.mrb[109].mxu1  ;;  %v4880_v51 = vpop.f32.mrb[102].mxu0  ;;  %v10114_v54 = vld [vmem:[#allocation53_spill] sm:$0xff] }
 0x52c   : > { %v4943_v7 = vpop.f32.mrb[110].mxu1  ;;  %v5656_v41 = vsel %vm3252_vm3, %v5084_v38, 0  ;;  %v7232_v30 = vpop.f32.mrb[103].mxu0  ;;  %v10115_v38 = vld [vmem:[#allocation45_spill] sm:$0xff] }
 0x52d   : > { %v5703_v13 = vsel %vm3252_vm3, %v5085_v60, 0  ;;  %v7238_v14 = vpop.f32.mrb[111].mxu1  ;;  %7324 = vmatpush3.bf16.msra.mxu0 %v5656_v41 }
 0x52e   : > { %7330 = vmatpush3.bf16.msra.mxu1 %v5703_v13  ;;  %7335 = vmatprep.subr.bf16.mxu0 %v9988_v5 }
 0x52f   : > { %7341 = vmatprep.subr.bf16.mxu1 %v9988_v5 }
 0x530   : > { %7326 = vmatmul.mubr.msk.bf16.vlgmr.msra.gmra.mrb[132].mxu0 %vm3248_vm4, %v10112_v47 }
 0x531   : > { %7332 = vmatmul.mubr.msk.bf16.vlgmr.msra.gmra.mrb[140].mxu1 %vm3248_vm4, %v10113_v8  ;;  %v5003_v28 = vpop.f32.mrb[104].mxu0  ;;  %7337 = vmatprep.mubr.msk.bf16.mxu0 %vm7502_vm5, %v9988_v5 }
 0x532   : > { %v5066_v55 = vpop.f32.mrb[112].mxu1  ;;  %7343 = vmatprep.mubr.msk.bf16.mxu1 %vm7502_vm5, %v9988_v5  ;;  %v5086_v39 = vpack.c.bf16 %v5003_v28, %v5003_v28  ;;  %v7243_v42 = vpop.f32.mrb[105].mxu0 }
 0x533   : > { %v5087_v52 = vpack.c.bf16 %v5066_v55, %v5066_v55  ;;  %v7249_v12 = vpop.f32.mrb[113].mxu1  ;;  %v5006_v58 = vpop.f32.mrb[106].mxu0 }
 0x534   : > { %v5069_v46 = vpop.f32.mrb[114].mxu1  ;;  %v5750_v18 = vsel %vm3252_vm3, %v5086_v39, 0  ;;  %v7244_v3 = vpop.f32.mrb[107].mxu0 }
 0x535   : > { %v5797_v17 = vsel %vm3252_vm3, %v5087_v52, 0  ;;  %v7250_v62 = vpop.f32.mrb[115].mxu1  ;;  %7336 = vmatpush3.bf16.msra.mxu0 %v5750_v18 }
 0x536   : > { %7342 = vmatpush3.bf16.msra.mxu1 %v5797_v17 }
 0x538   : > { %7338 = vmatmul.mubr.msk.bf16.vlgmr.msra.gmra.mrb[136].mxu0 %vm3248_vm4, %v10114_v54 }
 0x539   : > { %7344 = vmatmul.mubr.msk.bf16.vlgmr.msra.gmra.mrb[144].mxu1 %vm3248_vm4, %v10115_v38 }
 0x5d3   : > { %v5128_v5 = vpop.f32.mrb[108].mxu0  ;;  %v5175_v60 = vpop.f32.mrb[116].mxu1 }
 0x5d4   : > { %v7255_v6 = vpop.f32.mrb[109].mxu0  ;;  %v7261_v45 = vpop.f32.mrb[117].mxu1 }
 0x5d5   : > { %v5131_v51 = vpop.f32.mrb[110].mxu0  ;;  %v5178_v7 = vpop.f32.mrb[118].mxu1 }
 0x5d6   : > { %v7256_v41 = vpop.f32.mrb[111].mxu0  ;;  %v7262_v13 = vpop.f32.mrb[119].mxu1 }
 0x5db   : > { %v5222_v30 = vpop.f32.mrb[112].mxu0  ;;  %v5269_v14 = vpop.f32.mrb[120].mxu1 }
 0x5dc   : > { %v5840_v47 = vcombine.low %v5128_v5, %v5222_v30  ;;  %v5841_v8 = vcombine.high %v5128_v5, %v5222_v30  ;;  %v5856_v28 = vcombine.low %v5175_v60, %v5269_v14  ;;  %v5857_v55 = vcombine.high %v5175_v60, %v5269_v14  ;;  %v7267_v39 = vpop.f32.mrb[113].mxu0  ;;  %v7273_v52 = vpop.f32.mrb[121].mxu1 }
 0x5dd   : > { %v5225_v42 = vpop.f32.mrb[114].mxu0  ;;  %v5272_v12 = vpop.f32.mrb[122].mxu1 }
 0x5de   : > { %v5848_v58 = vrot.slane %v5840_v47, %v8611_v49  ;;  %v5855_v46 = vrot.slane %v5841_v8, %v8611_v49  ;;  %v5864_v18 = vrot.slane %v5856_v28, %v8611_v49  ;;  %v5871_v17 = vrot.slane %v5857_v55, %v8611_v49  ;;  %v7268_v3 = vpop.f32.mrb[115].mxu0  ;;  %v7274_v62 = vpop.f32.mrb[123].mxu1 }
 0x5df   : > { %v6112_v54 = vcombine.low %v5131_v51, %v5225_v42  ;;  %v6113_v38 = vcombine.high %v5131_v51, %v5225_v42  ;;  %v6128_v6 = vcombine.low %v5178_v7, %v5272_v12  ;;  %v6129_v5 = vcombine.high %v5178_v7, %v5272_v12 }
 0x5e0   : > { %v5904_v45 = vcombine.low %v5848_v58, %v5864_v18  ;;  %v5905_v60 = vcombine.high %v5848_v58, %v5864_v18  ;;  %v5920_v41 = vcombine.low %v5855_v46, %v5871_v17  ;;  %v5921_v13 = vcombine.high %v5855_v46, %v5871_v17 }
 0x5e1   : > { %v6120_v30 = vrot.slane %v6112_v54, %v8611_v49  ;;  %v6127_v14 = vrot.slane %v6113_v38, %v8611_v49  ;;  %v6136_v47 = vrot.slane %v6128_v6, %v8611_v49  ;;  %v6143_v8 = vrot.slane %v6129_v5, %v8611_v49 }
 0x5e2   : > { %v9349_v3 = vmul.f32 -inf, %v10082_v31  ;;  %v9352_v62 = vmul.f32 -inf, %v7948_v63  ;;  %v9355_v54 = vmul.f32 -inf, %v7713_v15  ;;  %v9357_v38 = vstv %s6448_s3 }
 0x5e3   : > { %v6176_v28 = vcombine.low %v6120_v30, %v6136_v47  ;;  %v6177_v55 = vcombine.high %v6120_v30, %v6136_v47  ;;  %v6192_v39 = vcombine.low %v6127_v14, %v6143_v8  ;;  %v6193_v52 = vcombine.high %v6127_v14, %v6143_v8  ;;  %v5316_v51 = vpop.f32.mrb[116].mxu0  ;;  %v5363_v42 = vpop.f32.mrb[124].mxu1 }
 0x5e4   : > { %v7279_v7 = vpop.f32.mrb[117].mxu0  ;;  %v7285_v12 = vpop.f32.mrb[125].mxu1  ;;  %v9360_v6 = vmul.f32 -inf, %v7917_v36  ;;  %v9363_v5 = vmul.f32 -inf, %v7735_v61  ;;  %v9366_v30 = vmul.f32 -inf, %v7732_v53  ;;  %v9369_v31 = vrot.slane %v5904_v45, %v8621_v40 }
 0x5e5   : > { %v5319_v58 = vpop.f32.mrb[118].mxu0  ;;  %v5366_v18 = vpop.f32.mrb[126].mxu1  ;;  %v9372_v63 = vrot.slane %v5905_v60, %v8621_v40  ;;  %v9375_v15 = vrot.slane %v5920_v41, %v8621_v40  ;;  %v9378_v14 = vrot.slane %v5921_v13, %v8621_v40  ;;  %v9381_v45 = vrot.slane %v6176_v28, %v8621_v40 }
 0x5e6   : > { %v7280_v46 = vpop.f32.mrb[119].mxu0  ;;  %v7286_v17 = vpop.f32.mrb[127].mxu1  ;;  %v9384_v60 = vrot.slane %v6177_v55, %v8621_v40  ;;  %v9387_v41 = vrot.slane %v6192_v39, %v8621_v40  ;;  %v9390_v13 = vrot.slane %v6193_v52, %v8621_v40 }
 0x5eb   : > { %v5410_v36 = vpop.f32.mrb[120].mxu0  ;;  %v5457_v47 = vpop.f32.mrb[128].mxu1 }
 0x5ec   : > { %v5872_v8 = vcombine.low %v5316_v51, %v5410_v36  ;;  %v5873_v61 = vcombine.high %v5316_v51, %v5410_v36  ;;  %v5888_v7 = vcombine.low %v5363_v42, %v5457_v47  ;;  %v5889_v12 = vcombine.high %v5363_v42, %v5457_v47  ;;  %v7291_v53 = vpop.f32.mrb[121].mxu0  ;;  %v7297_v46 = vpop.f32.mrb[129].mxu1 }
 0x5ed   : > { %v5413_v17 = vpop.f32.mrb[122].mxu0  ;;  %v5460_v59 = vpop.f32.mrb[130].mxu1 }
 0x5ee   : > { %v5880_v51 = vrot.slane %v5872_v8, %v8611_v49  ;;  %v5887_v42 = vrot.slane %v5873_v61, %v8611_v49  ;;  %v5896_v36 = vrot.slane %v5888_v7, %v8611_v49  ;;  %v5903_v28 = vrot.slane %v5889_v12, %v8611_v49  ;;  %v7292_v47 = vpop.f32.mrb[123].mxu0  ;;  %v7298_v53 = vpop.f32.mrb[131].mxu1 }
 0x5ef   : > { %v6144_v55 = vcombine.low %v5319_v58, %v5413_v17  ;;  %v6145_v46 = vcombine.high %v5319_v58, %v5413_v17  ;;  %v6160_v23 = vcombine.low %v5366_v18, %v5460_v59  ;;  %v6161_v39 = vcombine.high %v5366_v18, %v5460_v59 }
 0x5f0   : > { %v5936_v35 = vcombine.low %v5880_v51, %v5896_v36  ;;  %v5937_v50 = vcombine.high %v5880_v51, %v5896_v36  ;;  %v5952_v52 = vcombine.low %v5887_v42, %v5903_v28  ;;  %v5953_v44 = vcombine.high %v5887_v42, %v5903_v28 }
 0x5f1   : > { %v6152_v37 = vrot.slane %v6144_v55, %v8611_v49  ;;  %v6159_v8 = vrot.slane %v6145_v46, %v8611_v49  ;;  %v6168_v61 = vrot.slane %v6160_v23, %v8611_v49  ;;  %v6175_v7 = vrot.slane %v6161_v39, %v8611_v49 }
 0x5f2   : > { %v5944_v12 = vrot.slane %v5936_v35, %v8621_v40  ;;  %v5951_v47 = vrot.slane %v5937_v50, %v8621_v40  ;;  %v9403_v58 = vrot.slane %v5952_v52, %v8621_v40  ;;  %v9406_v59 = vrot.slane %v5953_v44, %v8621_v40 }
 0x5f3   : > { %v6208_v18 = vcombine.low %v6152_v37, %v6168_v61  ;;  %v6209_v17 = vcombine.high %v6152_v37, %v6168_v61  ;;  %v6224_v51 = vcombine.low %v6159_v8, %v6175_v7  ;;  %v6225_v42 = vcombine.high %v6159_v8, %v6175_v7  ;;  %v5504_v36 = vpop.f32.mrb[124].mxu0 }
 0x5f4   : > { %v5551_v28 = vpop.f32.mrb[132].mxu1  ;;  %v5968_v23 = vcombine.low %v9369_v31, %v5944_v12  ;;  %v5969_v53 = vcombine.high %v9369_v31, %v5944_v12  ;;  %v5970_v35 = vcombine.low %v9372_v63, %v5951_v47  ;;  %v5971_v50 = vcombine.high %v9372_v63, %v5951_v47  ;;  %v7303_v55 = vpop.f32.mrb[125].mxu0 }
 0x5f5   : > { %v7309_v46 = vpop.f32.mrb[133].mxu1  ;;  %v5507_v8 = vpop.f32.mrb[126].mxu0  ;;  %v6216_v61 = vrot.slane %v6208_v18, %v8621_v40  ;;  %v6223_v63 = vrot.slane %v6209_v17, %v8621_v40  ;;  %v9423_v7 = vrot.slane %v6224_v51, %v8621_v40  ;;  %v9426_v12 = vrot.slane %v6225_v42, %v8621_v40 }
 0x5f6   : > { %v5554_v31 = vpop.f32.mrb[134].mxu1  ;;  %v7304_v47 = vpop.f32.mrb[127].mxu0  ;;  %v6416_v46 = vadd.f32 %v9349_v3, %v5968_v23  ;;  %v6418_v39 = vadd.f32 %v9355_v54, %v5969_v53  ;;  %v6420_v52 = vadd.f32 %v9363_v5, %v5970_v35  ;;  %v6422_v37 = vadd.f32 %v9366_v30, %v5971_v50 }
 0x5f7   : > { %v7310_v55 = vpop.f32.mrb[135].mxu1  ;;  %v6240_v18 = vcombine.low %v9381_v45, %v6216_v61  ;;  %v6241_v17 = vcombine.high %v9381_v45, %v6216_v61  ;;  %v6242_v51 = vcombine.low %v9384_v60, %v6223_v63  ;;  %v6243_v44 = vcombine.high %v9384_v60, %v6223_v63  ;;  %v10116_v61 = vld [vmem:[#allocation57_spill] sm:$0xff] }
 0x5f8   : > { %v6449_v30 = vadd.f32 %v6416_v46, %v9036_v16  ;;  %v9447_v23 = vadd.f32 %v6418_v39, %v9099_v34  ;;  %v9451_v50 = vadd.f32 %v6420_v52, %v9124_v9  ;;  %v6404_v63 = vmul.f32 -inf, %v10116_v61  ;;  %v10117_v52 = vld [vmem:[#allocation63_spill] sm:$0xff] }
 0x5f9   : > { %v6432_v45 = vadd.f32 %v9352_v62, %v6240_v18  ;;  %v6434_v60 = vadd.f32 %v9360_v6, %v6241_v17  ;;  %v9455_v47 = vadd.f32 %v6422_v37, %v9160_v33  ;;  %v6406_v61 = vmul.f32 -inf, %v10117_v52 }
 0x5fa   : > { %v6482_v6 = vmul.f32 %v9357_v38, %v6449_v30  ;;  %v9506_v42 = vmul.f32 -inf, %v10089_v48  ;;  %v10126_v48 = vcombine.high %v9375_v15, %v9403_v58 }
 0x5fb   : > { %v5598_v53 = vpop.f32.mrb[128].mxu0  ;;  %v6465_v17 = vadd.f32 %v6432_v45, %v9218_v4  ;;  %v9460_v9 = vadd.f32 %v6434_v60, %v9222_v22 }
 0x5fc   : > { %v5645_v35 = vpop.f32.mrb[136].mxu1  ;;  %v5976_v55 = vcombine.low %v5504_v36, %v5598_v53  ;;  %v5977_v5 = vcombine.high %v5504_v36, %v5598_v53  ;;  %v7315_v62 = vpop.f32.mrb[129].mxu0 }
 0x5fd   : > { %v5992_v16 = vcombine.low %v5551_v28, %v5645_v35  ;;  %v5993_v46 = vcombine.high %v5551_v28, %v5645_v35  ;;  %v7321_v18 = vpop.f32.mrb[137].mxu1  ;;  %v5601_v34 = vpop.f32.mrb[130].mxu0 }
 0x5fe   : > { %v5648_v39 = vpop.f32.mrb[138].mxu1  ;;  %v9464_v33 = vrot.slane %v5976_v55, %v8611_v49  ;;  %v9467_v36 = vrot.slane %v5977_v5, %v8611_v49  ;;  %v7316_v35 = vpop.f32.mrb[131].mxu0  ;;  %v6248_v30 = vcombine.low %v5507_v8, %v5601_v34  ;;  %v6249_v62 = vcombine.high %v5507_v8, %v5601_v34 }
 0x5ff   : > { %v6000_v28 = vrot.slane %v5992_v16, %v8611_v49  ;;  %v6007_v37 = vrot.slane %v5993_v46, %v8611_v49  ;;  %v7322_v53 = vpop.f32.mrb[139].mxu1  ;;  %v6264_v4 = vcombine.low %v5554_v31, %v5648_v39  ;;  %v6265_v45 = vcombine.high %v5554_v31, %v5648_v39 }
 0x600   : > { %v6256_v5 = vrot.slane %v6248_v30, %v8611_v49  ;;  %v6263_v16 = vrot.slane %v6249_v62, %v8611_v49  ;;  %v6436_v53 = vadd.f32 %v6404_v63, %v6242_v51  ;;  %v6438_v8 = vadd.f32 %v6406_v61, %v6243_v44 }
 0x601   : > { %v6040_v22 = vcombine.low %v9464_v33, %v6000_v28  ;;  %v6041_v60 = vcombine.high %v9464_v33, %v6000_v28  ;;  %v6056_v55 = vcombine.low %v9467_v36, %v6007_v37  ;;  %v6057_v18 = vcombine.high %v9467_v36, %v6007_v37  ;;  %v10118_v28 = vld [vmem:[#allocation3_spill] sm:$0xff] }
 0x602   : > { %v6272_v46 = vrot.slane %v6264_v4, %v8611_v49  ;;  %v6279_v52 = vrot.slane %v6265_v45, %v8611_v49  ;;  %v6514_v3 = vadd.f32 %v6482_v6, %v10118_v28  ;;  %v6498_v36 = vmul.f32 %v9357_v38, %v6465_v17  ;;  %v10119_v6 = vld [vmem:[#allocation42_spill] sm:$0xff]  ;;  %v10120_v45 = vld [vmem:[#allocation65_spill] sm:$0xff]  ;;  %v10122_v28 = vld [vmem:[#allocation40_spill] sm:$0xff] }
 0x603   : > { %v5692_v54 = vpop.f32.mrb[132].mxu0  ;;  %v9482_v62 = vmul.f32 -inf, %v10090_v25  ;;  %v9485_v4 = vmul.f32 -inf, %v10086_v24  ;;  %v9492_v63 = vmul.f32 -inf, %v10092_v19  ;;  %v9495_v61 = vmul.f32 -inf, %v10088_v26  ;;  %v10121_v25 = vld [vmem:[#allocation4_spill] sm:$0xff] }
 0x604   : > { %v6312_v34 = vcombine.low %v6256_v5, %v6272_v46  ;;  %v6313_v31 = vcombine.high %v6256_v5, %v6272_v46  ;;  %v6328_v39 = vcombine.low %v6263_v16, %v6279_v52  ;;  %v6329_v35 = vcombine.high %v6263_v16, %v6279_v52  ;;  %v5739_v33 = vpop.f32.mrb[140].mxu1  ;;  %v7327_v37 = vpop.f32.mrb[133].mxu0  ;;  %6546 = vxpose.xlu0.b32.start [1/16] (narrow) %v6514_v3, 64 }
 0x605   : > { %v7333_v30 = vpop.f32.mrb[141].mxu1  ;;  %v9487_v51 = vpop.f32.mrb[134].mxu0  ;;  %v6392_v17 = vmul.f32 -inf, %v10119_v6  ;;  %v6408_v5 = vmul.f32 -inf, %v10120_v45  ;;  %v6530_v16 = vadd.f32 %v6498_v36, %v10121_v25  ;;  %v9501_v52 = vadd.f32 %v6436_v53, %v9224_v0 }
 0x606   : > { %v9489_v44 = vpop.f32.mrb[142].mxu1  ;;  %v7328_v46 = vpop.f32.mrb[135].mxu0  ;;  %v6394_v37 = vmul.f32 -inf, %v10122_v28  ;;  %v10123_v30 = vld [vmem:[#allocation85_spill] sm:$0xff]  ;;  %v9509_v26 = vadd.f32 %v6438_v8, %v9230_v32  ;;  %v10124_v3 = vcombine.low %v9375_v15, %v9403_v58  ;;  %v10125_v36 = vcombine.low %v9387_v41, %v9423_v7 }
 0x607   : > { %v7334_v24 = vpop.f32.mrb[143].mxu1  ;;  %v6410_v19 = vmul.f32 -inf, %v10123_v30  ;;  %6578 = vxpose.xlu1.b32.start [1/16] (narrow) %v6530_v16, 64  ;;  %v9518_v0 = vmul.f32 -inf, %v10085_v29  ;;  %v9521_v53 = vmul.f32 -inf, %v10091_v21  ;;  %v10127_v8 = vcombine.high %v9387_v41, %v9423_v7 }
 0x608   : > { %v6424_v6 = vadd.f32 %v6392_v17, %v10124_v3  ;;  %v6440_v45 = vadd.f32 %v6408_v5, %v10125_v36  ;;  %v6426_v32 = vadd.f32 %v6394_v37, %v10126_v48  ;;  %v9530_v17 = vmul.f32 -inf, %v10087_v11 }
 0x609   : > { %v6442_v25 = vadd.f32 %v6410_v19, %v10127_v8  ;;  %v9539_v21 = vmul.f32 -inf, %v7787_v2  ;;  %v6048_v16 = vrot.slane %v6040_v22, %v8621_v40  ;;  %v9543_v15 = vmul.f32 -inf, %v8038_v57 }
 0x60a   : > { %v9533_v5 = vadd.f32 %v6424_v6, %v9202_v43  ;;  %v9536_v29 = vadd.f32 %v6440_v45, %v9232_v56  ;;  %v9546_v41 = vadd.f32 %v6426_v32, %v9206_v20  ;;  %v6055_v58 = vrot.slane %v6041_v60, %v8621_v40 }
 0x60b   : > { %v6475_v11 = vadd.f32 %v6442_v25, %v9238_v10  ;;  %v9551_v43 = vrot.slane %v6056_v55, %v8621_v40  ;;  %v9554_v56 = vrot.slane %v6057_v18, %v8621_v40  ;;  %v9557_v2 = vrot.slane %v6312_v34, %v8621_v40  ;;  %v5786_v7 = vpop.f32.mrb[136].mxu0 }
 0x60c   : > { %v5833_v22 = vpop.f32.mrb[144].mxu1  ;;  %v6008_v57 = vcombine.low %v5692_v54, %v5786_v7  ;;  %v6009_v46 = vcombine.high %v5692_v54, %v5786_v7  ;;  %v7339_v28 = vpop.f32.mrb[137].mxu0  ;;  %v9560_v10 = vrot.slane %v6313_v31, %v8621_v40  ;;  %v9563_v60 = vrot.slane %v6328_v39, %v8621_v40 }
 0x60d   : > { %v6024_v24 = vcombine.low %v5739_v33, %v5833_v22  ;;  %v6025_v20 = vcombine.high %v5739_v33, %v5833_v22  ;;  %v7345_v37 = vpop.f32.mrb[145].mxu1  ;;  %v9566_v55 = vrot.slane %v6329_v35, %v8621_v40  ;;  %v5789_v18 = vpop.f32.mrb[138].mxu0  ;;  %v9569_v30 = vmul.f32 %v9357_v38, %v6475_v11 }
 0x60e   : > { %v5836_v34 = vpop.f32.mrb[146].mxu1  ;;  %v6016_v54 = vrot.slane %v6008_v57, %v8611_v49  ;;  %v6023_v33 = vrot.slane %v6009_v46, %v8611_v49  ;;  %v7340_v3 = vpop.f32.mrb[139].mxu0  ;;  %v6280_v39 = vcombine.low %v9487_v51, %v5789_v18  ;;  %v6281_v35 = vcombine.high %v9487_v51, %v5789_v18 }
 0x60f   : > { %v6032_v19 = vrot.slane %v6024_v24, %v8611_v49  ;;  %v6039_v31 = vrot.slane %v6025_v20, %v8611_v49  ;;  %v7346_v6 = vpop.f32.mrb[147].mxu1  ;;  %v6296_v36 = vcombine.low %v9489_v44, %v5836_v34  ;;  %v6297_v45 = vcombine.high %v9489_v44, %v5836_v34 }
 0x610   : > { %v6288_v11 = vrot.slane %v6280_v39, %v8611_v49  ;;  %v6295_v7 = vrot.slane %v6281_v35, %v8611_v49 }
 0x611   : > { %v6072_v48 = vcombine.low %v6016_v54, %v6032_v19  ;;  %v6073_v32 = vcombine.high %v6016_v54, %v6032_v19  ;;  %v6088_v8 = vcombine.low %v6023_v33, %v6039_v31  ;;  %v6089_v25 = vcombine.high %v6023_v33, %v6039_v31 }
 0x612   : > { %v6304_v22 = vrot.slane %v6296_v36, %v8611_v49  ;;  %v6311_v57 = vrot.slane %v6297_v45, %v8611_v49 }
 0x613   : > { %v6080_v46 = vrot.slane %v6072_v48, %v8621_v40  ;;  %v6087_v51 = vrot.slane %v6073_v32, %v8621_v40  ;;  %v9586_v24 = vrot.slane %v6088_v8, %v8621_v40  ;;  %v9589_v44 = vrot.slane %v6089_v25, %v8621_v40 }
 0x614   : > { %v6344_v20 = vcombine.low %v6288_v11, %v6304_v22  ;;  %v6345_v28 = vcombine.high %v6288_v11, %v6304_v22  ;;  %v6360_v37 = vcombine.low %v6295_v7, %v6311_v57  ;;  %v6361_v18 = vcombine.high %v6295_v7, %v6311_v57  ;;  %v10128_v57 = vld [vmem:[#allocation66_spill] sm:$0xff] }
 0x615   : > { %v6104_v34 = vcombine.low %v6048_v16, %v6080_v46  ;;  %v6105_v54 = vcombine.high %v6048_v16, %v6080_v46  ;;  %v6106_v33 = vcombine.low %v6055_v58, %v6087_v51  ;;  %v6107_v19 = vcombine.high %v6055_v58, %v6087_v51 }
 0x616   : > { %v6108_v49 = vcombine.low %v9551_v43, %v9586_v24  ;;  %v6109_v31 = vcombine.high %v9551_v43, %v9586_v24  ;;  %v6110_v3 = vcombine.low %v9554_v56, %v9589_v44  ;;  %v6111_v6 = vcombine.high %v9554_v56, %v9589_v44  ;;  %v10167_v56 = vld [vmem:[#allocation13_spill] sm:$0xff] }
 0x617   : > { %v6352_v39 = vrot.slane %v6344_v20, %v8621_v40  ;;  %v6359_v35 = vrot.slane %v6345_v28, %v8621_v40  ;;  %v6368_v16 = vrot.slane %v6360_v37, %v8621_v40  ;;  %v9603_v58 = vrot.slane %v6361_v18, %v8621_v40  ;;  %v10130_v28 = vld [vmem:[#allocation75_spill] sm:$0xff]  ;;  %v10131_v37 = vld [vmem:[#allocation54_spill] sm:$0xff]  ;;  %v10132_v18 = vld [vmem:[#allocation52_spill] sm:$0xff] }
 0x618   : > { %v6417_v36 = vadd.f32 %v9482_v62, %v6104_v34  ;;  %v6419_v45 = vadd.f32 %v9492_v63, %v6105_v54  ;;  %v6421_v43 = vadd.f32 %v9506_v42, %v6106_v33  ;;  %v6423_v48 = vadd.f32 %v9521_v53, %v6107_v19  ;;  %v10133_v34 = vld [vmem:[#allocation67_spill] sm:$0xff]  ;;  %v10135_v19 = vld [vmem:[#allocation77_spill] sm:$0xff] }
 0x619   : > { %v6376_v32 = vcombine.low %v9557_v2, %v6352_v39  ;;  %v6377_v8 = vcombine.high %v9557_v2, %v6352_v39  ;;  %v6378_v25 = vcombine.low %v9560_v10, %v6359_v35  ;;  %v6379_v11 = vcombine.high %v9560_v10, %v6359_v35 }
 0x61a   : > { %v6380_v7 = vcombine.low %v9563_v60, %v6368_v16  ;;  %v6381_v40 = vcombine.high %v9563_v60, %v6368_v16  ;;  %v6382_v62 = vcombine.low %v9566_v55, %v9603_v58  ;;  %v6383_v42 = vcombine.high %v9566_v55, %v9603_v58  ;;  %v10129_v60 = vld [vmem:[#allocation43_spill] sm:$0xff] }
 0x61b   : > { %v6450_v63 = vadd.f32 %v6417_v36, %v9051_v1  ;;  %v6433_v53 = vadd.f32 %v9485_v4, %v6376_v32  ;;  %v6452_v2 = vadd.f32 %v6419_v45, %v9103_v27  ;;  %v6435_v22 = vadd.f32 %v9495_v61, %v6377_v8  ;;  %v10137_v36 = vld [vmem:[#allocation41_spill] sm:$0xff] }
 0x61c   : > { %v9624_v10 = vadd.f32 %v6421_v43, %v10128_v57  ;;  %v6437_v46 = vadd.f32 %v9518_v0, %v6378_v25  ;;  %v9628_v51 = vadd.f32 %v6423_v48, %v10129_v60  ;;  %v6439_v24 = vadd.f32 %v9530_v17, %v6379_v11  ;;  %v10134_v0 = vld [vmem:[#allocation71_spill] sm:$0xff]  ;;  %v10136_v17 = vld [vmem:[#allocation5_spill] sm:$0xff]  ;;  %v10138_v43 = vld [vmem:[#allocation84_spill] sm:$0xff] }
 0x61d   : > { %v6483_v20 = vmul.f32 %v9357_v38, %v6450_v63  ;;  %v6466_v1 = vadd.f32 %v6433_v53, %v10130_v28  ;;  %v6468_v4 = vadd.f32 %v6435_v22, %v10131_v37  ;;  %v6396_v27 = vmul.f32 -inf, %v10132_v18  ;;  %v10141_v11 = vld [vmem:[#allocation55_spill] sm:$0xff]  ;;  %v10143_v57 = vld [vmem:[#allocation6_spill] sm:$0xff] }
 0x61e   : > { %v6484_v61 = vmul.f32 %v9357_v38, %v9447_v23  ;;  %v9638_v54 = vadd.f32 %v6437_v46, %v10133_v34  ;;  %v9641_v33 = vadd.f32 %v6439_v24, %v10134_v0  ;;  %v6412_v39 = vmul.f32 -inf, %v10135_v19  ;;  %v10142_v53 = vld [vmem:[#allocation47_spill] sm:$0xff]  ;;  %v10146_v34 = vld [vmem:[#allocation80_spill] sm:$0xff]  ;;  %v10147_v19 = vld [vmem:[#allocation50_spill] sm:$0xff] }
 0x61f   : > { %v6515_v35 = vadd.f32 %v6483_v20, %v10136_v17  ;;  %v6499_v16 = vmul.f32 %v9357_v38, %v6466_v1  ;;  %v6395_v45 = vmul.f32 -inf, %v10137_v36  ;;  %v6411_v48 = vmul.f32 -inf, %v10138_v43  ;;  %v10144_v28 = vld [vmem:[#allocation7_spill] sm:$0xff]  ;;  %v10148_v17 = vld [vmem:[#allocation44_spill] sm:$0xff] }
 0x620   : > { %v10139_v32 = vcombine.low %v9378_v14, %v9406_v59  ;;  %v10140_v8 = vcombine.low %v9390_v13, %v9426_v12  ;;  %v6397_v63 = vmul.f32 -inf, %v10141_v11  ;;  %v6398_v22 = vmul.f32 -inf, %v10142_v53  ;;  %v10145_v18 = vld [vmem:[#allocation79_spill] sm:$0xff]  ;;  %v10153_v53 = vld [vmem:[#allocation74_spill] sm:$0xff] }
 0x621   : > { %6547 = vxpose.xlu0.b32.cont [2/16] (narrow) %v6515_v35, 64  ;;  %v6531_v46 = vadd.f32 %v6499_v16, %v10143_v57  ;;  %v6500_v60 = vmul.f32 %v9357_v38, %v9460_v9  ;;  %v6425_v24 = vadd.f32 %v9539_v21, %v6108_v49  ;;  %v6441_v20 = vadd.f32 %v9543_v15, %v6380_v7  ;;  %v10149_v21 = vld [vmem:[#allocation82_spill] sm:$0xff]  ;;  %v10150_v15 = vld [vmem:[#allocation51_spill] sm:$0xff] }
 0x622   : > { %v6428_v23 = vadd.f32 %v6396_v27, %v10139_v32  ;;  %v6444_v25 = vadd.f32 %v6412_v39, %v10140_v8  ;;  %v6516_v1 = vadd.f32 %v6484_v61, %v10144_v28  ;;  %v6485_v37 = vmul.f32 %v9357_v38, %v6452_v2  ;;  %v10151_v2 = vld [vmem:[#allocation8_spill] sm:$0xff]  ;;  %v10152_v8 = vld [vmem:[#allocation61_spill] sm:$0xff] }
 0x623   : > { %v6413_v27 = vmul.f32 -inf, %v10145_v18  ;;  %v6414_v0 = vmul.f32 -inf, %v10146_v34  ;;  %6579 = vxpose.xlu1.b32.cont [2/16] (narrow) %v6531_v46, 64  ;;  %v9666_v39 = vadd.f32 %v6425_v24, %v10147_v19  ;;  %v9669_v35 = vadd.f32 %v6441_v20, %v10148_v17  ;;  %v10157_v20 = vld [vmem:[#allocation48_spill] sm:$0xff] }
 0x624   : > { %v6427_v9 = vadd.f32 %v6395_v45, %v6109_v31  ;;  %v6443_v16 = vadd.f32 %v6411_v48, %v6381_v40  ;;  %v6461_v49 = vadd.f32 %v6428_v23, %v10149_v21  ;;  %v6477_v7 = vadd.f32 %v6444_v25, %v10150_v15  ;;  %v10154_v40 = vld [vmem:[#allocation69_spill] sm:$0xff]  ;;  %v10155_v48 = vld [vmem:[#allocation78_spill] sm:$0xff] }
 0x625   : > { %v6429_v61 = vadd.f32 %v6397_v63, %v6110_v3  ;;  %v6445_v36 = vadd.f32 %v6413_v27, %v6382_v62  ;;  %6548 = vxpose.xlu0.b32.cont [3/16] (narrow) %v6516_v1, 64  ;;  %v6532_v43 = vadd.f32 %v6500_v60, %v10151_v2  ;;  %v6501_v32 = vmul.f32 %v9357_v38, %v6468_v4  ;;  %v10156_v62 = vld [vmem:[#allocation9_spill] sm:$0xff]  ;;  %v10159_v27 = vld [vmem:[#allocation11_spill] sm:$0xff] }
 0x626   : > { %v6460_v11 = vadd.f32 %v6427_v9, %v10152_v8  ;;  %v6476_v57 = vadd.f32 %v6443_v16, %v10153_v53  ;;  %v9678_v46 = vmul.f32 %v9357_v38, %v6461_v49  ;;  %v9681_v31 = vmul.f32 %v9357_v38, %v6477_v7  ;;  %v10158_v1 = vld [vmem:[#allocation81_spill] sm:$0xff]  ;;  %v10162_v49 = vld [vmem:[#allocation10_spill] sm:$0xff] }
 0x627   : > { %v6462_v45 = vadd.f32 %v6429_v61, %v10154_v40  ;;  %v6478_v3 = vadd.f32 %v6445_v36, %v10155_v48  ;;  %6580 = vxpose.xlu1.b32.cont [3/16] (narrow) %v6532_v43, 64  ;;  %v6517_v23 = vadd.f32 %v6485_v37, %v10156_v62  ;;  %v6486_v4 = vmul.f32 %v9357_v38, %v9451_v50  ;;  %v10168_v36 = vld [vmem:[#allocation12_spill] sm:$0xff]  ;;  %v10171_v40 = vld [vmem:[#allocation18_spill] sm:$0xff] }
 0x628   : > { %v6493_v25 = vmul.f32 %v9357_v38, %v6460_v11  ;;  %v6509_v63 = vmul.f32 %v9357_v38, %v6476_v57  ;;  %v6399_v28 = vmul.f32 -inf, %v10157_v20  ;;  %v6415_v18 = vmul.f32 -inf, %v10158_v1  ;;  %v10170_v11 = vld [vmem:[#allocation14_spill] sm:$0xff] }
 0x629   : > { %v9691_v60 = vmul.f32 %v9357_v38, %v6462_v45  ;;  %v9694_v24 = vmul.f32 %v9357_v38, %v6478_v3  ;;  %6549 = vxpose.xlu0.b32.cont [4/16] (narrow) %v6517_v23, 64  ;;  %v6533_v37 = vadd.f32 %v6501_v32, %v10159_v27  ;;  %v6502_v50 = vmul.f32 %v9357_v38, %v9501_v52  ;;  %v10169_v32 = vld [vmem:[#allocation16_spill] sm:$0xff] }
 0x62a   : > { %v10160_v34 = vcombine.high %v9378_v14, %v9406_v59  ;;  %v10161_v17 = vcombine.high %v9390_v13, %v9426_v12  ;;  %v6431_v16 = vadd.f32 %v6399_v28, %v6111_v6  ;;  %v6447_v21 = vadd.f32 %v6415_v18, %v6383_v42  ;;  %v10163_v14 = vld [vmem:[#allocation72_spill] sm:$0xff]  ;;  %v10165_v13 = vld [vmem:[#allocation46_spill] sm:$0xff] }
 0x62b   : > { %6581 = vxpose.xlu1.b32.cont [4/16] (narrow) %v6533_v37, 64  ;;  %v6518_v15 = vadd.f32 %v6486_v4, %v10162_v49  ;;  %v6487_v52 = vmul.f32 %v9357_v38, %v9624_v10  ;;  %v6534_v44 = vadd.f32 %v6502_v50, %v10167_v56  ;;  %v6503_v55 = vmul.f32 %v9357_v38, %v9638_v54  ;;  %v10182_v49 = vld [vmem:[#allocation24_spill] sm:$0xff] }
 0x62c   : > { %v6430_v19 = vadd.f32 %v6398_v22, %v10160_v34  ;;  %v6446_v9 = vadd.f32 %v6414_v0, %v10161_v17  ;;  %v10164_v22 = vld [vmem:[#allocation62_spill] sm:$0xff]  ;;  %v6464_v12 = vadd.f32 %v6431_v16, %v10165_v13  ;;  %v10166_v0 = vld [vmem:[#allocation83_spill] sm:$0xff]  ;;  %v6488_v43 = vmul.f32 %v9357_v38, %v9455_v47  ;;  %v10178_v34 = vld [vmem:[#allocation20_spill] sm:$0xff] }
 0x62d   : > { %v6480_v61 = vadd.f32 %v6447_v21, %v10166_v0  ;;  %6550 = vxpose.xlu0.b32.cont [5/16] (narrow) %v6518_v15, 64  ;;  %v6519_v2 = vadd.f32 %v6487_v52, %v10168_v36  ;;  %v6535_v8 = vadd.f32 %v6503_v55, %v10169_v32  ;;  %v6504_v54 = vmul.f32 %v9357_v38, %v9509_v26  ;;  %v10172_v47 = vld [vmem:[#allocation15_spill] sm:$0xff]  ;;  %v10173_v26 = vld [vmem:[#allocation21_spill] sm:$0xff] }
 0x62e   : > { %v6463_v59 = vadd.f32 %v6430_v19, %v10163_v14  ;;  %v6479_v7 = vadd.f32 %v6446_v9, %v10164_v22  ;;  %v6497_v42 = vmul.f32 %v9357_v38, %v6464_v12  ;;  %v6520_v53 = vadd.f32 %v6488_v43, %v10170_v11  ;;  %v10180_v9 = vld [vmem:[#allocation22_spill] sm:$0xff]  ;;  %v10184_v52 = vld [vmem:[#allocation25_spill] sm:$0xff] }
 0x62f   : > { %v6513_v10 = vmul.f32 %v9357_v38, %v6480_v61  ;;  %6582 = vxpose.xlu1.b32.cont [5/16] (narrow) %v6534_v44, 64  ;;  %v6489_v57 = vmul.f32 %v9357_v38, %v9628_v51  ;;  %v6536_v45 = vadd.f32 %v6504_v54, %v10171_v40  ;;  %v6505_v48 = vmul.f32 %v9357_v38, %v9641_v33  ;;  %v10174_v51 = vld [vmem:[#allocation17_spill] sm:$0xff]  ;;  %v10175_v33 = vld [vmem:[#allocation23_spill] sm:$0xff]  ;;  %v10189_v12 = vld [vmem:[#allocation34_spill] sm:$0xff] }
 0x630   : > { %v6496_v6 = vmul.f32 %v9357_v38, %v6463_v59  ;;  %v6512_v58 = vmul.f32 %v9357_v38, %v6479_v7  ;;  %v6490_v62 = vmul.f32 %v9357_v38, %v9533_v5  ;;  %v6506_v4 = vmul.f32 %v9357_v38, %v9536_v29  ;;  %v10176_v5 = vld [vmem:[#allocation19_spill] sm:$0xff]  ;;  %v10177_v29 = vld [vmem:[#allocation26_spill] sm:$0xff]  ;;  %v10187_v22 = vld [vmem:[#allocation33_spill] sm:$0xff] }
 0x631   : > { %6551 = vxpose.xlu0.b32.cont [6/16] (narrow) %v6519_v2, 64  ;;  %v6521_v3 = vadd.f32 %v6489_v57, %v10172_v47  ;;  %v6537_v23 = vadd.f32 %v6505_v48, %v10173_v26  ;;  %v6491_v28 = vmul.f32 %v9357_v38, %v9666_v39  ;;  %v6507_v18 = vmul.f32 %v9357_v38, %v9669_v35  ;;  %v10179_v39 = vld [vmem:[#allocation28_spill] sm:$0xff]  ;;  %v10181_v35 = vld [vmem:[#allocation30_spill] sm:$0xff]  ;;  %v10186_v59 = vld [vmem:[#allocation27_spill] sm:$0xff] }
 0x632   : > { %v6522_v20 = vadd.f32 %v6490_v62, %v10174_v51  ;;  %v6538_v1 = vadd.f32 %v6506_v4, %v10175_v33  ;;  %v6492_v37 = vmul.f32 %v9357_v38, %v9546_v41  ;;  %v6540_v17 = vadd.f32 %v9569_v30, %v10179_v39  ;;  %v10183_v41 = vld [vmem:[#allocation31_spill] sm:$0xff]  ;;  %v10185_v30 = vld [vmem:[#allocation32_spill] sm:$0xff] }
 0x633   : > { %6583 = vxpose.xlu1.b32.cont [6/16] (narrow) %v6535_v8, 64  ;;  %v6523_v27 = vadd.f32 %v6491_v28, %v10176_v5  ;;  %v6539_v50 = vadd.f32 %v6507_v18, %v10177_v29  ;;  %v6525_v16 = vadd.f32 %v6493_v25, %v10180_v9  ;;  %v6541_v21 = vadd.f32 %v6509_v63, %v10181_v35 }
 0x634   : > { %v6524_v19 = vadd.f32 %v6492_v37, %v10178_v34  ;;  %v6526_v38 = vadd.f32 %v9678_v46, %v10182_v49  ;;  %v6542_v15 = vadd.f32 %v9681_v31, %v10183_v41  ;;  %v6527_v14 = vadd.f32 %v9691_v60, %v10184_v52  ;;  %v10188_v46 = vld [vmem:[#allocation29_spill] sm:$0xff] }
 0x635   : > { %6552 = vxpose.xlu0.b32.cont [7/16] (narrow) %v6520_v53, 64  ;;  %v6543_v25 = vadd.f32 %v9694_v24, %v10185_v30  ;;  %v6528_v63 = vadd.f32 %v6496_v6, %v10186_v59  ;;  %v6544_v7 = vadd.f32 %v6512_v58, %v10187_v22  ;;  %v6529_v13 = vadd.f32 %v6497_v42, %v10188_v46 }
 0x636   : > { %v6545_v31 = vadd.f32 %v6513_v10, %v10189_v12 }
 0x637   : > { %6584 = vxpose.xlu1.b32.cont [7/16] (narrow) %v6536_v45, 64 }
 0x639   : > { %6553 = vxpose.xlu0.b32.cont [8/16] (narrow) %v6521_v3, 64 }
 0x63b   : > { %6585 = vxpose.xlu1.b32.cont [8/16] (narrow) %v6537_v23, 64 }
 0x63d   : > { %6554 = vxpose.xlu0.b32.cont [9/16] (narrow) %v6522_v20, 64 }
 0x63f   : > { %6586 = vxpose.xlu1.b32.cont [9/16] (narrow) %v6538_v1, 64 }
 0x641   : > { %6555 = vxpose.xlu0.b32.cont [10/16] (narrow) %v6523_v27, 64 }
 0x643   : > { %6587 = vxpose.xlu1.b32.cont [10/16] (narrow) %v6539_v50, 64 }
 0x645   : > { %6556 = vxpose.xlu0.b32.cont [11/16] (narrow) %v6524_v19, 64 }
 0x647   : > { %6588 = vxpose.xlu1.b32.cont [11/16] (narrow) %v6540_v17, 64 }
 0x649   : > { %6557 = vxpose.xlu0.b32.cont [12/16] (narrow) %v6525_v16, 64 }
 0x64b   : > { %6589 = vxpose.xlu1.b32.cont [12/16] (narrow) %v6541_v21, 64 }
 0x64d   : > { %6558 = vxpose.xlu0.b32.cont [13/16] (narrow) %v6526_v38, 64 }
 0x64f   : > { %6590 = vxpose.xlu1.b32.cont [13/16] (narrow) %v6542_v15, 64 }
 0x651   : > { %6559 = vxpose.xlu0.b32.cont [14/16] (narrow) %v6527_v14, 64 }
 0x653   : > { %6591 = vxpose.xlu1.b32.cont [14/16] (narrow) %v6543_v25, 64 }
 0x655   : > { %6560 = vxpose.xlu0.b32.cont [15/16] (narrow) %v6528_v63, 64 }
 0x657   : > { %6592 = vxpose.xlu1.b32.cont [15/16] (narrow) %v6544_v7, 64 }
 0x659   : > { %6561 = vxpose.xlu0.b32.end [16/16] (narrow) %v6529_v13, 64 }
 0x65b   : > { %6593 = vxpose.xlu1.b32.end [16/16] (narrow) %v6545_v31, 64 }
 0x69d   : > { %v6562_v60 = vpop.trf.xlu0 }
 0x69e   : > { %6610 = vst [vmem:[%s9777_s24] sm:$0xff] %v6562_v60 }
 0x69f   : > { %v6594_v24 = vpop.trf.xlu1 }
 0x6a0   : > { %6611 = vst [vmem:[%s9777_s24 + $0x8] sm:$0xff] %v6594_v24 }
 0x6a1   : > { %v6563_v0 = vpop.trf.xlu0 }
 0x6a2   : > { %6612 = vst [vmem:[%s9777_s24 + $0x10] sm:$0xff] %v6563_v0 }
 0x6a3   : > { %v6595_v61 = vpop.trf.xlu1 }
 0x6a4   : > { %6613 = vst [vmem:[%s9777_s24 + $0x18] sm:$0xff] %v6595_v61 }
 0x6a5   : > { %v6564_v56 = vpop.trf.xlu0 }
 0x6a6   : > { %6614 = vst [vmem:[%s9777_s24 + $0x20] sm:$0xff] %v6564_v56 }
 0x6a7   : > { %v6596_v44 = vpop.trf.xlu1 }
 0x6a8   : > { %6615 = vst [vmem:[%s9777_s24 + $0x28] sm:$0xff] %v6596_v44 }
 0x6a9   : > { %v6565_v55 = vpop.trf.xlu0 }
 0x6aa   : > { %6616 = vst [vmem:[%s9777_s24 + $0x30] sm:$0xff] %v6565_v55 }
 0x6ab   : > { %v6597_v6 = vpop.trf.xlu1 }
 0x6ac   : > { %6617 = vst [vmem:[%s9777_s24 + $0x38] sm:$0xff] %v6597_v6 }
 0x6ad   : > { %v6566_v58 = vpop.trf.xlu0 }
 0x6ae   : > { %6618 = vst [vmem:[%s9777_s24 + $0x40] sm:$0xff] %v6566_v58 }
 0x6af   : > { %v6598_v42 = vpop.trf.xlu1 }
 0x6b0   : > { %6619 = vst [vmem:[%s9777_s24 + $0x48] sm:$0xff] %v6598_v42 }
 0x6b1   : > { %v6567_v10 = vpop.trf.xlu0 }
 0x6b2   : > { %6620 = vst [vmem:[%s9777_s24 + $0x50] sm:$0xff] %v6567_v10 }
 0x6b3   : > { %v6599_v36 = vpop.trf.xlu1 }
 0x6b4   : > { %6621 = vst [vmem:[%s9777_s24 + $0x58] sm:$0xff] %v6599_v36 }
 0x6b5   : > { %v6568_v2 = vpop.trf.xlu0 }
 0x6b6   : > { %6622 = vst [vmem:[%s9777_s24 + $0x60] sm:$0xff] %v6568_v2 }
 0x6b7   : > { %v6600_v43 = vpop.trf.xlu1 }
 0x6b8   : > { %6623 = vst [vmem:[%s9777_s24 + $0x68] sm:$0xff] %v6600_v43 }
 0x6b9   : > { %v6569_v32 = vpop.trf.xlu0 }
 0x6ba   : > { %6624 = vst [vmem:[%s9777_s24 + $0x70] sm:$0xff] %v6569_v32 }
 0x6bb   : > { %v6601_v8 = vpop.trf.xlu1 }
 0x6bc   : > { %6625 = vst [vmem:[%s9777_s24 + $0x78] sm:$0xff] %v6601_v8 }
 0x6bd PF: > { %s15_s17 = sadd.s32 1, %s7498_s17  }
 0x6be   : > { %p12_p4 = scmp.ge.s32.totalorder %s15_s17, 4  }
 0x6c0   :  { %14 = sbr.rel (!%p12_p4) target bundleno = 2 (0x2), region = 66 }

</bundles_post_ra>
